<compile_context>
chip_gen: v5e
topology: v5e:2x2
jax: 0.10.0
libtpu: 0.0.40
codegen_flags: <defaults>
</compile_context>

<pallas_src>
import functools

import jax
import jax.numpy as jnp
from jax.experimental import pallas as pl
from jax.experimental.pallas import tpu as pltpu


# ---------------------------------------------------------------------------
# 1x1 convs as matmuls over the channel dim (MXU), emitting bf16 directly.
# ---------------------------------------------------------------------------
def _conv_cm_kernel(x_ref, w_ref, o_ref):
    # x: (c, N), w: (out_ch, c) -> o: (out_ch, N)  channel-major, lane-dense N.
    o_ref[...] = jnp.dot(w_ref[...], x_ref[...],
                         preferred_element_type=jnp.float32).astype(o_ref.dtype)


def conv1x1_cm(x, w):
    """x: (b, c, N) f32, w: (out_ch, c) f32 -> (b, out_ch, N) bf16."""
    b, c, n = x.shape
    out_ch = w.shape[0]
    return pl.pallas_call(
        _conv_cm_kernel,
        out_shape=jax.ShapeDtypeStruct((b, out_ch, n), jnp.bfloat16),
        grid=(b,),
        in_specs=[pl.BlockSpec((None, c, n), lambda i: (i, 0, 0)),
                  pl.BlockSpec((out_ch, c), lambda i: (0, 0))],
        out_specs=pl.BlockSpec((None, out_ch, n), lambda i: (i, 0, 0)),
        compiler_params=pltpu.CompilerParams(
            dimension_semantics=("parallel",)),
    )(x, w)


def _conv_kv_kernel(x_ref, w_ref, o_ref):
    # x: (c, N), w: (c, D) -> o: (N, D)  keys on sublanes for cheap band slicing.
    o_ref[...] = jax.lax.dot_general(
        x_ref[...], w_ref[...], (((0,), (0,)), ((), ())),
        preferred_element_type=jnp.float32).astype(o_ref.dtype)


def conv1x1_kv(x, w_heads):
    """x: (2b, c, N) f32, w_heads: (heads, c, D) f32 -> (2b, heads, N, D) bf16."""
    b2, c, n = x.shape
    heads, _, d = w_heads.shape
    return pl.pallas_call(
        _conv_kv_kernel,
        out_shape=jax.ShapeDtypeStruct((b2, heads, n, d), jnp.bfloat16),
        grid=(b2, heads),
        in_specs=[pl.BlockSpec((None, c, n), lambda i, j: (i, 0, 0)),
                  pl.BlockSpec((None, c, d), lambda i, j: (j, 0, 0))],
        out_specs=pl.BlockSpec((None, None, n, d), lambda i, j: (i, j, 0, 0)),
        compiler_params=pltpu.CompilerParams(
            dimension_semantics=("parallel", "parallel")),
    )(x, w_heads)


# ---------------------------------------------------------------------------
# Banded local-window attention: grid = (batch, heads, query-row-tiles).
# ---------------------------------------------------------------------------
def _sasa_attn_kernel(q_ref, kv_ref, mask_ref, o_ref, *, tile_rows, w, wp, ksize):
    # q_ref   : (D, X)        X = tile_rows*w, bf16, channel-major (lane = X)
    # kv_ref  : (2, HpWp, D)  both kv branches (k == v in SASA), bf16
    # mask_ref: (X, 2*Y)      Y = (tile_rows+K-1)*Wp, per-tile additive mask
    # o_ref   : (D, X)        f32, lane-dense output block
    r = pl.program_id(2)
    band = (tile_rows + ksize - 1) * wp
    start = pl.multiple_of(r * tile_rows * wp, 8)      # 8-aligned sublane slice

    q = q_ref[...]                                                    # (D, X)
    kv_band = jnp.concatenate(
        [kv_ref[0, pl.ds(start, band), :],
         kv_ref[1, pl.ds(start, band), :]], axis=0)                   # (2Y, D)

    # One fused logits matmul over both kv branches (MXU, f32 accumulate),
    # plus the tiny static window mask.
    logits = jax.lax.dot_general(
        q, kv_band, (((0,), (1,)), ((), ())),
        preferred_element_type=jnp.float32) + mask_ref[...]           # (X, 2Y)

    # Per-branch softmax (max / denom on each half -- correctness when fused),
    # the /2 two-branch average folded into the EUP reciprocal, and p
    # pre-scaled so ONE matmul finishes both branches.
    l1, l2 = logits[:, :band], logits[:, band:]
    p1 = jnp.exp(l1 - jnp.max(l1, axis=-1, keepdims=True))
    p2 = jnp.exp(l2 - jnp.max(l2, axis=-1, keepdims=True))
    inv1 = pl.reciprocal(jnp.sum(p1, axis=-1, keepdims=True) * 2.0, approx=True)
    inv2 = pl.reciprocal(jnp.sum(p2, axis=-1, keepdims=True) * 2.0, approx=True)
    p = jnp.concatenate([p1 * inv1, p2 * inv2], axis=1).astype(jnp.bfloat16)

    # out^T = kv_band^T @ p^T -> (D, X): lane-dense store, already in the
    # final PyTorch 'b (n d) h w' channel layout.
    o_ref[...] = jax.lax.dot_general(
        kv_band, p, (((0,), (1,)), ((), ())),
        preferred_element_type=jnp.float32).astype(o_ref.dtype)


def sasa_attention(q, kv, mask, *, tile_rows, w, wp, ksize):
    """q: (b, n, D, HW) bf16, kv: (b, 2, n, HpWp, D) bf16 -> (b, n, D, HW) f32."""
    b, heads, d, hw = q.shape
    hpwp = kv.shape[3]
    x = tile_rows * w
    n_row_tiles = hw // x
    kern = functools.partial(_sasa_attn_kernel, tile_rows=tile_rows, w=w,
                             wp=wp, ksize=ksize)
    return pl.pallas_call(
        kern,
        out_shape=jax.ShapeDtypeStruct((b, heads, d, hw), jnp.float32),
        grid=(b, heads, n_row_tiles),
        in_specs=[
            pl.BlockSpec((None, None, d, x), lambda i, j, r: (i, j, 0, r)),
            pl.BlockSpec((None, 2, None, hpwp, d), lambda i, j, r: (i, 0, j, 0, 0)),
            pl.BlockSpec(mask.shape, lambda i, j, r: (0, 0)),
        ],
        out_specs=pl.BlockSpec((None, None, d, x), lambda i, j, r: (i, j, 0, r)),
        compiler_params=pltpu.CompilerParams(
            dimension_semantics=("parallel", "parallel", "parallel"),
            # Explicit budget (v7x: 64 MiB physical / 32 MiB default scoped);
            # per-step blocks here are well under 1 MiB.
            vmem_limit_bytes=32 * 1024 * 1024),
    )(q, kv, mask)


def _band_mask(tile_rows, w, wp, ksize):
    """(X, 2Y) additive mask: 0 inside each query's KxK window, -1e30 outside.
    Identical for every row tile / head / batch -> a tiny per-tile constant."""
    band_rows = tile_rows + ksize - 1
    qy = jnp.repeat(jnp.arange(tile_rows), w)
    qx = jnp.tile(jnp.arange(w), tile_rows)
    ky = jnp.repeat(jnp.arange(band_rows), wp)
    kx = jnp.tile(jnp.arange(wp), band_rows)
    dy = ky[None, :] - qy[:, None]
    dx = kx[None, :] - qx[:, None]
    valid = (dy >= 0) & (dy < ksize) & (dx >= 0) & (dx < ksize)
    m = jnp.where(valid, 0.0, -1e30).astype(jnp.float32)
    return jnp.concatenate([m, m], axis=1)       # same mask for both kv branches


# ---------------------------------------------------------------------------
# Full SASA forward (thin glue + Pallas kernels)
# ---------------------------------------------------------------------------
def sasa_forward(kvmap1, qmap, kvmap2, wq, wkv, *, heads, dim_head, kernel_size):
    """Matches SASA.forward. NCHW fp32 inputs; output (b, heads*dim_head, h, w)."""
    b, c, h, w = qmap.shape
    K = kernel_size
    hp, wp = h + K - 1, w + K - 1
    d = dim_head
    out_ch = heads * d
    scale = d ** (-0.5)

    # Query-row tile: 8 rows when that keeps the output block lane-dense,
    # otherwise fall back to one tile (full height).
    tile_rows = 8 if (h % 8 == 0 and (8 * w) % 128 == 0) else h
    # TODO(synk): general ragged-h support would pad the last row tile.

    pad = lambda t: jnp.pad(
        t, ((0, 0), (0, 0), (K // 2, (K - 1) // 2), (K // 2, (K - 1) // 2)))

    # Conv inputs: NCHW is already channel-major, so these reshapes are free.
    xq = qmap.reshape(b, c, h * w)
    xkv = jnp.stack([pad(kvmap1), pad(kvmap2)], axis=1).reshape(b * 2, c, hp * wp)

    wq2 = wq.reshape(out_ch, c) * scale                            # scale folded
    wkv2 = jnp.transpose(wkv.reshape(heads, d, c), (0, 2, 1))      # (heads, c, d)

    # 1x1 convs emit bf16 directly, already in the attention-kernel layouts.
    q = conv1x1_cm(xq, wq2).reshape(b, heads, d, h * w)
    kv = conv1x1_kv(xkv, wkv2).reshape(b, 2, heads, hp * wp, d)

    mask = _band_mask(tile_rows, w, wp, K)

    out = sasa_attention(q, kv, mask, tile_rows=tile_rows, w=w, wp=wp, ksize=K)
    return out.reshape(b, out_ch, h, w)


# ---------------------------------------------------------------------------
# Pure-JAX reference (mirrors the PyTorch unfold-based code) for verification
# ---------------------------------------------------------------------------
def sasa_reference(kvmap1, qmap, kvmap2, wq, wkv, *, heads, dim_head, kernel_size):
    b, c, h, w = qmap.shape
    K = kernel_size
    scale = dim_head ** (-0.5)
    W2q = wq.reshape(heads * dim_head, c)
    W2kv = wkv.reshape(heads * dim_head, c)
    conv = lambda x, W: jnp.einsum('bchw,oc->bohw', x, W)
    pad = lambda x: jnp.pad(
        x, ((0, 0), (0, 0), (K // 2, (K - 1) // 2), (K // 2, (K - 1) // 2)))

    q = conv(qmap, W2q).reshape(b, heads, dim_head, h * w)
    q = jnp.transpose(q, (0, 1, 3, 2)) * scale            # (b, n, x, d)

    def branch(kvmap):
        kp = conv(pad(kvmap), W2kv)                       # (b, nd, Hp, Wp)
        kk = jnp.stack([kp[:, :, dy:dy + h, dx:dx + w]
                        for dy in range(K) for dx in range(K)], axis=-1)
        kk = kk.reshape(b, heads, dim_head, h * w, K * K)
        kk = jnp.transpose(kk, (0, 1, 3, 4, 2))           # (b, n, x, y, d)
        logits = jnp.einsum('bnxd,bnxyd->bnxy', q, kk)
        wts = jax.nn.softmax(logits, axis=-1)
        return jnp.einsum('bnxy,bnxyd->bnxd', wts, kk)

    out = (branch(kvmap1) + branch(kvmap2)) / 2.0         # (b, n, x, d)
    out = jnp.transpose(out, (0, 1, 3, 2)).reshape(b, heads * dim_head, h, w)
    return out


# ---------------------------------------------------------------------------
if __name__ == "__main__":
    B, C, H, W = 2, 4, 16, 16
    HEADS, DIM_HEAD, KSIZE = 2, 32, 3

    key = jax.random.PRNGKey(0)
    k0, k1, k2, k3, k4 = jax.random.split(key, 5)
    kvmap1 = jax.random.normal(k0, (B, C, H, W), jnp.float32)
    qmap = jax.random.normal(k1, (B, C, H, W), jnp.float32)
    kvmap2 = jax.random.normal(k2, (B, C, H, W), jnp.float32)
    # Conv2d(in, out, 1, bias=False) weights: (out, in, 1, 1)
    wq = jax.random.normal(k3, (HEADS * DIM_HEAD, C, 1, 1), jnp.float32) * 0.1
    wkv = jax.random.normal(k4, (HEADS * DIM_HEAD, C, 1, 1), jnp.float32) * 0.1

    fwd = jax.jit(functools.partial(
        sasa_forward, heads=HEADS, dim_head=DIM_HEAD, kernel_size=KSIZE))
    out = jax.block_until_ready(fwd(kvmap1, qmap, kvmap2, wq, wkv))

    ref = sasa_reference(kvmap1, qmap, kvmap2, wq, wkv,
                         heads=HEADS, dim_head=DIM_HEAD, kernel_size=KSIZE)
    assert out.shape == (B, HEADS * DIM_HEAD, H, W), out.shape
    # Tolerance covers the bf16 MXU operands + EUP approx reciprocal
    # (per perf review; expected max error well under 1e-3 at these scales).
    max_err = float(jnp.max(jnp.abs(out - ref)))
    assert jnp.allclose(out, ref, rtol=2e-3, atol=2e-3), max_err

    print("KERNEL_OK")
</pallas_src>

<mosaic_0001>
module attributes {stable_mosaic.version = 11 : i64} {
  func.func @_conv_cm_kernel(%arg0: i32, %arg1: memref<1x4x256xf32, #tpu.memory_space<vmem>>, %arg2: memref<64x4xf32, #tpu.memory_space<vmem>>, %arg3: memref<1x64x256xbf16, #tpu.memory_space<vmem>>) attributes {dimension_semantics = [#tpu.dimension_semantics<parallel>], iteration_bounds = array<i64: 2>, scalar_prefetch = 0 : i64, scratch_operands = 0 : i64, tpu.core_type = #tpu.core_type<tc>, window_params = [{transform_indices = @transform_0, window_bounds = array<i64: 1, 4, 256>}, {pipeline_mode = #tpu.pipeline_mode<synchronous>, transform_indices = @transform_1, window_bounds = array<i64: 64, 4>}, {transform_indices = @transform_2, window_bounds = array<i64: 1, 64, 256>}]} {
    %c0 = arith.constant 0 : index
    %c0_0 = arith.constant 0 : index
    %0 = vector.load %arg2[%c0, %c0_0] : memref<64x4xf32, #tpu.memory_space<vmem>>, vector<64x4xf32>
    %c0_1 = arith.constant 0 : index
    %c0_2 = arith.constant 0 : index
    %c0_3 = arith.constant 0 : index
    %1 = vector.load %arg1[%c0_1, %c0_2, %c0_3] : memref<1x4x256xf32, #tpu.memory_space<vmem>>, vector<1x4x256xf32>
    %2 = vector.shape_cast %1 : vector<1x4x256xf32> to vector<4x256xf32>
    %cst = arith.constant dense<0.000000e+00> : vector<64x256xf32>
    %3 = tpu.matmul %0, %2, %cst {dimension_numbers = #tpu.dot_dimension_numbers<[1], [0], [0], [1], [0, 0, 1, 1], [], []>} : vector<64x4xf32>, vector<4x256xf32>, vector<64x256xf32> -> vector<64x256xf32>
    %4 = arith.truncf %3 : vector<64x256xf32> to vector<64x256xbf16>
    %c0_4 = arith.constant 0 : index
    %c0_5 = arith.constant 0 : index
    %c0_6 = arith.constant 0 : index
    %5 = vector.load %arg3[%c0_4, %c0_5, %c0_6] : memref<1x64x256xbf16, #tpu.memory_space<vmem>>, vector<1x64x256xbf16>
    %6 = vector.shape_cast %5 : vector<1x64x256xbf16> to vector<64x256xbf16>
    %7 = vector.shape_cast %4 : vector<64x256xbf16> to vector<1x64x256xbf16>
    tpu.vector_store %arg3[%c0_4, %c0_5, %c0_6], %7 {strides = array<i32>} : memref<1x64x256xbf16, #tpu.memory_space<vmem>>, vector<1x64x256xbf16>,
    return
  }
  func.func @transform_0(%arg0: i32) -> (i32, i32, i32) {
    %c0_i32 = arith.constant 0 : i32
    %c0_i32_0 = arith.constant 0 : i32
    %c0_i32_1 = arith.constant 0 : i32
    return %arg0, %c0_i32, %c0_i32_0 : i32, i32, i32
  }
  func.func @transform_1(%arg0: i32) -> (i32, i32) {
    %c0_i32 = arith.constant 0 : i32
    %c0_i32_0 = arith.constant 0 : i32
    %c0_i32_1 = arith.constant 0 : i32
    return %c0_i32, %c0_i32_0 : i32, i32
  }
  func.func @transform_2(%arg0: i32) -> (i32, i32, i32) {
    %c0_i32 = arith.constant 0 : i32
    %c0_i32_0 = arith.constant 0 : i32
    %c0_i32_1 = arith.constant 0 : i32
    return %arg0, %c0_i32, %c0_i32_0 : i32, i32, i32
  }
}

module attributes {stable_mosaic.version = 11 : i64} {
  func.func @_conv_kv_kernel(%arg0: i32, %arg1: i32, %arg2: memref<1x4x324xf32, #tpu.memory_space<vmem>>, %arg3: memref<1x4x32xf32, #tpu.memory_space<vmem>>, %arg4: memref<1x1x324x32xbf16, #tpu.memory_space<vmem>>) attributes {dimension_semantics = [#tpu.dimension_semantics<parallel>, #tpu.dimension_semantics<parallel>], iteration_bounds = array<i64: 4, 2>, scalar_prefetch = 0 : i64, scratch_operands = 0 : i64, tpu.core_type = #tpu.core_type<tc>, window_params = [{transform_indices = @transform_0, window_bounds = array<i64: 1, 4, 324>}, {transform_indices = @transform_1, window_bounds = array<i64: 1, 4, 32>}, {transform_indices = @transform_2, window_bounds = array<i64: 1, 1, 324, 32>}]} {
    %c0 = arith.constant 0 : index
    %c0_0 = arith.constant 0 : index
    %c0_1 = arith.constant 0 : index
    %0 = vector.load %arg2[%c0, %c0_0, %c0_1] : memref<1x4x324xf32, #tpu.memory_space<vmem>>, vector<1x4x324xf32>
    %1 = vector.shape_cast %0 : vector<1x4x324xf32> to vector<4x324xf32>
    %c0_2 = arith.constant 0 : index
    %c0_3 = arith.constant 0 : index
    %c0_4 = arith.constant 0 : index
    %2 = vector.load %arg3[%c0_2, %c0_3, %c0_4] : memref<1x4x32xf32, #tpu.memory_space<vmem>>, vector<1x4x32xf32>
    %3 = vector.shape_cast %2 : vector<1x4x32xf32> to vector<4x32xf32>
    %cst = arith.constant dense<0.000000e+00> : vector<324x32xf32>
    %4 = tpu.matmul %1, %3, %cst {dimension_numbers = #tpu.dot_dimension_numbers<[0], [0], [1], [1], [0, 1, 1, 1], [], []>} : vector<4x324xf32>, vector<4x32xf32>, vector<324x32xf32> -> vector<324x32xf32>
    %5 = arith.truncf %4 : vector<324x32xf32> to vector<324x32xbf16>
    %c0_5 = arith.constant 0 : index
    %c0_6 = arith.constant 0 : index
    %c0_7 = arith.constant 0 : index
    %c0_8 = arith.constant 0 : index
    %6 = vector.load %arg4[%c0_5, %c0_6, %c0_7, %c0_8] : memref<1x1x324x32xbf16, #tpu.memory_space<vmem>>, vector<1x1x324x32xbf16>
    %7 = vector.shape_cast %6 : vector<1x1x324x32xbf16> to vector<324x32xbf16>
    %8 = vector.shape_cast %5 : vector<324x32xbf16> to vector<1x1x324x32xbf16>
    tpu.vector_store %arg4[%c0_5, %c0_6, %c0_7, %c0_8], %8 {strides = array<i32>} : memref<1x1x324x32xbf16, #tpu.memory_space<vmem>>, vector<1x1x324x32xbf16>,
    return
  }
  func.func @transform_0(%arg0: i32, %arg1: i32) -> (i32, i32, i32) {
    %c0_i32 = arith.constant 0 : i32
    %c0_i32_0 = arith.constant 0 : i32
    %c0_i32_1 = arith.constant 0 : i32
    return %arg0, %c0_i32, %c0_i32_0 : i32, i32, i32
  }
  func.func @transform_1(%arg0: i32, %arg1: i32) -> (i32, i32, i32) {
    %c0_i32 = arith.constant 0 : i32
    %c0_i32_0 = arith.constant 0 : i32
    %c0_i32_1 = arith.constant 0 : i32
    return %arg1, %c0_i32, %c0_i32_0 : i32, i32, i32
  }
  func.func @transform_2(%arg0: i32, %arg1: i32) -> (i32, i32, i32, i32) {
    %c0_i32 = arith.constant 0 : i32
    %c0_i32_0 = arith.constant 0 : i32
    %c0_i32_1 = arith.constant 0 : i32
    return %arg0, %arg1, %c0_i32, %c0_i32_0 : i32, i32, i32, i32
  }
}

module attributes {stable_mosaic.version = 11 : i64} {
  func.func @_sasa_attn_kernel(%arg0: i32, %arg1: i32, %arg2: i32, %arg3: memref<1x1x32x128xbf16, #tpu.memory_space<vmem>>, %arg4: memref<1x2x1x324x32xbf16, #tpu.memory_space<vmem>>, %arg5: memref<128x360xf32, #tpu.memory_space<vmem>>, %arg6: memref<1x1x32x128xf32, #tpu.memory_space<vmem>>) attributes {dimension_semantics = [#tpu.dimension_semantics<parallel>, #tpu.dimension_semantics<parallel>, #tpu.dimension_semantics<parallel>], iteration_bounds = array<i64: 2, 2, 2>, scalar_prefetch = 0 : i64, scratch_operands = 0 : i64, tpu.core_type = #tpu.core_type<tc>, window_params = [{transform_indices = @transform_0, window_bounds = array<i64: 1, 1, 32, 128>}, {transform_indices = @transform_1, window_bounds = array<i64: 1, 2, 1, 324, 32>}, {pipeline_mode = #tpu.pipeline_mode<synchronous>, transform_indices = @transform_2, window_bounds = array<i64: 128, 360>}, {transform_indices = @transform_3, window_bounds = array<i64: 1, 1, 32, 128>}]} {
    %c8_i32 = arith.constant 8 : i32
    %0 = arith.muli %arg2, %c8_i32 : i32
    %c18_i32 = arith.constant 18 : i32
    %1 = arith.muli %0, %c18_i32 : i32
    %2 = tpu.assume_multiple %1, 8 : i32
    %c0 = arith.constant 0 : index
    %c0_0 = arith.constant 0 : index
    %c0_1 = arith.constant 0 : index
    %c0_2 = arith.constant 0 : index
    %3 = vector.load %arg3[%c0, %c0_0, %c0_1, %c0_2] : memref<1x1x32x128xbf16, #tpu.memory_space<vmem>>, vector<1x1x32x128xbf16>
    %4 = vector.shape_cast %3 : vector<1x1x32x128xbf16> to vector<32x128xbf16>
    %c0_3 = arith.constant 0 : index
    %c0_4 = arith.constant 0 : index
    %c0_5 = arith.constant 0 : index
    %5 = arith.index_cast %2 : i32 to index
    %c0_6 = arith.constant 0 : index
    %6 = vector.load %arg4[%c0_3, %c0_4, %c0_5, %5, %c0_6] : memref<1x2x1x324x32xbf16, #tpu.memory_space<vmem>>, vector<1x1x1x180x32xbf16>
    %7 = vector.shape_cast %6 : vector<1x1x1x180x32xbf16> to vector<180x32xbf16>
    %c0_7 = arith.constant 0 : index
    %c1 = arith.constant 1 : index
    %c0_8 = arith.constant 0 : index
    %8 = arith.index_cast %2 : i32 to index
    %c0_9 = arith.constant 0 : index
    %9 = vector.load %arg4[%c0_7, %c1, %c0_8, %8, %c0_9] : memref<1x2x1x324x32xbf16, #tpu.memory_space<vmem>>, vector<1x1x1x180x32xbf16>
    %10 = vector.shape_cast %9 : vector<1x1x1x180x32xbf16> to vector<180x32xbf16>
    %11 = tpu.concatenate %7, %10 in 0 : vector<180x32xbf16>, vector<180x32xbf16> -> vector<360x32xbf16>
    %cst = arith.constant dense<0.000000e+00> : vector<128x360xf32>
    %12 = tpu.matmul %4, %11, %cst {dimension_numbers = #tpu.dot_dimension_numbers<[0], [1], [1], [0], [0, 1, 1, 0], [], []>} : vector<32x128xbf16>, vector<360x32xbf16>, vector<128x360xf32> -> vector<128x360xf32>
    %c0_10 = arith.constant 0 : index
    %c0_11 = arith.constant 0 : index
    %13 = vector.load %arg5[%c0_10, %c0_11] : memref<128x360xf32, #tpu.memory_space<vmem>>, vector<128x360xf32>
    %14 = arith.addf %12, %13 : vector<128x360xf32>
    %15 = vector.extract_strided_slice %14 {offsets = [0, 0], sizes = [128, 180], strides = [1, 1]} : vector<128x360xf32> to vector<128x180xf32>
    %16 = vector.extract_strided_slice %14 {offsets = [0, 180], sizes = [128, 180], strides = [1, 1]} : vector<128x360xf32> to vector<128x180xf32>
    %cst_12 = arith.constant dense<0xFF800000> : vector<128xf32>
    %17 = vector.multi_reduction <maximumf>, %15, %cst_12 [1] : vector<128x180xf32> to vector<128xf32>
    %18 = vector.shape_cast %17 : vector<128xf32> to vector<128x1xf32>
    %19 = vector.broadcast %18 : vector<128x1xf32> to vector<128x180xf32>
    %20 = arith.subf %15, %19 : vector<128x180xf32>
    %21 = math.exp %20 : vector<128x180xf32>
    %cst_13 = arith.constant dense<0xFF800000> : vector<128xf32>
    %22 = vector.multi_reduction <maximumf>, %16, %cst_13 [1] : vector<128x180xf32> to vector<128xf32>
    %23 = vector.shape_cast %22 : vector<128xf32> to vector<128x1xf32>
    %24 = vector.broadcast %23 : vector<128x1xf32> to vector<128x180xf32>
    %25 = arith.subf %16, %24 : vector<128x180xf32>
    %26 = math.exp %25 : vector<128x180xf32>
    %cst_14 = arith.constant dense<0.000000e+00> : vector<128xf32>
    %27 = vector.multi_reduction <add>, %21, %cst_14 [1] : vector<128x180xf32> to vector<128xf32>
    %28 = vector.shape_cast %27 : vector<128xf32> to vector<128x1xf32>
    %cst_15 = arith.constant 2.000000e+00 : f32
    %29 = vector.broadcast %cst_15 : f32 to vector<128x1xf32>
    %30 = arith.mulf %28, %29 : vector<128x1xf32>
    %31 = tpu.reciprocal %30 {approx = true} : vector<128x1xf32> -> vector<128x1xf32>
    %cst_16 = arith.constant dense<0.000000e+00> : vector<128xf32>
    %32 = vector.multi_reduction <add>, %26, %cst_16 [1] : vector<128x180xf32> to vector<128xf32>
    %33 = vector.shape_cast %32 : vector<128xf32> to vector<128x1xf32>
    %cst_17 = arith.constant 2.000000e+00 : f32
    %34 = vector.broadcast %cst_17 : f32 to vector<128x1xf32>
    %35 = arith.mulf %33, %34 : vector<128x1xf32>
    %36 = tpu.reciprocal %35 {approx = true} : vector<128x1xf32> -> vector<128x1xf32>
    %37 = vector.broadcast %31 : vector<128x1xf32> to vector<128x180xf32>
    %38 = arith.mulf %21, %37 : vector<128x180xf32>
    %39 = vector.broadcast %36 : vector<128x1xf32> to vector<128x180xf32>
    %40 = arith.mulf %26, %39 : vector<128x180xf32>
    %41 = tpu.concatenate %38, %40 in 1 : vector<128x180xf32>, vector<128x180xf32> -> vector<128x360xf32>
    %42 = arith.truncf %41 : vector<128x360xf32> to vector<128x360xbf16>
    %cst_18 = arith.constant dense<0.000000e+00> : vector<32x128xf32>
    %43 = tpu.matmul %11, %42, %cst_18 {dimension_numbers = #tpu.dot_dimension_numbers<[0], [1], [1], [0], [0, 1, 1, 0], [], []>} : vector<360x32xbf16>, vector<128x360xbf16>, vector<32x128xf32> -> vector<32x128xf32>
    %c0_19 = arith.constant 0 : index
    %c0_20 = arith.constant 0 : index
    %c0_21 = arith.constant 0 : index
    %c0_22 = arith.constant 0 : index
    %44 = vector.load %arg6[%c0_19, %c0_20, %c0_21, %c0_22] : memref<1x1x32x128xf32, #tpu.memory_space<vmem>>, vector<1x1x32x128xf32>
    %45 = vector.shape_cast %44 : vector<1x1x32x128xf32> to vector<32x128xf32>
    %46 = vector.shape_cast %43 : vector<32x128xf32> to vector<1x1x32x128xf32>
    tpu.vector_store %arg6[%c0_19, %c0_20, %c0_21, %c0_22], %46 {strides = array<i32>} : memref<1x1x32x128xf32, #tpu.memory_space<vmem>>, vector<1x1x32x128xf32>,
    return
  }
  func.func @transform_0(%arg0: i32, %arg1: i32, %arg2: i32) -> (i32, i32, i32, i32) {
    %c0_i32 = arith.constant 0 : i32
    %c0_i32_0 = arith.constant 0 : i32
    return %arg0, %arg1, %c0_i32, %arg2 : i32, i32, i32, i32
  }
  func.func @transform_1(%arg0: i32, %arg1: i32, %arg2: i32) -> (i32, i32, i32, i32, i32) {
    %c0_i32 = arith.constant 0 : i32
    %c0_i32_0 = arith.constant 0 : i32
    %c0_i32_1 = arith.constant 0 : i32
    %c0_i32_2 = arith.constant 0 : i32
    return %arg0, %c0_i32, %arg1, %c0_i32_0, %c0_i32_1 : i32, i32, i32, i32, i32
  }
  func.func @transform_2(%arg0: i32, %arg1: i32, %arg2: i32) -> (i32, i32) {
    %c0_i32 = arith.constant 0 : i32
    %c0_i32_0 = arith.constant 0 : i32
    %c0_i32_1 = arith.constant 0 : i32
    return %c0_i32, %c0_i32_0 : i32, i32
  }
  func.func @transform_3(%arg0: i32, %arg1: i32, %arg2: i32) -> (i32, i32, i32, i32) {
    %c0_i32 = arith.constant 0 : i32
    %c0_i32_0 = arith.constant 0 : i32
    return %arg0, %arg1, %c0_i32, %arg2 : i32, i32, i32, i32
  }
}

</mosaic_0001>

<bundles_post_ra>
// kernel: sub.25
= control target key start
LH: loop header
LB: loop body
LE: loop exit
PB: predicated region body
PF: predicated region fallthrough
CT: control target
= control target key end

     0   :  { %s67_s10 = smov 112   ;;  %s68_s11 = smov 80   ;;  %vm3_vm0 = vcmask 130048   ;;  %vm9_vm1 = vcmask 1048448   ;;  %vm15_vm2 = vcmask 917248   ;;  %vm21_vm3 = vcmask 786048   ;;  %s111_s0 = inlined_call_operand.vmem [shape: s32[8,16], index: 0, kind: input, shape index: {}]   ;;  %s112_s1 = inlined_call_operand.vmem [shape: s32[128], index: 1, kind: output, shape index: {}]  }
   0x1   :  { %v53_v0 = vld [vmem:[%s111_s0 + $0x7] sm:$0x1]   ;;  %v55_v1 = vld [vmem:[%s111_s0 + $0x5] sm:$0x1]   ;;  %v57_v2 = vld [vmem:[%s111_s0 + $0x3] sm:$0x1]  }
   0x2   :  { %7 = vrot.lane.b32.xlu0 %v53_v0, %s67_s10  ;;  %19 = vrot.lane.b32.xlu1 %v55_v1, %s68_s11  ;;  %s69_s14 = smov 48   ;;  %v54_v3 = vld [vmem:[%s111_s0 + $0x6] sm:$0x1]   ;;  %v56_v4 = vld [vmem:[%s111_s0 + $0x4] sm:$0x1]   ;;  %s70_s21 = smov 96  }
   0x3   :  { %31 = vrot.lane.b32.xlu2 %v57_v2, %s69_s14  ;;  %v58_v5 = vld [vmem:[%s111_s0 + $0x2] sm:$0x1]   ;;  %s71_s22 = smov 64   ;;  %s72_s23 = smov 32   ;;  %v59_v6 = vld [vmem:[%s111_s0 + $0x1] sm:$0x1]  }
   0x4   :  { %s73_s26 = smov 16   ;;  %v2_v7 = vld [vmem:[%s111_s0] sm:$0x1]   ;;  %vm27_vm4 = vcmask 654848   ;;  %vm33_vm5 = vcmask 523648   ;;  %vm39_vm6 = vcmask 392448  }
   0x5   :  { %4 = vst.msk [vmem:[#allocation0] sm:$0x1] %vm3_vm0, %v2_v7   ;;  %vm45_vm7 = vcmask 261248  }
   0xa   :  { %13 = vrot.lane.b32.xlu0 %v54_v3, %s70_s21  ;;  %25 = vrot.lane.b32.xlu1 %v56_v4, %s71_s22 }
   0xb   :  { %37 = vrot.lane.b32.xlu2 %v58_v5, %s72_s23 }
  0x12   :  { %43 = vrot.lane.b32.xlu0 %v59_v6, %s73_s26 }
  0x5d   :  { %v32_v8 = vpop.permute.xlu2 %31  }
  0x65   :  { %v38_v9 = vpop.permute.xlu2 %37  }
  0x74   :  { %v8_v10 = vpop.permute.xlu0 %7   ;;  %v20_v11 = vpop.permute.xlu1 %19  }
  0x75   :  { %10 = vst.msk [vmem:[#allocation0] sm:$0x1] %vm9_vm1, %v8_v10  }
  0x7c   :  { %v14_v12 = vpop.permute.xlu0 %13   ;;  %v26_v13 = vpop.permute.xlu1 %25  }
  0x7d   :  { %16 = vst.msk [vmem:[#allocation0] sm:$0x1] %vm15_vm2, %v14_v12  }
  0x7e   :  { %22 = vst.msk [vmem:[#allocation0] sm:$0x1] %vm21_vm3, %v20_v11  }
  0x7f   :  { %28 = vst.msk [vmem:[#allocation0] sm:$0x1] %vm27_vm4, %v26_v13  }
  0x80   :  { %34 = vst.msk [vmem:[#allocation0] sm:$0x1] %vm33_vm5, %v32_v8  }
  0x81   :  { %40 = vst.msk [vmem:[#allocation0] sm:$0x1] %vm39_vm6, %v38_v9  }
  0x84   :  { %v44_v14 = vpop.permute.xlu0 %43  }
  0x85   :  { %46 = vst.msk [vmem:[#allocation0] sm:$0x1] %vm45_vm7, %v44_v14  }
  0x8c   :  { %v49_v15 = vld [vmem:[#allocation0] sm:$0x1] }
  0x8d   :  { %52 = vst [vmem:[%s112_s1] sm:$0x1] %v49_v15 }

// kernel: sub.22
= control target key start
LH: loop header
LB: loop body
LE: loop exit
PB: predicated region body
PF: predicated region fallthrough
CT: control target
= control target key end

     0   :  { %vm9_vm0 = vcmask 15360   ;;  %s93_s12 = smov 126   ;;  %s94_s13 = smov 90   ;;  %vm3_vm1 = vcmask 146432   ;;  %vm13_vm2 = vcmask 130048   ;;  %vm16_vm3 = vcmask 1048560   ;;  %s148_s0 = inlined_call_operand.vmem [shape: s32[10,18], index: 0, kind: input, shape index: {}]   ;;  %s149_s1 = inlined_call_operand.vmem [shape: s32[180], index: 1, kind: output, shape index: {}]  }
   0x1   :  { %v74_v0 = vld [vmem:[%s148_s0 + $0x7] sm:$0x1]   ;;  %v77_v3 = vld [vmem:[%s148_s0 + $0x5] sm:$0x1]   ;;  %v79_v4 = vld [vmem:[%s148_s0 + $0x3] sm:$0x1]  }
   0x2   :  { %v75_v1 = vld [vmem:[%s148_s0 + $0x7] sm:$0x1]   ;;  %26 = vrot.lane.b32.xlu1 %v77_v3, %s94_s13  ;;  %s95_s16 = smov 54   ;;  %v76_v5 = vld [vmem:[%s148_s0 + $0x6] sm:$0x1]   ;;  %s96_s23 = smov 108  }
   0x3   :  { %v10_v2 = vsel %vm9_vm0, %v75_v1, %v74_v0  ;;  %38 = vrot.lane.b32.xlu2 %v79_v4, %s95_s16  ;;  %v78_v6 = vld [vmem:[%s148_s0 + $0x4] sm:$0x1]   ;;  %v80_v7 = vld [vmem:[%s148_s0 + $0x2] sm:$0x1]   ;;  %s97_s24 = smov 72   ;;  %s98_s25 = smov 36  }
   0x4   :  { %11 = vrot.lane.b32.xlu0 %v10_v2, %s93_s12  ;;  %v81_v8 = vld [vmem:[%s148_s0 + $0x9] sm:$0x1]   ;;  %v82_v9 = vld [vmem:[%s148_s0 + $0x1] sm:$0x1]   ;;  %v83_v10 = vld [vmem:[%s148_s0 + $0x8] sm:$0x1]  }
   0x5   :  { %s99_s3 = smov 34   ;;  %s100_s4 = smov 18   ;;  %v2_v11 = vld [vmem:[%s148_s0] sm:$0x1]   ;;  %vm22_vm4 = vcmask 1032032   ;;  %vm28_vm5 = vcmask 884432  }
   0x6   :  { %s101_s5 = smov 16   ;;  %4 = vst.msk [vmem:[#allocation0] sm:$0x1] %vm3_vm1, %v2_v11   ;;  %vm34_vm6 = vcmask 736832   ;;  %vm40_vm7 = vcmask 589232   ;;  %vm46_vm8 = vcmask 441632  }
   0x7   :  { %vm52_vm9 = vcmask 425232   ;;  %vm65_vm10 = vcmask 277632   ;;  %vm59_vm11 = vcmask 294032  }
   0xa   :  { %32 = vrot.lane.b32.xlu1 %v78_v6, %s97_s24 }
   0xb   :  { %44 = vrot.lane.b32.xlu2 %v80_v7, %s98_s25 }
   0xc   :  { %20 = vrot.lane.b32.xlu0 %v76_v5, %s96_s23 }
  0x12   :  { %57 = vrot.lane.b32.xlu1 %v82_v9, %s100_s4 }
  0x13   :  { %63 = vrot.lane.b32.xlu2 %v83_v10, %s101_s5 }
  0x14   :  { %50 = vrot.lane.b32.xlu0 %v81_v8, %s99_s3 }
  0x5d   :  { %v39_v12 = vpop.permute.xlu2 %38  }
  0x65   :  { %v45_v13 = vpop.permute.xlu2 %44  }
  0x6d   :  { %v64_v14 = vpop.permute.xlu2 %63  }
  0x74   :  { %v27_v16 = vpop.permute.xlu1 %26  }
  0x76   :  { %v12_v15 = vpop.permute.xlu0 %11  }
  0x77   :  { %15 = vst.msk [vmem:[#allocation0 + $0x1] sm:$0x1] %vm13_vm2, %v12_v15  }
  0x78   :  { %17 = vst.msk [vmem:[#allocation0] sm:$0x1] %vm16_vm3, %v12_v15  }
  0x7c   :  { %v33_v18 = vpop.permute.xlu1 %32  }
  0x7e   :  { %v21_v17 = vpop.permute.xlu0 %20  }
  0x7f   :  { %23 = vst.msk [vmem:[#allocation0] sm:$0x1] %vm22_vm4, %v21_v17  }
  0x80   :  { %29 = vst.msk [vmem:[#allocation0] sm:$0x1] %vm28_vm5, %v27_v16  }
  0x81   :  { %35 = vst.msk [vmem:[#allocation0] sm:$0x1] %vm34_vm6, %v33_v18  }
  0x82   :  { %41 = vst.msk [vmem:[#allocation0] sm:$0x1] %vm40_vm7, %v39_v12  }
  0x83   :  { %47 = vst.msk [vmem:[#allocation0] sm:$0x1] %vm46_vm8, %v45_v13  }
  0x84   :  { %v58_v20 = vpop.permute.xlu1 %57  }
  0x85   :  { %60 = vst.msk [vmem:[#allocation0] sm:$0x1] %vm59_vm11, %v58_v20  }
  0x86   :  { %v51_v19 = vpop.permute.xlu0 %50  }
  0x87   :  { %54 = vst.msk [vmem:[#allocation0 + $0x1] sm:$0x1] %vm52_vm9, %v51_v19  }
  0x88   :  { %67 = vst.msk [vmem:[#allocation0 + $0x1] sm:$0x1] %vm65_vm10, %v64_v14  }
  0x8f   :  { %v70_v21 = vld [vmem:[#allocation0] sm:$0x3] }
  0x90   :  { %73 = vst [vmem:[%s149_s1] sm:$0x3] %v70_v21 }

// kernel: sasa_forward.3
= control target key start
LH: loop header
LB: loop body
LE: loop exit
PB: predicated region body
PF: predicated region fallthrough
CT: control target
= control target key end

     0   :  { %s404_s9 = smov 0   ;;  %s475_s0 = inlined_call_operand.vmem [shape: f32[2,4,256], index: 0, kind: input, shape index: {}]   ;;  %s476_s1 = inlined_call_operand.vmem [shape: f32[64,4], index: 1, kind: input, shape index: {}]   ;;  %s477_s2 = inlined_call_operand.vmem [shape: bf16[2,64,256], index: 2, kind: output, shape index: {}]  }
   0x1 LB: > { %s340_s10 = sadd.s32 4294967295, %s387_s9   ;;  %p344_p0 = scmp.ge.s32.totalorder %s387_s9, 1  ;;  %s387_s9 = sphi %s404_s9, %s12_s9  }
   0x2   : > { %p112_p1 = scmp.lt.s32.totalorder %s387_s9, 3 }
   0x4   : > { %p113_p2 = pnand %p344_p0, %p112_p1 }
   0x5   : > { %p134_p3 = scmp.lt.s32.totalorder (!%p113_p2), %s340_s10, 1 }
   0x6   : > { %116 = sbr.rel (%p113_p2) target bundleno = 183 (0xb7), region = 28 }
   0xb   : > { %s479_s10 = smov (!%p134_p3, %s340_s10), 1  ;;  %vm182_vm0 = vcmask 1043456   ;;  %v148_v1 = vld [vmem:[%s476_s1 + $0x20] sm:$0xff]  ;;  %vm157_vm1 = vcmask 31744   ;;  %v149_v5 = vld [vmem:[%s476_s1 + $0x28] sm:$0xff]  ;;  %v150_v7 = vld [vmem:[%s476_s1 + $0x30] sm:$0xff] }
   0xc   : > { %s369_s11 = sshll.u32 %s479_s10, 3  ;;  %v144_v4 = vld [vmem:[%s476_s1] sm:$0xff]  ;;  %v145_v6 = vld [vmem:[%s476_s1 + $0x8] sm:$0xff]  ;;  %v146_v8 = vld [vmem:[%s476_s1 + $0x10] sm:$0xff]  ;;  %s370_s3 = sshll.u32 %s479_s10, 6 }
   0xd   : > { %s138_s14 = scalar_lea.vmem %s475_s0, %s369_s11  ;;  %v151_v9 = vld [vmem:[%s476_s1 + $0x38] sm:$0xff]  ;;  %s462_s6 = scalar_lea.vmem %s477_s2, %s370_s3 }
   0xe   : > { %v152_v0 = vld [vmem:[%s138_s14] sm:$0xff]  ;;  %v147_v10 = vld [vmem:[%s476_s1 + $0x18] sm:$0xff] }
   0xf   : > { %154 = vst [vmem:[#allocation1] ss:$2 sm:$0xff] %v152_v0 }
  0x16   : > { %v155_v2 = vld.sshfl [vmem:[#allocation1] sm:$0xff pattern:$0x75316420]  ;;  %v156_v3 = vld.sshfl [vmem:[#allocation1 + $0x8] sm:$0xff pattern:$0x75316420] }
  0x17   : > { %371 = vmatpush.msk.msra.mxu2 %vm182_vm0, %v155_v2  ;;  %372 = vmatpush.msk.msra.mxu3 %vm182_vm0, %v156_v3 }
  0x18   : > { %354 = vmatmul.msk.f32.vlgmr.msra.gmra.mxu2 %vm157_vm1, %v148_v1  ;;  %363 = vmatmul.msk.f32.vlgmr.msra.gmra.mxu3 %vm157_vm1, %v148_v1 }
  0x19   : > { %349 = vmatpush.msk.msra.mxu0 %vm182_vm0, %v155_v2  ;;  %358 = vmatpush.msk.msra.mxu1 %vm182_vm0, %v156_v3 }
  0x1a   : > { %350 = vmatmul.msk.f32.vlgmr.msra.gmra.mxu0 %vm157_vm1, %v144_v4  ;;  %359 = vmatmul.msk.f32.vlgmr.msra.gmra.mxu1 %vm157_vm1, %v144_v4 }
  0x20   : > { %355 = vmatmul.msk.f32.gmra.mxu2 %vm157_vm1, %v149_v5  ;;  %364 = vmatmul.msk.f32.gmra.mxu3 %vm157_vm1, %v149_v5 }
  0x22   : > { %351 = vmatmul.msk.f32.gmra.mxu0 %vm157_vm1, %v145_v6  ;;  %360 = vmatmul.msk.f32.gmra.mxu1 %vm157_vm1, %v145_v6 }
  0x28   : > { %356 = vmatmul.msk.f32.gmra.mxu2 %vm157_vm1, %v150_v7  ;;  %365 = vmatmul.msk.f32.gmra.mxu3 %vm157_vm1, %v150_v7 }
  0x2a   : > { %352 = vmatmul.msk.f32.gmra.mxu0 %vm157_vm1, %v146_v8  ;;  %361 = vmatmul.msk.f32.gmra.mxu1 %vm157_vm1, %v146_v8 }
  0x30   : > { %357 = vmatmul.msk.f32.gmra.mxu2 %vm157_vm1, %v151_v9  ;;  %366 = vmatmul.msk.f32.gmra.mxu3 %vm157_vm1, %v151_v9 }
  0x32   : > { %353 = vmatmul.msk.f32.gmra.mxu0 %vm157_vm1, %v147_v10  ;;  %362 = vmatmul.msk.f32.gmra.mxu1 %vm157_vm1, %v147_v10 }
  0x97   : > { %v204_v11 = vpop.f32.mrf.mxu0  ;;  %v245_v12 = vpop.f32.mrf.mxu1 }
  0x98   : > { %v269_v13 = vpack.c.bf16 %v245_v12, %v204_v11 }
  0x9a   : > { %277 = vst [vmem:[%s462_s6] sm:$0xff] %v269_v13 }
  0x9b   : > { %v216_v14 = vpop.f32.mrf.mxu2  ;;  %v257_v15 = vpop.f32.mrf.mxu3 }
  0x9c   : > { %v273_v16 = vpack.c.bf16 %v257_v15, %v216_v14 }
  0x9e   : > { %281 = vst [vmem:[%s462_s6 + $0x20] sm:$0xff] %v273_v16 }
  0x9f   : > { %v207_v17 = vpop.f32.mrf.mxu0  ;;  %v248_v18 = vpop.f32.mrf.mxu1 }
  0xa0   : > { %v270_v19 = vpack.c.bf16 %v248_v18, %v207_v17 }
  0xa2   : > { %278 = vst [vmem:[%s462_s6 + $0x8] sm:$0xff] %v270_v19 }
  0xa3   : > { %v219_v20 = vpop.f32.mrf.mxu2  ;;  %v260_v21 = vpop.f32.mrf.mxu3 }
  0xa4   : > { %v274_v22 = vpack.c.bf16 %v260_v21, %v219_v20 }
  0xa6   : > { %282 = vst [vmem:[%s462_s6 + $0x28] sm:$0xff] %v274_v22 }
  0xa7   : > { %v210_v23 = vpop.f32.mrf.mxu0  ;;  %v251_v24 = vpop.f32.mrf.mxu1 }
  0xa8   : > { %v271_v25 = vpack.c.bf16 %v251_v24, %v210_v23 }
  0xaa   : > { %279 = vst [vmem:[%s462_s6 + $0x10] sm:$0xff] %v271_v25 }
  0xab   : > { %v222_v26 = vpop.f32.mrf.mxu2  ;;  %v263_v27 = vpop.f32.mrf.mxu3 }
  0xac   : > { %v275_v28 = vpack.c.bf16 %v263_v27, %v222_v26 }
  0xae   : > { %283 = vst [vmem:[%s462_s6 + $0x30] sm:$0xff] %v275_v28 }
  0xaf   : > { %v213_v29 = vpop.f32.mrf.mxu0  ;;  %v254_v30 = vpop.f32.mrf.mxu1 }
  0xb0   : > { %v272_v31 = vpack.c.bf16 %v254_v30, %v213_v29 }
  0xb2   : > { %280 = vst [vmem:[%s462_s6 + $0x18] sm:$0xff] %v272_v31 }
  0xb3   : > { %v225_v32 = vpop.f32.mrf.mxu2  ;;  %v266_v33 = vpop.f32.mrf.mxu3 }
  0xb4   : > { %v276_v34 = vpack.c.bf16 %v266_v33, %v225_v32 }
  0xb6   : > { %284 = vst [vmem:[%s462_s6 + $0x38] sm:$0xff] %v276_v34 }
  0xb7 PF: > { %s12_s9 = sadd.s32 1, %s387_s9  }
  0xb8   : > { %p9_p4 = scmp.ge.s32.totalorder %s12_s9, 4  }
  0xba   :  { %11 = sbr.rel (!%p9_p4) target bundleno = 1 (0x1), region = 58 }

// kernel: sasa_forward.4
= control target key start
LH: loop header
LB: loop body
LE: loop exit
PB: predicated region body
PF: predicated region fallthrough
CT: control target
= control target key end

     0   :  { %s897_s9 = smov 0   ;;  %s899_s10 = smov 0   ;;  %s1081_s0 = inlined_call_operand.vmem [shape: f32[4,4,324], index: 0, kind: input, shape index: {}]   ;;  %s1082_s1 = inlined_call_operand.vmem [shape: f32[2,4,32], index: 1, kind: input, shape index: {}]   ;;  %s1083_s2 = inlined_call_operand.vmem [shape: bf16[4,2,324,32], index: 2, kind: output, shape index: {}]  }
   0x1   :  { %s901_s11 = smov 0   ;;  %s903_s12 = smov 0  }
   0x2   :  { %s905_s13 = smov 0  }
   0x3 LB: > { %s21_s14 = sadd.s32 1, %s872_s11  ;;  %s24_s15 = sadd.s32 1, %s876_s12  ;;  %s880_s13 = sphi %s905_s13, %s12_s13   ;;  %s876_s12 = sphi %s903_s12, %s1087_s12   ;;  %s872_s11 = sphi %s901_s11, %s1086_s11   ;;  %s868_s10 = sphi %s899_s10, %s1085_s10   ;;  %s864_s9 = sphi %s897_s9, %s1084_s9  }
   0x4   : > { %p22_p0 = scmp.ge.s32.totalorder %s21_s14, 2  ;;  %p747_p1 = scmp.ge.s32.totalorder %s880_s13, 1 }
   0x5   : > { %p135_p2 = scmp.lt.s32.totalorder %s880_s13, 9 }
   0x6   : > { %s1089_s14 = smov (%p22_p0, %s21_s14), 0  ;;  %s1091_s15 = smov (!%p22_p0, %s24_s15), %s876_s12 }
   0x7   : > { %p136_p3 = pnand %p747_p1, %p135_p2  ;;  %p26_p4 = scmp.ge.s32.totalorder %s1091_s15, 4 }
   0x8   : > { %p165_p5 = scmp.lt.s32.totalorder (!%p136_p3), %s868_s10, 3  ;;  %p170_p6 = scmp.lt.s32.totalorder (!%p136_p3), %s864_s9, 1 }
   0x9   : > { %s1093_s15 = smov (%p26_p4, %s1091_s15), 0  ;;  %139 = sbr.rel (%p136_p3) target bundleno = 583 (0x247), region = 28 }
   0xe   : > { %s1095_s10 = smov (!%p165_p5, %s868_s10), 3  ;;  %s1097_s9 = smov (!%p170_p6, %s864_s9), 1  ;;  %vm417_vm0 = vcmask 1043456   ;;  %vm293_vm1 = vcmask 31744   ;;  %vm602_vm2 = vcmask 257024   ;;  %vm643_vm3 = vcmask 254976  }
   0xf   : > { %s798_s16 = smul.u32 12, %s1095_s10  ;;  %s749_s23 = sshll.u32 %s1097_s9, 2 }
  0x10   : > { %s800_s20 = smul.u32 82, %s1095_s10  ;;  %s173_s26 = scalar_lea.vmem %s1082_s1, %s749_s23 }
  0x11   : > { %s169_s19 = scalar_lea.vmem %s1081_s0, %s798_s16  ;;  %s799_s21 = smul.u32 41, %s1097_s9  ;;  %v185_v2 = vld [vmem:[%s173_s26] sm:$0xf] }
  0x12   : > { %v183_v0 = vld [vmem:[%s169_s19] sm:$0xff]  ;;  %751 = vmatpush.msk.msra.mxu0 %vm417_vm0, %v185_v2  ;;  %795 = vmatpush.msk.msra.mxu1 %vm417_vm0, %v185_v2  ;;  %v184_v4 = vld [vmem:[%s169_s19 + $0x8] sm:$0xf] }
  0x13   : > { %188 = vst [vmem:[#allocation1] ss:$2 sm:$0xff] %v183_v0  ;;  %s930_s22 = sadd.s32 %s800_s20, %s799_s21  ;;  %796 = vmatpush.msk.msra.mxu2 %vm417_vm0, %v185_v2  ;;  %797 = vmatpush.msk.msra.mxu3 %vm417_vm0, %v185_v2 }
  0x14   : > { %190 = vst [vmem:[#allocation1 + $0x10] ss:$2 sm:$0xff] %v184_v4  ;;  %s750_s27 = sshll.u32 %s930_s22, 2 }
  0x15   : > { %s955_s30 = scalar_lea.vmem %s1083_s2, %s750_s27 }
  0x1a   : > { %v191_v1 = vld.sshfl [vmem:[#allocation1] sm:$0xff pattern:$0x75316420]  ;;  %v192_v3 = vld.sshfl [vmem:[#allocation1 + $0x8] sm:$0xff pattern:$0x75316420] }
  0x1b   : > { %197 = vxpose.xlu0.b32.start.end [1/1] (short) %v191_v1, 128  ;;  %v193_v5 = vld.sshfl [vmem:[#allocation1 + $0x10] sm:$0xff pattern:$0x75316420] }
  0x1c   : > { %261 = vxpose.xlu1.b32.start.end [1/1] (short) (narrow) %v193_v5, 72 }
  0x9b   : > { %229 = vxpose.xlu0.b32.start.end [1/1] (short) %v192_v3, 128 }
  0xbf   : > { %v213_v6 = vpop.trf.xlu0 }
  0xc0   : > { %752 = vmatmul.msk.f32.vlgmr.msra.gmra.mxu0 %vm293_vm1, %v213_v6  ;;  %v969_v37 = vpop.trf.xlu1 }
  0xc7   : > { %v214_v7 = vpop.trf.xlu0 }
  0xc8   : > { %753 = vmatmul.msk.f32.gmra.mxu0 %vm293_vm1, %v214_v7  ;;  %v278_v41 = vpop.trf.xlu1 }
  0xc9   : > { %785 = vmatmul.msk.f32.vlgmr.msra.gmra.mxu3 %vm293_vm1, %v278_v41 }
  0xcf   : > { %v215_v8 = vpop.trf.xlu0 }
  0xd0   : > { %754 = vmatmul.msk.f32.gmra.mxu0 %vm293_vm1, %v215_v8  ;;  %v279_v45 = vpop.trf.xlu1 }
  0xd1   : > { %786 = vmatmul.msk.f32.gmra.mxu3 %vm293_vm1, %v279_v45 }
  0xd7   : > { %v216_v9 = vpop.trf.xlu0 }
  0xd8   : > { %755 = vmatmul.msk.f32.gmra.mxu0 %vm293_vm1, %v216_v9  ;;  %v280_v49 = vpop.trf.xlu1 }
  0xd9   : > { %787 = vmatmul.msk.f32.gmra.mxu3 %vm293_vm1, %v280_v49 }
  0xdf   : > { %v217_v10 = vpop.trf.xlu0 }
  0xe0   : > { %756 = vmatmul.msk.f32.gmra.mxu0 %vm293_vm1, %v217_v10  ;;  %v281_v53 = vpop.trf.xlu1 }
  0xe1   : > { %788 = vmatmul.msk.f32.gmra.mxu3 %vm293_vm1, %v281_v53 }
  0xe7   : > { %v218_v11 = vpop.trf.xlu0 }
  0xe8   : > { %757 = vmatmul.msk.f32.gmra.mxu0 %vm293_vm1, %v218_v11  ;;  %v282_v57 = vpop.trf.xlu1 }
  0xe9   : > { %789 = vmatmul.msk.f32.gmra.mxu3 %vm293_vm1, %v282_v57 }
  0xef   : > { %v219_v12 = vpop.trf.xlu0 }
  0xf0   : > { %758 = vmatmul.msk.f32.gmra.mxu0 %vm293_vm1, %v219_v12  ;;  %v283_v61 = vpop.trf.xlu1 }
  0xf1   : > { %790 = vmatmul.msk.f32.gmra.mxu3 %vm293_vm1, %v283_v61 }
  0xf7   : > { %v220_v13 = vpop.trf.xlu0 }
  0xf8   : > { %759 = vmatmul.msk.f32.gmra.mxu0 %vm293_vm1, %v220_v13  ;;  %v284_v1 = vpop.trf.xlu1 }
  0xf9   : > { %791 = vmatmul.msk.f32.gmra.mxu3 %vm293_vm1, %v284_v1 }
  0xff   : > { %v221_v14 = vpop.trf.xlu0 }
 0x100   : > { %760 = vmatmul.msk.f32.gmra.mxu0 %vm293_vm1, %v221_v14  ;;  %v285_v5 = vpop.trf.xlu1 }
 0x101   : > { %792 = vmatmul.msk.f32.gmra.mxu3 %vm293_vm1, %v285_v5 }
 0x107   : > { %v222_v15 = vpop.trf.xlu0 }
 0x108   : > { %761 = vmatmul.msk.f32.gmra.mxu0 %vm293_vm1, %v222_v15 }
 0x10f   : > { %v223_v16 = vpop.trf.xlu0 }
 0x110   : > { %762 = vmatmul.msk.f32.gmra.mxu0 %vm293_vm1, %v223_v16 }
 0x117   : > { %v224_v17 = vpop.trf.xlu0 }
 0x118   : > { %763 = vmatmul.msk.f32.vlgmr.msra.gmra.mxu1 %vm293_vm1, %v224_v17 }
 0x11f   : > { %v225_v18 = vpop.trf.xlu0 }
 0x120   : > { %764 = vmatmul.msk.f32.gmra.mxu1 %vm293_vm1, %v225_v18 }
 0x127   : > { %v226_v19 = vpop.trf.xlu0 }
 0x128   : > { %765 = vmatmul.msk.f32.gmra.mxu1 %vm293_vm1, %v226_v19 }
 0x12f   : > { %v227_v20 = vpop.trf.xlu0 }
 0x130   : > { %766 = vmatmul.msk.f32.gmra.mxu1 %vm293_vm1, %v227_v20 }
 0x137   : > { %v228_v21 = vpop.trf.xlu0 }
 0x138   : > { %767 = vmatmul.msk.f32.gmra.mxu1 %vm293_vm1, %v228_v21 }
 0x13d   : > { %v438_v22 = vpop.f32.mrf.mxu0 }
 0x13e   : > { %v561_v23 = vpack.c.bf16 %v438_v22, %v438_v22 }
 0x13f   : > { %v245_v24 = vpop.trf.xlu0 }
 0x140   : > { %603 = vst.msk [vmem:[%s955_s30] sm:$0xf] %vm602_vm2, %v561_v23  ;;  %768 = vmatmul.msk.f32.gmra.mxu1 %vm293_vm1, %v245_v24 }
 0x145   : > { %v441_v25 = vpop.f32.mrf.mxu0 }
 0x146   : > { %v562_v26 = vpack.c.bf16 %v441_v25, %v441_v25 }
 0x147   : > { %v246_v27 = vpop.trf.xlu0 }
 0x148   : > { %604 = vst.msk [vmem:[%s955_s30 + $0x4] sm:$0xf] %vm602_vm2, %v562_v26  ;;  %769 = vmatmul.msk.f32.gmra.mxu1 %vm293_vm1, %v246_v27 }
 0x14c   : > { %v537_v27 = vpop.f32.mrf.mxu3 }
 0x14d   : > { %v444_v28 = vpop.f32.mrf.mxu0 }
 0x14e   : > { %v563_v29 = vpack.c.bf16 %v444_v28, %v444_v28  ;;  %v594_v28 = vpack.c.bf16 %v537_v27, %v537_v27 }
 0x14f   : > { %v247_v30 = vpop.trf.xlu0 }
 0x150   : > { %605 = vst.msk [vmem:[%s955_s30 + $0x8] sm:$0xf] %vm602_vm2, %v563_v29  ;;  %770 = vmatmul.msk.f32.gmra.mxu1 %vm293_vm1, %v247_v30 }
 0x151   : > { %636 = vst.msk [vmem:[%s955_s30 + $0x84] sm:$0xf] %vm602_vm2, %v594_v28 }
 0x154   : > { %v540_v30 = vpop.f32.mrf.mxu3 }
 0x155   : > { %v447_v31 = vpop.f32.mrf.mxu0 }
 0x156   : > { %v564_v32 = vpack.c.bf16 %v447_v31, %v447_v31 }
 0x157   : > { %v248_v33 = vpop.trf.xlu0 }
 0x158   : > { %606 = vst.msk [vmem:[%s955_s30 + $0xc] sm:$0xf] %vm602_vm2, %v564_v32  ;;  %771 = vmatmul.msk.f32.gmra.mxu1 %vm293_vm1, %v248_v33  ;;  %v595_v32 = vpack.c.bf16 %v540_v30, %v540_v30 }
 0x15a   : > { %637 = vst.msk [vmem:[%s955_s30 + $0x88] sm:$0xf] %vm602_vm2, %v595_v32 }
 0x15d   : > { %v450_v34 = vpop.f32.mrf.mxu0 }
 0x15e   : > { %v565_v35 = vpack.c.bf16 %v450_v34, %v450_v34  ;;  %v543_v34 = vpop.f32.mrf.mxu3 }
 0x15f   : > { %v249_v36 = vpop.trf.xlu0 }
 0x160   : > { %607 = vst.msk [vmem:[%s955_s30 + $0x10] sm:$0xf] %vm602_vm2, %v565_v35  ;;  %772 = vmatmul.msk.f32.gmra.mxu1 %vm293_vm1, %v249_v36  ;;  %v596_v36 = vpack.c.bf16 %v543_v34, %v543_v34 }
 0x162   : > { %638 = vst.msk [vmem:[%s955_s30 + $0x8c] sm:$0xf] %vm602_vm2, %v596_v36 }
 0x165   : > { %v453_v38 = vpop.f32.mrf.mxu0 }
 0x166   : > { %v566_v39 = vpack.c.bf16 %v453_v38, %v453_v38  ;;  %v546_v38 = vpop.f32.mrf.mxu3 }
 0x167   : > { %v250_v40 = vpop.trf.xlu0 }
 0x168   : > { %608 = vst.msk [vmem:[%s955_s30 + $0x14] sm:$0xf] %vm602_vm2, %v566_v39  ;;  %773 = vmatmul.msk.f32.gmra.mxu1 %vm293_vm1, %v250_v40  ;;  %v597_v40 = vpack.c.bf16 %v546_v38, %v546_v38 }
 0x16a   : > { %639 = vst.msk [vmem:[%s955_s30 + $0x90] sm:$0xf] %vm602_vm2, %v597_v40 }
 0x16d   : > { %v456_v42 = vpop.f32.mrf.mxu0 }
 0x16e   : > { %v567_v43 = vpack.c.bf16 %v456_v42, %v456_v42  ;;  %v549_v42 = vpop.f32.mrf.mxu3 }
 0x16f   : > { %v251_v44 = vpop.trf.xlu0 }
 0x170   : > { %609 = vst.msk [vmem:[%s955_s30 + $0x18] sm:$0xf] %vm602_vm2, %v567_v43  ;;  %774 = vmatmul.msk.f32.vlgmr.msra.gmra.mxu2 %vm293_vm1, %v251_v44  ;;  %v598_v44 = vpack.c.bf16 %v549_v42, %v549_v42 }
 0x172   : > { %640 = vst.msk [vmem:[%s955_s30 + $0x94] sm:$0xf] %vm602_vm2, %v598_v44 }
 0x175   : > { %v459_v46 = vpop.f32.mrf.mxu0 }
 0x176   : > { %v568_v47 = vpack.c.bf16 %v459_v46, %v459_v46  ;;  %v552_v46 = vpop.f32.mrf.mxu3 }
 0x177   : > { %v252_v48 = vpop.trf.xlu0 }
 0x178   : > { %610 = vst.msk [vmem:[%s955_s30 + $0x1c] sm:$0xf] %vm602_vm2, %v568_v47  ;;  %775 = vmatmul.msk.f32.gmra.mxu2 %vm293_vm1, %v252_v48  ;;  %v599_v48 = vpack.c.bf16 %v552_v46, %v552_v46 }
 0x17a   : > { %641 = vst.msk [vmem:[%s955_s30 + $0x98] sm:$0xf] %vm602_vm2, %v599_v48 }
 0x17d   : > { %v462_v50 = vpop.f32.mrf.mxu0 }
 0x17e   : > { %v569_v51 = vpack.c.bf16 %v462_v50, %v462_v50  ;;  %v555_v50 = vpop.f32.mrf.mxu3 }
 0x17f   : > { %v253_v52 = vpop.trf.xlu0 }
 0x180   : > { %611 = vst.msk [vmem:[%s955_s30 + $0x20] sm:$0xf] %vm602_vm2, %v569_v51  ;;  %776 = vmatmul.msk.f32.gmra.mxu2 %vm293_vm1, %v253_v52  ;;  %v600_v52 = vpack.c.bf16 %v555_v50, %v555_v50 }
 0x182   : > { %642 = vst.msk [vmem:[%s955_s30 + $0x9c] sm:$0xf] %vm602_vm2, %v600_v52 }
 0x185   : > { %v465_v54 = vpop.f32.mrf.mxu0 }
 0x186   : > { %v570_v55 = vpack.c.bf16 %v465_v54, %v465_v54  ;;  %v558_v54 = vpop.f32.mrf.mxu3 }
 0x187   : > { %v254_v56 = vpop.trf.xlu0 }
 0x188   : > { %612 = vst.msk [vmem:[%s955_s30 + $0x24] sm:$0xf] %vm602_vm2, %v570_v55  ;;  %777 = vmatmul.msk.f32.gmra.mxu2 %vm293_vm1, %v254_v56  ;;  %v601_v56 = vpack.c.bf16 %v558_v54, %v558_v54 }
 0x18a   : > { %644 = vst.msk [vmem:[%s955_s30 + $0xa0] sm:$0x3] %vm643_vm3, %v601_v56 }
 0x18d   : > { %v468_v58 = vpop.f32.mrf.mxu0 }
 0x18e   : > { %v571_v59 = vpack.c.bf16 %v468_v58, %v468_v58 }
 0x18f   : > { %v255_v60 = vpop.trf.xlu0 }
 0x190   : > { %613 = vst.msk [vmem:[%s955_s30 + $0x28] sm:$0xf] %vm602_vm2, %v571_v59  ;;  %778 = vmatmul.msk.f32.gmra.mxu2 %vm293_vm1, %v255_v60 }
 0x195   : > { %v471_v62 = vpop.f32.mrf.mxu1 }
 0x196   : > { %v572_v63 = vpack.c.bf16 %v471_v62, %v471_v62 }
 0x197   : > { %v256_v0 = vpop.trf.xlu0 }
 0x198   : > { %614 = vst.msk [vmem:[%s955_s30 + $0x2c] sm:$0xf] %vm602_vm2, %v572_v63  ;;  %779 = vmatmul.msk.f32.gmra.mxu2 %vm293_vm1, %v256_v0 }
 0x19d   : > { %v474_v2 = vpop.f32.mrf.mxu1 }
 0x19e   : > { %v573_v3 = vpack.c.bf16 %v474_v2, %v474_v2 }
 0x19f   : > { %v257_v4 = vpop.trf.xlu0 }
 0x1a0   : > { %615 = vst.msk [vmem:[%s955_s30 + $0x30] sm:$0xf] %vm602_vm2, %v573_v3  ;;  %780 = vmatmul.msk.f32.gmra.mxu2 %vm293_vm1, %v257_v4 }
 0x1a5   : > { %v477_v6 = vpop.f32.mrf.mxu1 }
 0x1a6   : > { %v574_v7 = vpack.c.bf16 %v477_v6, %v477_v6 }
 0x1a7   : > { %v258_v8 = vpop.trf.xlu0 }
 0x1a8   : > { %616 = vst.msk [vmem:[%s955_s30 + $0x34] sm:$0xf] %vm602_vm2, %v574_v7  ;;  %781 = vmatmul.msk.f32.gmra.mxu2 %vm293_vm1, %v258_v8 }
 0x1ad   : > { %v480_v9 = vpop.f32.mrf.mxu1 }
 0x1ae   : > { %v575_v10 = vpack.c.bf16 %v480_v9, %v480_v9 }
 0x1af   : > { %v259_v11 = vpop.trf.xlu0 }
 0x1b0   : > { %617 = vst.msk [vmem:[%s955_s30 + $0x38] sm:$0xf] %vm602_vm2, %v575_v10  ;;  %782 = vmatmul.msk.f32.gmra.mxu2 %vm293_vm1, %v259_v11 }
 0x1b5   : > { %v483_v12 = vpop.f32.mrf.mxu1 }
 0x1b6   : > { %v576_v13 = vpack.c.bf16 %v483_v12, %v483_v12 }
 0x1b7   : > { %v260_v14 = vpop.trf.xlu0 }
 0x1b8   : > { %618 = vst.msk [vmem:[%s955_s30 + $0x3c] sm:$0xf] %vm602_vm2, %v576_v13  ;;  %783 = vmatmul.msk.f32.gmra.mxu2 %vm293_vm1, %v260_v14 }
 0x1bd   : > { %v486_v15 = vpop.f32.mrf.mxu1 }
 0x1be   : > { %v577_v16 = vpack.c.bf16 %v486_v15, %v486_v15 }
 0x1c0   : > { %619 = vst.msk [vmem:[%s955_s30 + $0x40] sm:$0xf] %vm602_vm2, %v577_v16  ;;  %784 = vmatmul.msk.f32.gmra.mxu2 %vm293_vm1, %v969_v37 }
 0x1c5   : > { %v489_v17 = vpop.f32.mrf.mxu1 }
 0x1c6   : > { %v578_v18 = vpack.c.bf16 %v489_v17, %v489_v17 }
 0x1c8   : > { %620 = vst.msk [vmem:[%s955_s30 + $0x44] sm:$0xf] %vm602_vm2, %v578_v18 }
 0x1cd   : > { %v492_v19 = vpop.f32.mrf.mxu1 }
 0x1ce   : > { %v579_v20 = vpack.c.bf16 %v492_v19, %v492_v19 }
 0x1d0   : > { %621 = vst.msk [vmem:[%s955_s30 + $0x48] sm:$0xf] %vm602_vm2, %v579_v20 }
 0x1d5   : > { %v495_v21 = vpop.f32.mrf.mxu1 }
 0x1d6   : > { %v580_v22 = vpack.c.bf16 %v495_v21, %v495_v21 }
 0x1d8   : > { %622 = vst.msk [vmem:[%s955_s30 + $0x4c] sm:$0xf] %vm602_vm2, %v580_v22 }
 0x1dd   : > { %v498_v23 = vpop.f32.mrf.mxu1 }
 0x1de   : > { %v581_v24 = vpack.c.bf16 %v498_v23, %v498_v23 }
 0x1e0   : > { %623 = vst.msk [vmem:[%s955_s30 + $0x50] sm:$0xf] %vm602_vm2, %v581_v24 }
 0x1e5   : > { %v501_v25 = vpop.f32.mrf.mxu1 }
 0x1e6   : > { %v582_v26 = vpack.c.bf16 %v501_v25, %v501_v25 }
 0x1e8   : > { %624 = vst.msk [vmem:[%s955_s30 + $0x54] sm:$0xf] %vm602_vm2, %v582_v26 }
 0x1f3   : > { %v504_v29 = vpop.f32.mrf.mxu2 }
 0x1f4   : > { %v583_v31 = vpack.c.bf16 %v504_v29, %v504_v29 }
 0x1f6   : > { %625 = vst.msk [vmem:[%s955_s30 + $0x58] sm:$0xf] %vm602_vm2, %v583_v31 }
 0x1fb   : > { %v507_v33 = vpop.f32.mrf.mxu2 }
 0x1fc   : > { %v584_v35 = vpack.c.bf16 %v507_v33, %v507_v33 }
 0x1fe   : > { %626 = vst.msk [vmem:[%s955_s30 + $0x5c] sm:$0xf] %vm602_vm2, %v584_v35 }
 0x203   : > { %v510_v37 = vpop.f32.mrf.mxu2 }
 0x204   : > { %v585_v39 = vpack.c.bf16 %v510_v37, %v510_v37 }
 0x206   : > { %627 = vst.msk [vmem:[%s955_s30 + $0x60] sm:$0xf] %vm602_vm2, %v585_v39 }
 0x20b   : > { %v513_v41 = vpop.f32.mrf.mxu2 }
 0x20c   : > { %v586_v43 = vpack.c.bf16 %v513_v41, %v513_v41 }
 0x20e   : > { %628 = vst.msk [vmem:[%s955_s30 + $0x64] sm:$0xf] %vm602_vm2, %v586_v43 }
 0x213   : > { %v516_v45 = vpop.f32.mrf.mxu2 }
 0x214   : > { %v587_v47 = vpack.c.bf16 %v516_v45, %v516_v45 }
 0x216   : > { %629 = vst.msk [vmem:[%s955_s30 + $0x68] sm:$0xf] %vm602_vm2, %v587_v47 }
 0x21b   : > { %v519_v49 = vpop.f32.mrf.mxu2 }
 0x21c   : > { %v588_v51 = vpack.c.bf16 %v519_v49, %v519_v49 }
 0x21e   : > { %630 = vst.msk [vmem:[%s955_s30 + $0x6c] sm:$0xf] %vm602_vm2, %v588_v51 }
 0x223   : > { %v522_v53 = vpop.f32.mrf.mxu2 }
 0x224   : > { %v589_v55 = vpack.c.bf16 %v522_v53, %v522_v53 }
 0x226   : > { %631 = vst.msk [vmem:[%s955_s30 + $0x70] sm:$0xf] %vm602_vm2, %v589_v55 }
 0x22b   : > { %v525_v57 = vpop.f32.mrf.mxu2 }
 0x22c   : > { %v590_v58 = vpack.c.bf16 %v525_v57, %v525_v57 }
 0x22e   : > { %632 = vst.msk [vmem:[%s955_s30 + $0x74] sm:$0xf] %vm602_vm2, %v590_v58 }
 0x233   : > { %v528_v59 = vpop.f32.mrf.mxu2 }
 0x234   : > { %v591_v60 = vpack.c.bf16 %v528_v59, %v528_v59 }
 0x236   : > { %633 = vst.msk [vmem:[%s955_s30 + $0x78] sm:$0xf] %vm602_vm2, %v591_v60 }
 0x23b   : > { %v531_v61 = vpop.f32.mrf.mxu2 }
 0x23c   : > { %v592_v62 = vpack.c.bf16 %v531_v61, %v531_v61 }
 0x23e   : > { %634 = vst.msk [vmem:[%s955_s30 + $0x7c] sm:$0xf] %vm602_vm2, %v592_v62 }
 0x243   : > { %v534_v63 = vpop.f32.mrf.mxu2 }
 0x244   : > { %v593_v0 = vpack.c.bf16 %v534_v63, %v534_v63 }
 0x246   : > { %635 = vst.msk [vmem:[%s955_s30 + $0x80] sm:$0xf] %vm602_vm2, %v593_v0 }
 0x247 PF: > { %s12_s13 = sadd.s32 1, %s880_s13   ;;  %s1084_s9 = smov %s872_s11 }
 0x248   : > { %p9_p7 = scmp.ge.s32.totalorder %s12_s13, 10   ;;  %s1085_s10 = smov %s876_s12 }
 0x249   : > { %s1086_s11 = smov %s1089_s14  ;;  %s1087_s12 = smov %s1093_s15 }
 0x24a   :  { %11 = sbr.rel (!%p9_p7) target bundleno = 3 (0x3), region = 62 }

// kernel: sasa_forward.5
= control target key start
LH: loop header
LB: loop body
LE: loop exit
PB: predicated region body
PF: predicated region fallthrough
CT: control target
= control target key end

     0   :  { %s2896_s12 = smov 0   ;;  %s2898_s13 = smov 0   ;;  %s4358_s0 = inlined_call_operand.vmem [shape: bf16[2,2,32,256], index: 0, kind: input, shape index: {}]   ;;  %s4359_s1 = inlined_call_operand.vmem [shape: bf16[2,2,2,324,32], index: 1, kind: input, shape index: {}]   ;;  %s4360_s2 = inlined_call_operand.vmem [shape: f32[128,360], index: 2, kind: input, shape index: {}]   ;;  %s4361_s3 = inlined_call_operand.vmem [shape: f32[2,2,32,256], index: 3, kind: output, shape index: {}]  }
   0x1   :  { %s2900_s14 = smov 0   ;;  %s2902_s15 = smov 0  }
   0x2   :  { %s2904_s16 = smov 0   ;;  %s2906_s17 = smov 0  }
   0x3   :  { %s2908_s18 = smov 0   ;;  %s2910_s19 = smov 0  }
   0x4   :  { %s2912_s20 = smov 0   ;;  %s2914_s21 = smov 0  }
   0x5   :  { %s2916_s22 = smov 0  }
   0x6 LB: > { %s25_s23 = sadd.s32 1, %s2859_s19  ;;  %s28_s24 = sadd.s32 1, %s2863_s20  ;;  %s2871_s22 = sphi %s2916_s22, %s13_s22   ;;  %s2867_s21 = sphi %s2914_s21, %s4523_s21   ;;  %s2863_s20 = sphi %s2912_s20, %s4522_s20   ;;  %s2859_s19 = sphi %s2910_s19, %s4521_s19   ;;  %s2855_s18 = sphi %s2908_s18, %s4520_s18   ;;  %s2851_s17 = sphi %s2906_s17, %s4519_s17   ;;  %s2847_s16 = sphi %s2904_s16, %s4518_s16   ;;  %s2843_s15 = sphi %s2902_s15, %s4517_s15   ;;  %s2839_s14 = sphi %s2900_s14, %s4516_s14   ;;  %s2835_s13 = sphi %s2898_s13, %s4515_s13   ;;  %s2831_s12 = sphi %s2896_s12, %s4514_s12  }
   0x7   : > { %p26_p0 = scmp.ge.s32.totalorder %s25_s23, 2  ;;  %s32_s25 = sadd.s32 1, %s2867_s21 }
   0x8   : > { %p50_p1 = scmp.ne.s32.totalorder %s2843_s15, %s2839_s14  ;;  %p51_p3 = scmp.eq.s32.totalorder %s2871_s22, 0 }
   0x9   : > { %s4525_s23 = smov (%p26_p0, %s25_s23), 0  ;;  %s4527_s24 = smov (!%p26_p0, %s28_s24), %s2863_s20 }
   0xa   : > { %p30_p2 = scmp.ge.s32.totalorder %s4527_s24, 2  ;;  %s2270_s26 = sadd.s32 4294967295, %s2871_s22  }
   0xb   : > { %p78_p4 = scmp.ne.s32.totalorder %s2835_s13, %s2831_s12  ;;  %p2969_p5 = por %p51_p3, %p50_p1 }
   0xc   : > { %s4529_s24 = smov (%p30_p2, %s4527_s24), 0  ;;  %s4531_s25 = smov (!%p30_p2, %s32_s25), %s2867_s21 }
   0xd   : > { %4410 = sst [smem:[#allocation5_spill]] %s4529_s24  ;;  %p34_p6 = scmp.ge.s32.totalorder %s4531_s25, 2 }
   0xe   : > { %p2973_p7 = por %p78_p4, %p51_p3  ;;  %s37_s29 = ssub.s32 %s2863_s20, %s4529_s24 }
   0xf   : > { %p133_p8 = scmp.eq.s32.totalorder %s2270_s26, 7  ;;  %s4533_s25 = smov (%p34_p6, %s4531_s25), 0 }
  0x10   : > { %4413 = sst [smem:[#allocation6_spill]] %s4533_s25  ;;  %s39_s30 = ssub.s32 %s2859_s19, %s4525_s23 }
  0x11   : > { %p2986_p9 = por %p133_p8, %p50_p1  ;;  %s36_s5 = ssub.s32 %s2867_s21, %s4533_s25 }
  0x12   : > { %s43_s6 = sadd.s32 1, %s2843_s15  ;;  %s38_s7 = sor.u32 %s37_s29, %s36_s5 }
  0x13   : > { %s71_s8 = sadd.s32 1, %s2835_s13  ;;  %s40_s9 = sor.u32 %s39_s30, %s38_s7 }
  0x14   : > { %p69_p10 = scmp.eq.s32.totalorder %s38_s7, 0  ;;  %p41_p11 = scmp.eq.s32.totalorder %s40_s9, 0 }
  0x15   : > { %p2273_p12 = scmp.ge.s32.totalorder %s2871_s22, 8 }
  0x16   : > { %s2995_s10 = scalar_select %p69_p10, %s2835_s13, %s71_s8  }
  0x17   : > { %s2998_s11 = scalar_select %p41_p11, %s2843_s15, %s43_s6  }
  0x18   : > { %158 = sbr.rel (%p2273_p12) target bundleno = 91 (0x5b), region = 20 }
  0x1d   : > { %161 = sbr.rel (!%p2969_p5) target bundleno = 40 (0x28), region = 24  ;;  %s163_s26 = sand.u32 (%p2969_p5), 1, %s2843_s15  }
  0x1e   : > { %s2275_s29 = sshll.u32 (%p2969_p5), %s2863_s20, 3  ;;  %s2274_s5 = sshll.u32 (%p2969_p5), %s163_s26, 4 }
  0x1f   : > { %s167_s30 = sadd.s32 (%p2969_p5), %s2859_s19, %s2275_s29  ;;  %s2276_s7 = sshll.u32 (%p2969_p5), %s2867_s21, 4 }
  0x20   : > { %s169_s9 = sadd.s32 (%p2969_p5), %s2276_s7, %s167_s30  ;;  %s165_s27 = scalar_lea.vmem (%p2969_p5), [#allocation2], %s2274_s5 }
  0x21   : > { %s2277_s8 = sshll.u32 (%p2969_p5), %s169_s9, 2 }
  0x22   : > { %s171_s24 = scalar_lea.vmem %s4358_s0, %s2277_s8 }
  0x23   : > { %v188_v0 = vld [vmem:[%s171_s24] sm:$0xf]  ;;  %v190_v1 = vld [vmem:[%s171_s24 + $0x8] sm:$0xf]  ;;  %v192_v2 = vld [vmem:[%s171_s24 + $0x10] sm:$0xf] }
  0x24   : > { %189 = vst [vmem:[%s165_s27] sm:$0xf] %v188_v0  ;;  %v194_v3 = vld [vmem:[%s171_s24 + $0x18] sm:$0xf] }
  0x25   : > { %191 = vst [vmem:[%s165_s27 + $0x4] sm:$0xf] %v190_v1 }
  0x26   : > { %193 = vst [vmem:[%s165_s27 + $0x8] sm:$0xf] %v192_v2 }
  0x27   : > { %195 = vst [vmem:[%s165_s27 + $0xc] sm:$0xf] %v194_v3 }
  0x28 PF: > { %227 = sbr.rel (!%p2973_p7) target bundleno = 91 (0x5b), region = 65  ;;  %s229_s26 = sand.u32 (%p2973_p7), 1, %s2835_s13  }
  0x29   : > { %s2500_s29 = smul.u32 (%p2973_p7), 41, %s2863_s20 }
  0x2a   : > { %s2499_s25 = smul.u32 (%p2973_p7), 328, %s229_s26 }
  0x2b   : > { %s2501_s30 = smul.u32 (%p2973_p7), 164, %s2867_s21 }
  0x2c   : > { %s3023_s28 = scalar_lea.vmem (%p2973_p7), [#allocation3], %s2499_s25 }
  0x2d   : > { %s234_s7 = sadd.s32 %s2501_s30, %s2500_s29 }
  0x2e   : > { %s2278_s9 = sshll.u32 %s234_s7, 2 }
  0x2f   : > { %s3018_s24 = scalar_lea.vmem %s4359_s1, %s2278_s9 }
  0x30   : > { %v253_v4 = vld [vmem:[%s3018_s24] sm:$0xff]   ;;  %v257_v5 = vld [vmem:[%s3018_s24 + $0x8] sm:$0xff]   ;;  %v261_v6 = vld [vmem:[%s3018_s24 + $0x10] sm:$0xff]  }
  0x31   : > { %254 = vst [vmem:[%s3023_s28] sm:$0xff] %v253_v4   ;;  %v265_v7 = vld [vmem:[%s3018_s24 + $0x18] sm:$0xff]   ;;  %v269_v8 = vld [vmem:[%s3018_s24 + $0x20] sm:$0xff]   ;;  %v273_v9 = vld [vmem:[%s3018_s24 + $0x28] sm:$0xff]  }
  0x32   : > { %258 = vst [vmem:[%s3023_s28 + $0x8] sm:$0xff] %v257_v5   ;;  %v277_v10 = vld [vmem:[%s3018_s24 + $0x30] sm:$0xff]   ;;  %v281_v11 = vld [vmem:[%s3018_s24 + $0x38] sm:$0xff]   ;;  %v285_v12 = vld [vmem:[%s3018_s24 + $0x40] sm:$0xff]  }
  0x33   : > { %262 = vst [vmem:[%s3023_s28 + $0x10] sm:$0xff] %v261_v6   ;;  %v289_v13 = vld [vmem:[%s3018_s24 + $0x48] sm:$0xff]   ;;  %v293_v14 = vld [vmem:[%s3018_s24 + $0x50] sm:$0xff]   ;;  %v297_v15 = vld [vmem:[%s3018_s24 + $0x58] sm:$0xff]  }
  0x34   : > { %266 = vst [vmem:[%s3023_s28 + $0x18] sm:$0xff] %v265_v7   ;;  %v301_v16 = vld [vmem:[%s3018_s24 + $0x60] sm:$0xff]   ;;  %v305_v17 = vld [vmem:[%s3018_s24 + $0x68] sm:$0xff]   ;;  %v309_v18 = vld [vmem:[%s3018_s24 + $0x70] sm:$0xff]  }
  0x35   : > { %270 = vst [vmem:[%s3023_s28 + $0x20] sm:$0xff] %v269_v8   ;;  %v313_v19 = vld [vmem:[%s3018_s24 + $0x78] sm:$0xff]   ;;  %v317_v20 = vld [vmem:[%s3018_s24 + $0x80] sm:$0xff]   ;;  %v321_v21 = vld [vmem:[%s3018_s24 + $0x88] sm:$0xff]  }
  0x36   : > { %274 = vst [vmem:[%s3023_s28 + $0x28] sm:$0xff] %v273_v9   ;;  %v325_v22 = vld [vmem:[%s3018_s24 + $0x90] sm:$0xff]   ;;  %v329_v23 = vld [vmem:[%s3018_s24 + $0x98] sm:$0xff]   ;;  %v333_v24 = vld [vmem:[%s3018_s24 + $0xa0] sm:$0xf] }
  0x37   : > { %278 = vst [vmem:[%s3023_s28 + $0x30] sm:$0xff] %v277_v10   ;;  %v335_v25 = vld [vmem:[%s3018_s24 + $0x148] sm:$0xff]   ;;  %v339_v26 = vld [vmem:[%s3018_s24 + $0x150] sm:$0xff]   ;;  %v343_v27 = vld [vmem:[%s3018_s24 + $0x158] sm:$0xff]  }
  0x38   : > { %282 = vst [vmem:[%s3023_s28 + $0x38] sm:$0xff] %v281_v11   ;;  %v347_v28 = vld [vmem:[%s3018_s24 + $0x160] sm:$0xff]   ;;  %v351_v29 = vld [vmem:[%s3018_s24 + $0x168] sm:$0xff]   ;;  %v355_v30 = vld [vmem:[%s3018_s24 + $0x170] sm:$0xff]  }
  0x39   : > { %286 = vst [vmem:[%s3023_s28 + $0x40] sm:$0xff] %v285_v12   ;;  %v359_v31 = vld [vmem:[%s3018_s24 + $0x178] sm:$0xff]   ;;  %v363_v32 = vld [vmem:[%s3018_s24 + $0x180] sm:$0xff]   ;;  %v367_v33 = vld [vmem:[%s3018_s24 + $0x188] sm:$0xff]  }
  0x3a   : > { %290 = vst [vmem:[%s3023_s28 + $0x48] sm:$0xff] %v289_v13   ;;  %v371_v34 = vld [vmem:[%s3018_s24 + $0x190] sm:$0xff]   ;;  %v375_v35 = vld [vmem:[%s3018_s24 + $0x198] sm:$0xff]   ;;  %v379_v36 = vld [vmem:[%s3018_s24 + $0x1a0] sm:$0xff]  }
  0x3b   : > { %294 = vst [vmem:[%s3023_s28 + $0x50] sm:$0xff] %v293_v14   ;;  %v383_v37 = vld [vmem:[%s3018_s24 + $0x1a8] sm:$0xff]   ;;  %v387_v38 = vld [vmem:[%s3018_s24 + $0x1b0] sm:$0xff]   ;;  %v391_v39 = vld [vmem:[%s3018_s24 + $0x1b8] sm:$0xff]  }
  0x3c   : > { %298 = vst [vmem:[%s3023_s28 + $0x58] sm:$0xff] %v297_v15   ;;  %v395_v40 = vld [vmem:[%s3018_s24 + $0x1c0] sm:$0xff]   ;;  %v399_v41 = vld [vmem:[%s3018_s24 + $0x1c8] sm:$0xff]   ;;  %v403_v42 = vld [vmem:[%s3018_s24 + $0x1d0] sm:$0xff]  }
  0x3d   : > { %302 = vst [vmem:[%s3023_s28 + $0x60] sm:$0xff] %v301_v16   ;;  %v407_v43 = vld [vmem:[%s3018_s24 + $0x1d8] sm:$0xff]   ;;  %v411_v44 = vld [vmem:[%s3018_s24 + $0x1e0] sm:$0xff]   ;;  %v415_v45 = vld [vmem:[%s3018_s24 + $0x1e8] sm:$0xf] }
  0x3e   : > { %306 = vst [vmem:[%s3023_s28 + $0x68] sm:$0xff] %v305_v17  }
  0x3f   : > { %310 = vst [vmem:[%s3023_s28 + $0x70] sm:$0xff] %v309_v18  }
  0x40   : > { %314 = vst [vmem:[%s3023_s28 + $0x78] sm:$0xff] %v313_v19  }
  0x41   : > { %318 = vst [vmem:[%s3023_s28 + $0x80] sm:$0xff] %v317_v20  }
  0x42   : > { %322 = vst [vmem:[%s3023_s28 + $0x88] sm:$0xff] %v321_v21  }
  0x43   : > { %326 = vst [vmem:[%s3023_s28 + $0x90] sm:$0xff] %v325_v22  }
  0x44   : > { %330 = vst [vmem:[%s3023_s28 + $0x98] sm:$0xff] %v329_v23  }
  0x45   : > { %334 = vst [vmem:[%s3023_s28 + $0xa0] sm:$0xf] %v333_v24 }
  0x46   : > { %336 = vst [vmem:[%s3023_s28 + $0xa4] sm:$0xff] %v335_v25  }
  0x47   : > { %340 = vst [vmem:[%s3023_s28 + $0xac] sm:$0xff] %v339_v26  }
  0x48   : > { %344 = vst [vmem:[%s3023_s28 + $0xb4] sm:$0xff] %v343_v27  }
  0x49   : > { %348 = vst [vmem:[%s3023_s28 + $0xbc] sm:$0xff] %v347_v28  }
  0x4a   : > { %352 = vst [vmem:[%s3023_s28 + $0xc4] sm:$0xff] %v351_v29  }
  0x4b   : > { %356 = vst [vmem:[%s3023_s28 + $0xcc] sm:$0xff] %v355_v30  }
  0x4c   : > { %360 = vst [vmem:[%s3023_s28 + $0xd4] sm:$0xff] %v359_v31  }
  0x4d   : > { %364 = vst [vmem:[%s3023_s28 + $0xdc] sm:$0xff] %v363_v32  }
  0x4e   : > { %368 = vst [vmem:[%s3023_s28 + $0xe4] sm:$0xff] %v367_v33  }
  0x4f   : > { %372 = vst [vmem:[%s3023_s28 + $0xec] sm:$0xff] %v371_v34  }
  0x50   : > { %376 = vst [vmem:[%s3023_s28 + $0xf4] sm:$0xff] %v375_v35  }
  0x51   : > { %380 = vst [vmem:[%s3023_s28 + $0xfc] sm:$0xff] %v379_v36  }
  0x52   : > { %384 = vst [vmem:[%s3023_s28 + $0x104] sm:$0xff] %v383_v37  }
  0x53   : > { %388 = vst [vmem:[%s3023_s28 + $0x10c] sm:$0xff] %v387_v38  }
  0x54   : > { %392 = vst [vmem:[%s3023_s28 + $0x114] sm:$0xff] %v391_v39  }
  0x55   : > { %396 = vst [vmem:[%s3023_s28 + $0x11c] sm:$0xff] %v395_v40  }
  0x56   : > { %400 = vst [vmem:[%s3023_s28 + $0x124] sm:$0xff] %v399_v41  }
  0x57   : > { %404 = vst [vmem:[%s3023_s28 + $0x12c] sm:$0xff] %v403_v42  }
  0x58   : > { %408 = vst [vmem:[%s3023_s28 + $0x134] sm:$0xff] %v407_v43  }
  0x59   : > { %412 = vst [vmem:[%s3023_s28 + $0x13c] sm:$0xff] %v411_v44  }
  0x5a   : > { %416 = vst [vmem:[%s3023_s28 + $0x144] sm:$0xf] %v415_v45 }
  0x5b PF: > { %p2279_p13 = scmp.ge.s32.totalorder %s2871_s22, 1  ;;  %p603_p0 = scmp.lt.s32.totalorder %s2871_s22, 9 }
  0x5d   : > { %p604_p1 = pnand %p2279_p13, %p603_p0 }
  0x5f   : > { %607 = sbr.rel (%p604_p1) target bundleno = 1558 (0x616), region = 106 }
  0x64   : > { %s610_s6 = sand.u32 1, %s2839_s14   ;;  %s617_s27 = sand.u32 1, %s2831_s12   ;;  %vm945_vm0 = vcmask 261120   ;;  %vm829_vm1 = vcmask 1041408   ;;  %vm1185_vm2 = vcmask 424960   ;;  %vm1346_vm3 = vcmask 1047968  }
  0x65   : > { %s3112_s26 = sshll.u32 %s610_s6, 4  ;;  %s2502_s29 = smul.u32 328, %s617_s27  ;;  %vm1348_vm4 = vcmask 850944   ;;  %vm1716_vm5 = vcmask 621568  }
  0x66   : > { %s644_s25 = smul.u32 144, %s2847_s16  ;;  %s612_s30 = scalar_lea.vmem [#allocation2], %s3112_s26 }
  0x67   : > { %v2435_v46 = vld [vmem:[%s612_s30] sm:$0xff]  ;;  %s619_s8 = scalar_lea.vmem [#allocation3], %s2502_s29  ;;  %v2436_v7 = vld [vmem:[%s612_s30 + $0x8] sm:$0xff]  ;;  %s2873_s12 = smov 76  }
  0x68   : > { %s649_s7 = sshra.s32 %s644_s25, 3  ;;  %929 = vxpose.xlu0.c.b16.start [1/2] (short) %v2435_v46, 128  ;;  %s2281_s24 = sshll.u32 %s610_s6, 5 }
  0x69   : > { %s2282_s9 = sshll.u32 %s649_s7, 2  ;;  %s642_s28 = scalar_lea.vmem [#allocation4], %s2281_s24 }
  0x6a   : > { %s3118_s5 = scalar_lea.vmem %s619_s8, %s2282_s9 [#allocation3]  ;;  %s2430_s14 = sshll.u32 (%p2986_p9), %s2851_s17, 3 }
  0x6b   : > { %v2444_v47 = vld [vmem:[%s3118_s5 + $0x38] sm:$0xff]  ;;  %v3123_v49 = vld [vmem:[%s3118_s5 + $0xc4] sm:$0xff]  ;;  %v2443_v58 = vld [vmem:[%s3118_s5 + $0x30] sm:$0xff]  ;;  %s2431_s6 = sshll.u32 (%p2986_p9), %s2855_s18, 4  ;;  %s2112_s27 = sadd.s32 (%p2986_p9), %s2847_s16, %s2430_s14 }
  0x6c   : > { %v2451_v48 = vld [vmem:[%s3118_s5 + $0xbc] sm:$0xff]  ;;  %v2450_v50 = vld [vmem:[%s3118_s5 + $0xb4] sm:$0xff]  ;;  %v992_v52 = vsel %vm945_vm0, %v2444_v47, 0  ;;  %v837_v54 = vrot.slane %v3123_v49, 6  ;;  %2473 = vmatpush.lsf.bf16.msrb.mxu3 %v2444_v47  ;;  %v2457_v63 = vld [vmem:[%s3118_s5 + $0xec] sm:$0xff]  ;;  %v989_v1 = vsel %vm945_vm0, %v2443_v58, 0  ;;  %s2114_s26 = sadd.s32 (%p2986_p9), %s2431_s6, %s2112_s27 }
  0x6d   : > { %v2458_v51 = vld [vmem:[%s3118_s5 + $0xf4] sm:$0xff]  ;;  %v835_v53 = vrot.slane %v2451_v48, 6  ;;  %v2306_v55 = vld [vmem:[%s3118_s5 + $0xfc] sm:$0x3]  ;;  %1038 = vmatpush.bf16.xpose.msra.mxu0 %v992_v52  ;;  %v833_v59 = vrot.slane %v2450_v50, 6  ;;  %v2442_v3 = vld [vmem:[%s3118_s5 + $0x28] sm:$0xff] }
  0x6e   : > { %v816_v56 = vunpack.c.l.b16 %v2306_v55  ;;  %v849_v62 = vrot.slane %v2458_v51, 6  ;;  %v2449_v4 = vld [vmem:[%s3118_s5 + $0xac] sm:$0xff]  ;;  %v847_v6 = vrot.slane %v2457_v63, 6  ;;  %v2441_v12 = vld [vmem:[%s3118_s5 + $0x20] sm:$0xff]  ;;  %v986_v14 = vsel %vm945_vm0, %v2442_v3, 0  ;;  %v2440_v19 = vld [vmem:[%s3118_s5 + $0x18] sm:$0xff] }
  0x6f   : > { %v3133_v57 = vsel %vm829_vm1, %v835_v53, %v837_v54  ;;  %v3141_v2 = vsel %vm829_vm1, %v833_v59, %v835_v53  ;;  %v831_v10 = vrot.slane %v2449_v4, 6  ;;  %v2456_v13 = vld [vmem:[%s3118_s5 + $0xe4] sm:$0xff]  ;;  %v675_v23 = vld [vmem:[%s3118_s5 + $0x58] sm:$0x3]  ;;  %v2455_v24 = vld [vmem:[%s3118_s5 + $0xdc] sm:$0xff]  ;;  %v983_v26 = vsel %vm945_vm0, %v2441_v12, 0 }
  0x70   : > { %v1015_v60 = vsel %vm945_vm0, %v3133_v57, 0  ;;  %v828_v61 = vpack.c.b16 %v816_v56, %v816_v56  ;;  %2474 = vmatpush.lsf.bf16.msrb.mxu3 %v2443_v58  ;;  %v1012_v9 = vsel %vm945_vm0, %v3141_v2, 0  ;;  %v3155_v11 = vsel %vm829_vm1, %v847_v6, %v849_v62  ;;  %v2448_v17 = vld [vmem:[%s3118_s5 + $0xa4] sm:$0xff]  ;;  %v2439_v25 = vld [vmem:[%s3118_s5 + $0x10] sm:$0xff]  ;;  %s2432_s29 = sshll.u32 (%p2986_p9), %s2114_s26, 3 }
  0x71   : > { %1087 = vmatpush.bf16.xpose.msra.mxu1 %v1015_v60  ;;  %4416 = vst [vmem:[#allocation8_spill] sm:$0xff] %v3155_v11  ;;  %v834_v15 = vsel %vm829_vm1, %v831_v10, %v833_v59  ;;  %v1033_v16 = vsel %vm945_vm0, %v3155_v11, 0  ;;  %v845_v18 = vrot.slane %v2456_v13, 6  ;;  %v830_v21 = vrot.slane %v2448_v17, 6  ;;  %v2438_v31 = vld [vmem:[%s3118_s5 + $0x8] sm:$0xff]  ;;  %v2454_v35 = vld [vmem:[%s3118_s5 + $0xd4] sm:$0xff]  ;;  %s2116_s7 = scalar_lea.vmem (%p2986_p9), %s4361_s3, %s2432_s29 }
  0x72   : > { %v851_v0 = vrot.slane %v828_v61, 6  ;;  %v1009_v20 = vsel %vm945_vm0, %v834_v15, 0  ;;  %v747_v29 = vunpack.c.l.b16 %v675_v23  ;;  %v843_v30 = vrot.slane %v2455_v24, 6  ;;  %v2437_v36 = vld [vmem:[%s3118_s5] sm:$0xff]  ;;  %v2453_v43 = vld [vmem:[%s3118_s5 + $0xcc] sm:$0xff]  ;;  %v872_v23 = vld [vmem:[%s4360_s2 + $0x18] sm:$0xff] }
  0x73   : > { %v3167_v22 = vsel %vm829_vm1, %v845_v18, %v847_v6  ;;  %v832_v27 = vsel %vm829_vm1, %v830_v21, %v831_v10  ;;  %v980_v37 = vsel %vm945_vm0, %v2440_v19, 0  ;;  %v841_v40 = vrot.slane %v2454_v35, 6  ;;  %v2447_v44 = vld [vmem:[%s3118_s5 + $0x50] sm:$0xff]  ;;  %v2446_v51 = vld [vmem:[%s3118_s5 + $0x48] sm:$0xff] }
  0x74   : > { %v3146_v5 = vsel %vm829_vm1, %v849_v62, %v851_v0  ;;  %2475 = vmatpush.lsf.bf16.msrb.mxu3 %v2442_v3  ;;  %4417 = vst [vmem:[#allocation9_spill] sm:$0xff] %v3167_v22  ;;  %v1030_v28 = vsel %vm945_vm0, %v3167_v22, 0  ;;  %v1006_v32 = vsel %vm945_vm0, %v832_v27, 0  ;;  %v759_v33 = vpack.c.b16 %v747_v29, %v747_v29  ;;  %v869_v3 = vld [vmem:[%s4360_s2] sm:$0xff]  ;;  %v870_v4 = vld [vmem:[%s4360_s2 + $0x8] sm:$0xff]  ;;  %v871_v13 = vld [vmem:[%s4360_s2 + $0x10] sm:$0xff] }
  0x75   : > { %4415 = vst [vmem:[#allocation7_spill] sm:$0xff] %v3146_v5  ;;  %v1036_v8 = vsel %vm945_vm0, %v3146_v5, 0  ;;  %1039 = vmatpush.bf16.xpose.msra.mxu0 %v989_v1  ;;  %v3179_v34 = vsel %vm829_vm1, %v843_v30, %v845_v18  ;;  %v3190_v42 = vsel %vm829_vm1, %v841_v40, %v843_v30  ;;  %v977_v45 = vsel %vm945_vm0, %v2439_v25, 0  ;;  %v873_v18 = vld [vmem:[%s4360_s2 + $0x20] sm:$0xff] }
  0x76   : > { %1137 = vmatpush.bf16.xpose.msra.mxu2 %v1036_v8  ;;  %4418 = vst [vmem:[#allocation10_spill] sm:$0xff] %v3179_v34  ;;  %v867_v38 = vsel %vm829_vm1, %v759_v33, %v830_v21  ;;  %v1027_v39 = vsel %vm945_vm0, %v3179_v34, 0  ;;  %v1024_v46 = vsel %vm945_vm0, %v3190_v42, 0  ;;  %v839_v47 = vrot.slane %v2453_v43, 6 }
  0x77   : > { %v1003_v41 = vsel %vm945_vm0, %v867_v38, 0  ;;  %4419 = vst [vmem:[#allocation11_spill] sm:$0xff] %v3190_v42  ;;  %v1001_v48 = vsel %vm945_vm0, %v2447_v44, 0  ;;  %v974_v52 = vsel %vm945_vm0, %v2438_v31, 0  ;;  %v998_v55 = vsel %vm945_vm0, %v2446_v51, 0 }
  0x78   : > { %930 = vxpose.xlu0.c.b16.end [2/2] (short) %v2436_v7, 128  ;;  %2476 = vmatpush.lsf.bf16.msrb.mxu3 %v2441_v12  ;;  %v3200_v50 = vsel %vm829_vm1, %v839_v47, %v841_v40  ;;  %v3210_v56 = vsel %vm829_vm1, %v837_v54, %v839_v47  ;;  %v971_v58 = vsel %vm945_vm0, %v2437_v36, 0  ;;  %v878_v40 = vld [vmem:[%s4360_s2 + $0x48] sm:$0xff] }
  0x79   : > { %1088 = vmatpush.bf16.xpose.msra.mxu1 %v1012_v9  ;;  %4420 = vst [vmem:[#allocation12_spill] sm:$0xff] %v3200_v50  ;;  %v1021_v53 = vsel %vm945_vm0, %v3200_v50, 0  ;;  %v1018_v59 = vsel %vm945_vm0, %v3210_v56, 0 }
  0x7a   : > { %4421 = vst [vmem:[#allocation13_spill] sm:$0xff] %v3210_v56 }
  0x7c   : > { %2477 = vmatpush.lsf.bf16.msrb.mxu3 %v2440_v19 }
  0x7d   : > { %1040 = vmatpush.bf16.xpose.msra.mxu0 %v986_v14 }
  0x7e   : > { %1138 = vmatpush.bf16.xpose.msra.mxu2 %v1033_v16 }
  0x80   : > { %2478 = vmatpush.lsf.bf16.msrb.mxu3 %v2439_v25  ;;  %v874_v25 = vld [vmem:[%s4360_s2 + $0x28] sm:$0xff] }
  0x81   : > { %1089 = vmatpush.bf16.xpose.msra.mxu1 %v1009_v20 }
  0x84   : > { %2479 = vmatpush.lsf.bf16.msrb.mxu3 %v2438_v31 }
  0x85   : > { %1041 = vmatpush.bf16.xpose.msra.mxu0 %v983_v26 }
  0x86   : > { %1139 = vmatpush.bf16.xpose.msra.mxu2 %v1030_v28 }
  0x88   : > { %2480 = vmatpush.lsf.bf16.msrb.mxu3 %v2437_v36 }
  0x89   : > { %1090 = vmatpush.bf16.xpose.msra.mxu1 %v1006_v32  ;;  %v876_v32 = vld [vmem:[%s4360_s2 + $0x38] sm:$0xff] }
  0x8a   : > { %2481 = vllmr.4.mxu3 }
  0x8c   : > { %2486 = vmatpush.lsf.bf16.msrb.mxu3 %v3133_v57  ;;  %v2445_v57 = vld [vmem:[%s3118_s5 + $0x40] sm:$0xff] }
  0x8d   : > { %1042 = vmatpush.bf16.xpose.msra.mxu0 %v980_v37  ;;  %v995_v60 = vsel %vm945_vm0, %v2445_v57, 0 }
  0x8e   : > { %1140 = vmatpush.bf16.xpose.msra.mxu2 %v1027_v39 }
  0x90   : > { %2487 = vmatpush.lsf.bf16.msrb.mxu3 %v3141_v2 }
  0x91   : > { %1091 = vmatpush.bf16.xpose.msra.mxu1 %v1003_v41  ;;  %v879_v41 = vld [vmem:[%s4360_s2 + $0x50] sm:$0xff] }
  0x94   : > { %2488 = vmatpush.lsf.bf16.msrb.mxu3 %v834_v15 }
  0x95   : > { %1043 = vmatpush.bf16.xpose.msra.mxu0 %v977_v45 }
  0x96   : > { %1141 = vmatpush.bf16.xpose.msra.mxu2 %v1024_v46 }
  0x98   : > { %2489 = vmatpush.lsf.bf16.msrb.mxu3 %v832_v27 }
  0x99   : > { %1092 = vmatpush.bf16.xpose.msra.mxu1 %v1001_v48  ;;  %v877_v48 = vld [vmem:[%s4360_s2 + $0x40] sm:$0xff] }
  0x9c   : > { %2490 = vmatpush.lsf.bf16.msrb.mxu3 %v867_v38  ;;  %v875_v38 = vld [vmem:[%s4360_s2 + $0x30] sm:$0xff] }
  0x9d   : > { %1044 = vmatpush.bf16.xpose.msra.mxu0 %v974_v52 }
  0x9e   : > { %1142 = vmatpush.bf16.xpose.msra.mxu2 %v1021_v53 }
  0xa0   : > { %2491 = vmatpush.lsf.bf16.msrb.mxu3 %v2447_v44 }
  0xa1   : > { %1093 = vmatpush.bf16.xpose.msra.mxu1 %v998_v55 }
  0xa4   : > { %2492 = vmatpush.lsf.bf16.msrb.mxu3 %v2446_v51 }
  0xa5   : > { %1045 = vmatpush.bf16.xpose.msra.mxu0 %v971_v58 }
  0xa6   : > { %1143 = vmatpush.bf16.xpose.msra.mxu2 %v1018_v59  ;;  %v880_v59 = vld [vmem:[%s4360_s2 + $0x58] sm:$0xff] }
  0xa8   : > { %2493 = vmatpush.lsf.bf16.msrb.mxu3 %v2445_v57 }
  0xa9   : > { %1094 = vmatpush.bf16.xpose.msra.mxu1 %v995_v60 }
 0x114   : > { %v937_v61 = vpop.trf.xlu0 }
 0x115   : > { %2403 = vmatmul.msk.bf16.vlgmr.msra.gmra.mxu0 %vm945_vm0, %v937_v61  ;;  %2411 = vmatmul.msk.bf16.vlgmr.msra.gmra.mxu1 %vm945_vm0, %v937_v61 }
 0x116   : > { %2419 = vmatmul.msk.bf16.vlgmr.msra.gmra.mxu2 %vm945_vm0, %v937_v61 }
 0x124   : > { %v938_v49 = vpop.trf.xlu0 }
 0x125   : > { %2404 = vmatmul.msk.bf16.gmra.mxu0 %vm945_vm0, %v938_v49  ;;  %2412 = vmatmul.msk.bf16.gmra.mxu1 %vm945_vm0, %v938_v49 }
 0x126   : > { %2420 = vmatmul.msk.bf16.gmra.mxu2 %vm945_vm0, %v938_v49 }
 0x134   : > { %v939_v54 = vpop.trf.xlu0 }
 0x135   : > { %2405 = vmatmul.msk.bf16.gmra.mxu0 %vm945_vm0, %v939_v54  ;;  %2413 = vmatmul.msk.bf16.gmra.mxu1 %vm945_vm0, %v939_v54 }
 0x136   : > { %2421 = vmatmul.msk.bf16.gmra.mxu2 %vm945_vm0, %v939_v54 }
 0x144   : > { %v940_v62 = vpop.trf.xlu0 }
 0x145   : > { %2406 = vmatmul.msk.bf16.gmra.mxu0 %vm945_vm0, %v940_v62  ;;  %2414 = vmatmul.msk.bf16.gmra.mxu1 %vm945_vm0, %v940_v62 }
 0x146   : > { %2422 = vmatmul.msk.bf16.gmra.mxu2 %vm945_vm0, %v940_v62 }
 0x154   : > { %v941_v63 = vpop.trf.xlu0 }
 0x155   : > { %2407 = vmatmul.msk.bf16.gmra.mxu0 %vm945_vm0, %v941_v63  ;;  %2415 = vmatmul.msk.bf16.gmra.mxu1 %vm945_vm0, %v941_v63 }
 0x156   : > { %2423 = vmatmul.msk.bf16.gmra.mxu2 %vm945_vm0, %v941_v63  ;;  %v882_v63 = vld [vmem:[%s4360_s2 + $0x68] sm:$0xff] }
 0x164   : > { %v942_v0 = vpop.trf.xlu0 }
 0x165   : > { %2408 = vmatmul.msk.bf16.gmra.mxu0 %vm945_vm0, %v942_v0  ;;  %2416 = vmatmul.msk.bf16.gmra.mxu1 %vm945_vm0, %v942_v0 }
 0x166   : > { %2424 = vmatmul.msk.bf16.gmra.mxu2 %vm945_vm0, %v942_v0 }
 0x174   : > { %v943_v1 = vpop.trf.xlu0 }
 0x175   : > { %2409 = vmatmul.msk.bf16.gmra.mxu0 %vm945_vm0, %v943_v1  ;;  %2417 = vmatmul.msk.bf16.gmra.mxu1 %vm945_vm0, %v943_v1 }
 0x176   : > { %2425 = vmatmul.msk.bf16.gmra.mxu2 %vm945_vm0, %v943_v1 }
 0x184   : > { %v944_v2 = vpop.trf.xlu0 }
 0x185   : > { %2410 = vmatmul.msk.bf16.gmra.mxu0 %vm945_vm0, %v944_v2  ;;  %2418 = vmatmul.msk.bf16.gmra.mxu1 %vm945_vm0, %v944_v2 }
 0x186   : > { %2426 = vmatmul.msk.bf16.gmra.mxu2 %vm945_vm0, %v944_v2 }
 0x192   : > { %v1047_v6 = vpop.f32.mrf.mxu0  ;;  %v1096_v7 = vpop.f32.mrf.mxu1 }
 0x193   : > { %v3247_v8 = vadd.f32 %v1047_v6, %v869_v3  ;;  %v3249_v9 = vadd.f32 %v1096_v7, %v870_v4  ;;  %v881_v4 = vld [vmem:[%s4360_s2 + $0x60] sm:$0xff] }
 0x195   : > { %v1186_v10 = vsel %vm1185_vm2, %v3249_v9, -inf  ;;  %v1347_v19 = vsel %vm1346_vm3, %v3249_v9, -inf }
 0x196   : > { %v1187_v12 = vmax.f32 %v3247_v8, %v1186_v10  ;;  %v884_v10 = vld [vmem:[%s4360_s2 + $0x78] sm:$0xff] }
 0x198   : > { %1188 = vmax.xlane.f32.xlu2 %v1187_v12  ;;  %v885_v12 = vld [vmem:[%s4360_s2 + $0x80] sm:$0xff] }
 0x199   : > { %v1145_v14 = vpop.f32.mrf.mxu2 }
 0x19a   : > { %v3257_v15 = vadd.f32 %v1145_v14, %v871_v13  ;;  %v1049_v16 = vpop.f32.mrf.mxu0  ;;  %v1098_v17 = vpop.f32.mrf.mxu1 }
 0x19b   : > { %v3269_v24 = vadd.f32 %v1098_v17, %v873_v18  ;;  %v3274_v26 = vadd.f32 %v1049_v16, %v872_v23 }
 0x19c   : > { %v1349_v20 = vsel %vm1348_vm4, %v3257_v15, -inf }
 0x19d   : > { %v1350_v21 = vmax.f32 %v1347_v19, %v1349_v20  ;;  %4422 = vst [vmem:[#allocation14_spill] sm:$0xff] %v3269_v24  ;;  %v1190_v31 = vsel %vm1185_vm2, %v3269_v24, -inf  ;;  %v1353_v33 = vsel %vm1346_vm3, %v3269_v24, -inf  ;;  %v883_v19 = vld [vmem:[%s4360_s2 + $0x70] sm:$0xff] }
 0x19e   : > { %v1191_v36 = vmax.f32 %v3274_v26, %v1190_v31 }
 0x19f   : > { %1351 = vmax.xlane.f32.xlu1 %v1350_v21 }
 0x1a1   : > { %v1147_v27 = vpop.f32.mrf.mxu2 }
 0x1a2   : > { %v3276_v28 = vadd.f32 %v1147_v27, %v874_v25  ;;  %v1052_v29 = vpop.f32.mrf.mxu0  ;;  %v1101_v30 = vpop.f32.mrf.mxu1 }
 0x1a3   : > { %v3291_v39 = vadd.f32 %v1101_v30, %v876_v32  ;;  %v3299_v43 = vadd.f32 %v1052_v29, %v875_v38  ;;  %v886_v30 = vld [vmem:[%s4360_s2 + $0x88] sm:$0xff] }
 0x1a4   : > { %4423 = vst [vmem:[#allocation15_spill] sm:$0xff] %v3276_v28  ;;  %v1354_v35 = vsel %vm1348_vm4, %v3276_v28, -inf }
 0x1a5   : > { %v1355_v37 = vmax.f32 %v1353_v33, %v1354_v35  ;;  %v1194_v47 = vsel %vm1185_vm2, %v3291_v39, -inf  ;;  %v1358_v0 = vsel %vm1346_vm3, %v3291_v39, -inf }
 0x1a6   : > { %v1195_v53 = vmax.f32 %v3299_v43, %v1194_v47 }
 0x1a7   : > { %1192 = vmax.xlane.f32.xlu1 %v1191_v36  ;;  %1356 = vmax.xlane.f32.xlu2 %v1355_v37  ;;  %v888_v37 = vld [vmem:[%s4360_s2 + $0x98] sm:$0xff] }
 0x1a9   : > { %v1150_v44 = vpop.f32.mrf.mxu2 }
 0x1aa   : > { %v1054_v45 = vpop.f32.mrf.mxu0  ;;  %v1103_v46 = vpop.f32.mrf.mxu1  ;;  %v3313_v57 = vadd.f32 %v1150_v44, %v877_v48  ;;  %v890_v48 = vld [vmem:[%s4360_s2 + $0xa8] sm:$0xff] }
 0x1ab   : > { %v3306_v51 = vadd.f32 %v1054_v45, %v878_v40  ;;  %v3308_v52 = vadd.f32 %v1103_v46, %v879_v41  ;;  %v887_v45 = vld [vmem:[%s4360_s2 + $0x90] sm:$0xff] }
 0x1ac   : > { %v1359_v62 = vsel %vm1348_vm4, %v3313_v57, -inf }
 0x1ad   : > { %v1198_v55 = vsel %vm1185_vm2, %v3308_v52, -inf  ;;  %v1360_v2 = vmax.f32 %v1358_v0, %v1359_v62  ;;  %v1363_v3 = vsel %vm1346_vm3, %v3308_v52, -inf }
 0x1ae   : > { %v1199_v58 = vmax.f32 %v3306_v51, %v1198_v55 }
 0x1af   : > { %1196 = vmax.xlane.f32.xlu2 %v1195_v53  ;;  %v891_v53 = vld [vmem:[%s4360_s2 + $0xb0] sm:$0xff] }
 0x1b0   : > { %1200 = vmax.xlane.f32.xlu1 %v1199_v58 }
 0x1b1   : > { %v1152_v60 = vpop.f32.mrf.mxu2 }
 0x1b2   : > { %v3319_v61 = vadd.f32 %v1152_v60, %v880_v59  ;;  %v1057_v49 = vpop.f32.mrf.mxu0  ;;  %v1106_v54 = vpop.f32.mrf.mxu1 }
 0x1b3   : > { %v3335_v6 = vadd.f32 %v1106_v54, %v882_v63  ;;  %v3343_v13 = vadd.f32 %v1057_v49, %v881_v4  ;;  %v889_v54 = vld [vmem:[%s4360_s2 + $0xa0] sm:$0xff]  ;;  %v892_v4 = vld [vmem:[%s4360_s2 + $0xb8] sm:$0xff] }
 0x1b4   : > { %v1364_v1 = vsel %vm1348_vm4, %v3319_v61, -inf }
 0x1b5   : > { %v1365_v7 = vmax.f32 %v1363_v3, %v1364_v1  ;;  %v1202_v18 = vsel %vm1185_vm2, %v3335_v6, -inf  ;;  %v1368_v38 = vsel %vm1346_vm3, %v3335_v6, -inf }
 0x1b6   : > { %v1203_v23 = vmax.f32 %v3343_v13, %v1202_v18 }
 0x1b7   : > { %1361 = vmax.xlane.f32.xlu2 %v1360_v2 }
 0x1b8   : > { %1366 = vmax.xlane.f32.xlu1 %v1365_v7  ;;  %v893_v7 = vld [vmem:[%s4360_s2 + $0xc0] sm:$0xff] }
 0x1b9   : > { %v1155_v14 = vpop.f32.mrf.mxu2 }
 0x1ba   : > { %v1059_v16 = vpop.f32.mrf.mxu0  ;;  %v1108_v17 = vpop.f32.mrf.mxu1  ;;  %v3357_v27 = vadd.f32 %v1155_v14, %v883_v19 }
 0x1bb   : > { %v3350_v20 = vadd.f32 %v1059_v16, %v884_v10  ;;  %v3352_v21 = vadd.f32 %v1108_v17, %v885_v12  ;;  %v894_v10 = vld [vmem:[%s4360_s2 + $0xc8] sm:$0xff] }
 0x1bc   : > { %v1369_v36 = vsel %vm1348_vm4, %v3357_v27, -inf }
 0x1bd   : > { %v1206_v25 = vsel %vm1185_vm2, %v3352_v21, -inf  ;;  %v1370_v41 = vmax.f32 %v1368_v38, %v1369_v36  ;;  %v1373_v44 = vsel %vm1346_vm3, %v3352_v21, -inf  ;;  %v896_v38 = vld [vmem:[%s4360_s2 + $0xd8] sm:$0xff] }
 0x1be   : > { %v1207_v29 = vmax.f32 %v3350_v20, %v1206_v25 }
 0x1bf   : > { %1204 = vmax.xlane.f32.xlu2 %v1203_v23 }
 0x1c0   : > { %1208 = vmax.xlane.f32.xlu1 %v1207_v29 }
 0x1c1   : > { %v1157_v31 = vpop.f32.mrf.mxu2 }
 0x1c2   : > { %v3363_v32 = vadd.f32 %v1157_v31, %v886_v30  ;;  %v1062_v33 = vpop.f32.mrf.mxu0  ;;  %v1111_v35 = vpop.f32.mrf.mxu1 }
 0x1c3   : > { %v3379_v46 = vadd.f32 %v1111_v35, %v888_v37  ;;  %v3387_v55 = vadd.f32 %v1062_v33, %v887_v45  ;;  %v895_v37 = vld [vmem:[%s4360_s2 + $0xd0] sm:$0xff] }
 0x1c4   : > { %v1374_v40 = vsel %vm1348_vm4, %v3363_v32, -inf }
 0x1c5   : > { %v1375_v47 = vmax.f32 %v1373_v44, %v1374_v40  ;;  %v1210_v49 = vsel %vm1185_vm2, %v3379_v46, -inf  ;;  %v1378_v25 = vsel %vm1346_vm3, %v3379_v46, -inf  ;;  %v897_v40 = vld [vmem:[%s4360_s2 + $0xe0] sm:$0xff] }
 0x1c6   : > { %v1211_v0 = vmax.f32 %v3387_v55, %v1210_v49 }
 0x1c7   : > { %1371 = vmax.xlane.f32.xlu2 %v1370_v41 }
 0x1c8   : > { %1376 = vmax.xlane.f32.xlu1 %v1375_v47 }
 0x1c9   : > { %v1160_v58 = vpop.f32.mrf.mxu2 }
 0x1ca   : > { %v1064_v59 = vpop.f32.mrf.mxu0  ;;  %v1113_v60 = vpop.f32.mrf.mxu1  ;;  %v3401_v2 = vadd.f32 %v1160_v58, %v889_v54 }
 0x1cb   : > { %v3394_v62 = vadd.f32 %v1064_v59, %v890_v48  ;;  %v3396_v63 = vadd.f32 %v1113_v60, %v891_v53 }
 0x1cc   : > { %v1379_v18 = vsel %vm1348_vm4, %v3401_v2, -inf }
 0x1cd   : > { %v1214_v1 = vsel %vm1185_vm2, %v3396_v63, -inf  ;;  %v1380_v30 = vmax.f32 %v1378_v25, %v1379_v18  ;;  %v1383_v31 = vsel %vm1346_vm3, %v3396_v63, -inf  ;;  %v899_v18 = vld [vmem:[%s4360_s2 + $0xf0] sm:$0xff] }
 0x1ce   : > { %v1215_v3 = vmax.f32 %v3394_v62, %v1214_v1 }
 0x1cf   : > { %1212 = vmax.xlane.f32.xlu2 %v1211_v0  ;;  %v898_v0 = vld [vmem:[%s4360_s2 + $0xe8] sm:$0xff] }
 0x1d0   : > { %1216 = vmax.xlane.f32.xlu1 %v1215_v3 }
 0x1d1   : > { %v1162_v12 = vpop.f32.mrf.mxu2 }
 0x1d2   : > { %v3413_v14 = vadd.f32 %v1162_v12, %v892_v4  ;;  %v1067_v16 = vpop.f32.mrf.mxu0  ;;  %v1116_v17 = vpop.f32.mrf.mxu1 }
 0x1d3   : > { %v3417_v19 = vadd.f32 %v1067_v16, %v893_v7  ;;  %v3419_v23 = vadd.f32 %v1116_v17, %v894_v10  ;;  %v900_v10 = vld [vmem:[%s4360_s2 + $0xf8] sm:$0xff] }
 0x1d4   : > { %v1384_v29 = vsel %vm1348_vm4, %v3413_v14, -inf }
 0x1d5   : > { %v1218_v33 = vsel %vm1185_vm2, %v3419_v23, -inf  ;;  %v1385_v35 = vmax.f32 %v1383_v31, %v1384_v29  ;;  %v1388_v58 = vsel %vm1346_vm3, %v3419_v23, -inf  ;;  %v901_v29 = vld [vmem:[%s4360_s2 + $0x100] sm:$0xff] }
 0x1d6   : > { %v1219_v36 = vmax.f32 %v3417_v19, %v1218_v33 }
 0x1d7   : > { %1381 = vmax.xlane.f32.xlu2 %v1380_v30 }
 0x1d8   : > { %1386 = vmax.xlane.f32.xlu1 %v1385_v35  ;;  %1220 = vmax.xlane.f32.xlu0 %v1219_v36 }
 0x1d9   : > { %v1165_v41 = vpop.f32.mrf.mxu2 }
 0x1da   : > { %v3439_v44 = vadd.f32 %v1165_v41, %v895_v37  ;;  %v1069_v45 = vpop.f32.mrf.mxu0  ;;  %v1118_v47 = vpop.f32.mrf.mxu1  ;;  %v903_v37 = vld [vmem:[%s4360_s2 + $0x110] sm:$0xff] }
 0x1db   : > { %v3441_v48 = vadd.f32 %v1069_v45, %v896_v38  ;;  %v3443_v53 = vadd.f32 %v1118_v47, %v897_v40  ;;  %v902_v47 = vld [vmem:[%s4360_s2 + $0x108] sm:$0xff] }
 0x1dc   : > { %v1389_v59 = vsel %vm1348_vm4, %v3439_v44, -inf }
 0x1dd   : > { %v1390_v60 = vmax.f32 %v1388_v58, %v1389_v59  ;;  %v1222_v49 = vsel %vm1185_vm2, %v3443_v53, -inf  ;;  %v1393_v16 = vsel %vm1346_vm3, %v3443_v53, -inf }
 0x1de   : > { %v1223_v54 = vmax.f32 %v3441_v48, %v1222_v49 }
 0x1df   : > { %1391 = vmax.xlane.f32.xlu2 %v1390_v60  ;;  %v904_v60 = vld [vmem:[%s4360_s2 + $0x118] sm:$0xff] }
 0x1e0   : > { %1224 = vmax.xlane.f32.xlu1 %v1223_v54 }
 0x1e1   : > { %v1167_v1 = vpop.f32.mrf.mxu2 }
 0x1e2   : > { %v3455_v3 = vadd.f32 %v1167_v1, %v898_v0  ;;  %v1072_v4 = vpop.f32.mrf.mxu0  ;;  %v1121_v7 = vpop.f32.mrf.mxu1  ;;  %v906_v0 = vld [vmem:[%s4360_s2 + $0x128] sm:$0xff] }
 0x1e3   : > { %v3467_v25 = vadd.f32 %v1121_v7, %v900_v10  ;;  %v3472_v31 = vadd.f32 %v1072_v4, %v899_v18 }
 0x1e4   : > { %v1394_v12 = vsel %vm1348_vm4, %v3455_v3, -inf }
 0x1e5   : > { %v1395_v17 = vmax.f32 %v1393_v16, %v1394_v12  ;;  %v1226_v38 = vsel %vm1185_vm2, %v3467_v25, -inf  ;;  %v1398_v40 = vsel %vm1346_vm3, %v3467_v25, -inf  ;;  %v905_v12 = vld [vmem:[%s4360_s2 + $0x120] sm:$0xff] }
 0x1e6   : > { %v1227_v59 = vmax.f32 %v3472_v31, %v1226_v38 }
 0x1e8   : > { %1396 = vmax.xlane.f32.xlu1 %v1395_v17 }
 0x1e9   : > { %v1170_v30 = vpop.f32.mrf.mxu2 }
 0x1ea   : > { %v3474_v33 = vadd.f32 %v1170_v30, %v901_v29  ;;  %v1074_v35 = vpop.f32.mrf.mxu0  ;;  %v1123_v36 = vpop.f32.mrf.mxu1 }
 0x1eb   : > { %v3488_v58 = vadd.f32 %v1123_v36, %v903_v37  ;;  %v3494_v49 = vadd.f32 %v1074_v35, %v902_v47  ;;  %v909_v47 = vld [vmem:[%s4360_s2 + $0x140] sm:$0xff] }
 0x1ec   : > { %v1399_v41 = vsel %vm1348_vm4, %v3474_v33, -inf }
 0x1ed   : > { %v1400_v45 = vmax.f32 %v1398_v40, %v1399_v41  ;;  %v1230_v10 = vsel %vm1185_vm2, %v3488_v58, -inf  ;;  %v1403_v29 = vsel %vm1346_vm3, %v3488_v58, -inf  ;;  %v907_v41 = vld [vmem:[%s4360_s2 + $0x130] sm:$0xff] }
 0x1ee   : > { %v1231_v18 = vmax.f32 %v3494_v49, %v1230_v10 }
 0x1ef   : > { %1401 = vmax.xlane.f32.xlu2 %v1400_v45 }
 0x1f0   : > { %1228 = vmax.xlane.f32.xlu1 %v1227_v59 }
 0x1f1   : > { %v1172_v54 = vpop.f32.mrf.mxu2 }
 0x1f2   : > { %v3499_v1 = vadd.f32 %v1172_v54, %v904_v60  ;;  %v1077_v4 = vpop.f32.mrf.mxu0  ;;  %v1126_v7 = vpop.f32.mrf.mxu1  ;;  %v910_v60 = vld [vmem:[%s4360_s2 + $0x148] sm:$0xff] }
 0x1f3   : > { %v3506_v16 = vadd.f32 %v1126_v7, %v906_v0  ;;  %v3513_v35 = vadd.f32 %v1077_v4, %v905_v12  ;;  %v912_v4 = vld [vmem:[%s4360_s2 + $0x158] sm:$0xff] }
 0x1f4   : > { %v1404_v17 = vsel %vm1348_vm4, %v3499_v1, -inf }
 0x1f5   : > { %v1405_v30 = vmax.f32 %v1403_v29, %v1404_v17  ;;  %v1234_v36 = vsel %vm1185_vm2, %v3506_v16, -inf  ;;  %v1408_v12 = vsel %vm1346_vm3, %v3506_v16, -inf }
 0x1f6   : > { %v1235_v45 = vmax.f32 %v3513_v35, %v1234_v36 }
 0x1f7   : > { %1232 = vmax.xlane.f32.xlu2 %v1231_v18  ;;  %v911_v18 = vld [vmem:[%s4360_s2 + $0x150] sm:$0xff] }
 0x1f8   : > { %1406 = vmax.xlane.f32.xlu1 %v1405_v30 }
 0x1f9   : > { %v1175_v37 = vpop.f32.mrf.mxu2 }
 0x1fa   : > { %v1079_v38 = vpop.f32.mrf.mxu0  ;;  %v1128_v40 = vpop.f32.mrf.mxu1  ;;  %v3524_v59 = vadd.f32 %v1175_v37, %v907_v41 }
 0x1fb   : > { %v3529_v54 = vadd.f32 %v1128_v40, %v909_v47 }
 0x1fc   : > { %v1409_v17 = vsel %vm1348_vm4, %v3524_v59, -inf }
 0x1fd   : > { %v1413_v36 = vsel %vm1346_vm3, %v3529_v54, -inf  ;;  %v1410_v41 = vmax.f32 %v1408_v12, %v1409_v17  ;;  %v913_v12 = vld [vmem:[%s4360_s2 + $0x160] sm:$0xff]  ;;  %v915_v17 = vld [vmem:[%s4360_s2 + $0x170] sm:$0xff] }
 0x1ff   : > { %1236 = vmax.xlane.f32.xlu2 %v1235_v45  ;;  %v908_v45 = vld [vmem:[%s4360_s2 + $0x138] sm:$0xff] }
 0x201   : > { %v1177_v0 = vpop.f32.mrf.mxu2 }
 0x202   : > { %v3534_v7 = vadd.f32 %v1177_v0, %v910_v60  ;;  %v1131_v10 = vpop.f32.mrf.mxu1  ;;  %v1082_v29 = vpop.f32.mrf.mxu0  ;;  %v3556_v0 = vadd.f32 %v1079_v38, %v908_v45  ;;  %v914_v45 = vld [vmem:[%s4360_s2 + $0x168] sm:$0xff] }
 0x203   : > { %v3543_v30 = vadd.f32 %v1131_v10, %v912_v4  ;;  %v3552_v47 = vadd.f32 %v1082_v29, %v911_v18  ;;  %v1238_v10 = vsel %vm1185_vm2, %v3529_v54, -inf }
 0x204   : > { %v1414_v37 = vsel %vm1348_vm4, %v3534_v7, -inf }
 0x205   : > { %v1415_v40 = vmax.f32 %v1413_v36, %v1414_v37  ;;  %v1242_v60 = vsel %vm1185_vm2, %v3543_v30, -inf }
 0x206   : > { %v1243_v36 = vmax.f32 %v3552_v47, %v1242_v60 }
 0x207   : > { %1416 = vmax.xlane.f32.xlu1 %v1415_v40  ;;  %1411 = vmax.xlane.f32.xlu2 %v1410_v41  ;;  %v1239_v40 = vmax.f32 %v3556_v0, %v1238_v10  ;;  %v1418_v10 = vsel %vm1346_vm3, %v3543_v30, -inf }
 0x209   : > { %v1180_v4 = vpop.f32.mrf.mxu2 }
 0x20a   : > { %v1133_v18 = vpop.f32.mrf.mxu1  ;;  %v3570_v41 = vadd.f32 %v1180_v4, %v913_v12  ;;  %v1084_v5 = vpop.f32.mrf.mxu0 }
 0x20b   : > { %v1189_v29 = vpop.xlane.xlu2 %1188  ;;  %v3575_v11 = vadd.f32 %v1133_v18, %v915_v17  ;;  %v3577_v60 = vadd.f32 %v1084_v5, %v914_v45  ;;  %v916_v18 = vld [vmem:[%s4360_s2 + $0x178] sm:$0xff] }
 0x20c   : > { %v1250_v37 = vsub.f32 %v3247_v8, %v1189_v29  ;;  %v1251_v38 = vsub.f32 %v3249_v9, %v1189_v29  ;;  %v1419_v4 = vsel %vm1348_vm4, %v3570_v41, -inf }
 0x20d   : > { %v1246_v12 = vsel %vm1185_vm2, %v3575_v11, -inf }
 0x20e   : > { %v1284_v22 = vmul.f32 1.442695, %v1251_v38  ;;  %v1282_v34 = vmul.f32 1.442695, %v1250_v37 }
 0x20f   : > { %1240 = vmax.xlane.f32.xlu2 %v1239_v40  ;;  %1244 = vmax.xlane.f32.xlu1 %v1243_v36  ;;  %v1247_v36 = vmax.f32 %v3577_v60, %v1246_v12  ;;  %v1423_v12 = vsel %vm1346_vm3, %v3575_v11, -inf }
 0x210   : > { %2593 = vpow2.f32 %v1284_v22  ;;  %v1420_v22 = vmax.f32 %v1418_v10, %v1419_v4 }
 0x211   : > { %2595 = vpow2.f32 %v1282_v34  ;;  %v1182_v5 = vpop.f32.mrf.mxu2 }
 0x212   : > { %v1352_v8 = vpop.xlane.xlu1 %1351  ;;  %v3592_v38 = vadd.f32 %v1182_v5, %v916_v18 }
 0x213   : > { %v1429_v17 = vsub.f32 %v3257_v15, %v1352_v8 }
 0x214   : > { %v1424_v10 = vsel %vm1348_vm4, %v3592_v38, -inf }
 0x215   : > { %v1462_v29 = vmul.f32 1.442695, %v1429_v17  ;;  %v1425_v18 = vmax.f32 %v1423_v12, %v1424_v10 }
 0x216   : > { %v3590_v37 = vpop.eup %2593 }
 0x217   : > { %4424 = vst [vmem:[#allocation16_spill] sm:$0xff] %v3590_v37  ;;  %1421 = vmax.xlane.f32.xlu2 %v1420_v22  ;;  %1248 = vmax.xlane.f32.xlu1 %v1247_v36  ;;  %2597 = vpow2.f32 %v1462_v29  ;;  %v3594_v40 = vpop.eup %2595  ;;  %v1524_v34 = vsel %vm1185_vm2, %v3590_v37, 0.0  ;;  %v1428_v22 = vsub.f32 %v3249_v9, %v1352_v8 }
 0x218   : > { %v1525_v4 = vadd.f32 %v3594_v40, %v1524_v34 }
 0x219   : > { %v1460_v50 = vmul.f32 1.442695, %v1428_v22 }
 0x21a   : > { %v3596_v15 = vpop.xlane.xlu2 %1356  ;;  %v1193_v45 = vpop.xlane.xlu1 %1192 }
 0x21b   : > { %4425 = vst [vmem:[#allocation17_spill] sm:$0xff] %v3596_v15  ;;  %v1252_v9 = vsub.f32 %v3274_v26, %v1193_v45 }
 0x21d   : > { %v3605_v17 = vpop.eup %2597 }
 0x21e   : > { %4426 = vst [vmem:[#allocation18_spill] sm:$0xff] %v3605_v17  ;;  %1654 = vrot.lane.b32.xlu0 %v3605_v17, %s2873_s12  ;;  %v1253_v17 = vsub.f32 %v3269_v24, %v1193_v45 }
 0x21f   : > { %1526 = vadd.xlane.f32.xlu2 %v1525_v4  ;;  %1426 = vmax.xlane.f32.xlu1 %v1425_v18 }
 0x220   : > { %v1288_v8 = vmul.f32 1.442695, %v1253_v17 }
 0x222   : > { %v1197_v5 = vpop.xlane.xlu2 %1196 }
 0x223   : > { %v3609_v29 = vpop.xlane.xlu1 %1200  ;;  %v1254_v45 = vsub.f32 %v3299_v43, %v1197_v5 }
 0x22a   : > { %v1362_v36 = vpop.xlane.xlu2 %1361 }
 0x22b   : > { %v1432_v34 = vsub.f32 %v3291_v39, %v1362_v36  ;;  %v1367_v37 = vpop.xlane.xlu1 %1366  ;;  %v1433_v10 = vsub.f32 %v3313_v57, %v1362_v36  ;;  %v1255_v57 = vsub.f32 %v3291_v39, %v1197_v5  ;;  %v1290_v39 = vmul.f32 1.442695, %v1254_v45 }
 0x22d   : > { %v1468_v42 = vmul.f32 1.442695, %v1432_v34  ;;  %v1470_v4 = vmul.f32 1.442695, %v1433_v10  ;;  %v1292_v17 = vmul.f32 1.442695, %v1255_v57 }
 0x22f   : > { %2599 = vpow2.f32 %v1468_v42  ;;  %v1434_v42 = vsub.f32 %v3308_v52, %v1367_v37 }
 0x230   : > { %2601 = vpow2.f32 %v1460_v50  ;;  %v1286_v50 = vmul.f32 1.442695, %v1252_v9 }
 0x231   : > { %2603 = vpow2.f32 %v1470_v4  ;;  %v1472_v22 = vmul.f32 1.442695, %v1434_v42  ;;  %v1435_v4 = vsub.f32 %v3319_v61, %v1367_v37 }
 0x232   : > { %v1205_v12 = vpop.xlane.xlu2 %1204  ;;  %2605 = vpow2.f32 %v1288_v8 }
 0x233   : > { %v3617_v56 = vpop.xlane.xlu1 %1208  ;;  %2607 = vpow2.f32 %v1286_v50  ;;  %v1259_v8 = vsub.f32 %v3335_v6, %v1205_v12  ;;  %v1474_v50 = vmul.f32 1.442695, %v1435_v4  ;;  %v1258_v57 = vsub.f32 %v3343_v13, %v1205_v12 }
 0x234   : > { %2609 = vpow2.f32 %v1472_v22  ;;  %v1257_v12 = vsub.f32 %v3308_v52, %v3609_v29 }
 0x235   : > { %v3615_v18 = vpop.eup %2599  ;;  %2611 = vpow2.f32 %v1292_v17  ;;  %v1300_v61 = vmul.f32 1.442695, %v1259_v8  ;;  %v1298_v17 = vmul.f32 1.442695, %v1258_v57 }
 0x236   : > { %4427 = vst [vmem:[#allocation19_spill] sm:$0xff] %v3615_v18  ;;  %v3622_v34 = vpop.eup %2601  ;;  %2613 = vpow2.f32 %v1290_v39 }
 0x237   : > { %1660 = vrot.lane.b32.xlu2 %v3615_v18, %s2873_s12  ;;  %4428 = vst [vmem:[#allocation20_spill] sm:$0xff] %v3622_v34  ;;  %v3630_v26 = vpop.eup %2603  ;;  %2615 = vpow2.f32 %v1474_v50  ;;  %v1256_v50 = vsub.f32 %v3306_v51, %v3609_v29 }
 0x238   : > { %1652 = vrot.lane.b32.xlu1 %v3622_v34, %s2873_s12  ;;  %4429 = vst [vmem:[#allocation21_spill] sm:$0xff] %v3630_v26  ;;  %v3638_v9 = vpop.eup %2605  ;;  %2617 = vpow2.f32 %v1300_v61  ;;  %v1296_v61 = vmul.f32 1.442695, %v1257_v12 }
 0x239   : > { %4430 = vst [vmem:[#allocation22_spill] sm:$0xff] %v3638_v9  ;;  %v3641_v42 = vpop.eup %2607  ;;  %v1528_v43 = vsel %vm1185_vm2, %v3638_v9, 0.0  ;;  %2619 = vpow2.f32 %v1298_v17  ;;  %v1294_v9 = vmul.f32 1.442695, %v1256_v50 }
 0x23a   : > { %v3628_v36 = vpop.xlane.xlu2 %1371  ;;  %v3645_v5 = vpop.eup %2609  ;;  %v1529_v37 = vadd.f32 %v3641_v42, %v1528_v43  ;;  %2621 = vpow2.f32 %v1296_v61 }
 0x23b   : > { %v3633_v10 = vpop.xlane.xlu1 %1376  ;;  %4431 = vst [vmem:[#allocation23_spill] sm:$0xff] %v3645_v5  ;;  %v3653_v22 = vpop.eup %2611  ;;  %2623 = vpow2.f32 %v1294_v9  ;;  %v1261_v9 = vsub.f32 %v3352_v21, %v3617_v56 }
 0x23c   : > { %4432 = vst [vmem:[#allocation24_spill] sm:$0xff] %v3653_v22  ;;  %v3657_v4 = vpop.eup %2613  ;;  %v1532_v13 = vsel %vm1185_vm2, %v3653_v22, 0.0 }
 0x23d   : > { %v3663_v39 = vpop.eup %2615  ;;  %v1533_v8 = vadd.f32 %v3657_v4, %v1532_v13  ;;  %v1304_v18 = vmul.f32 1.442695, %v1261_v9 }
 0x23e   : > { %4433 = vst [vmem:[#allocation25_spill] sm:$0xff] %v3663_v39  ;;  %v3672_v57 = vpop.eup %2617 }
 0x23f   : > { %1662 = vrot.lane.b32.xlu2 %v3630_v26, %s2873_s12  ;;  %4434 = vst [vmem:[#allocation26_spill] sm:$0xff] %v3672_v57  ;;  %v3676_v52 = vpop.eup %2619  ;;  %v1540_v17 = vsel %vm1185_vm2, %v3672_v57, 0.0  ;;  %v1260_v26 = vsub.f32 %v3350_v20, %v3617_v56 }
 0x240   : > { %v1541_v13 = vadd.f32 %v3676_v52, %v1540_v17  ;;  %v3683_v29 = vpop.eup %2621 }
 0x241   : > { %4435 = vst [vmem:[#allocation27_spill] sm:$0xff] %v3683_v29  ;;  %v3687_v12 = vpop.eup %2623  ;;  %v1536_v50 = vsel %vm1185_vm2, %v3683_v29, 0.0 }
 0x242   : > { %v3648_v34 = vpop.xlane.xlu2 %1212  ;;  %v1537_v61 = vadd.f32 %v3687_v12, %v1536_v50 }
 0x243   : > { %v3655_v45 = vpop.xlane.xlu1 %1216 }
 0x247   : > { %1664 = vrot.lane.b32.xlu2 %v3645_v5, %s2873_s12  ;;  %v1302_v5 = vmul.f32 1.442695, %v1260_v26 }
 0x248   : > { %1530 = vadd.xlane.f32.xlu0 %v1529_v37 }
 0x24a   : > { %v3670_v43 = vpop.xlane.xlu2 %1381 }
 0x24b   : > { %v3674_v37 = vpop.xlane.xlu1 %1386  ;;  %v1441_v22 = vsub.f32 %v3401_v2, %v3670_v43 }
 0x24d   : > { %v1486_v29 = vmul.f32 1.442695, %v1441_v22 }
 0x24f   : > { %1666 = vrot.lane.b32.xlu2 %v3663_v39, %s2873_s12 }
 0x250   : > { %1534 = vadd.xlane.f32.xlu0 %v1533_v8  ;;  %v1439_v8 = vsub.f32 %v3363_v32, %v3633_v10 }
 0x252   : > { %v3681_v51 = vpop.xlane.xlu2 %1391  ;;  %v1482_v17 = vmul.f32 1.442695, %v1439_v8  ;;  %v1436_v8 = vsub.f32 %v3335_v6, %v3628_v36 }
 0x253   : > { %v3685_v39 = vpop.xlane.xlu1 %1224 }
 0x254   : > { %2625 = vpow2.f32 %v1482_v17  ;;  %v1476_v2 = vmul.f32 1.442695, %v1436_v8 }
 0x255   : > { %2627 = vpow2.f32 %v1304_v18 }
 0x256   : > { %2629 = vpow2.f32 %v1302_v5 }
 0x257   : > { %2631 = vpow2.f32 %v1486_v29  ;;  %v1437_v29 = vsub.f32 %v3357_v27, %v3628_v36 }
 0x258   : > { %1542 = vadd.xlane.f32.xlu0 %v1541_v13  ;;  %2633 = vpow2.f32 %v1476_v2 }
 0x259   : > { %v1478_v8 = vmul.f32 1.442695, %v1437_v29 }
 0x25a   : > { %v3704_v57 = vpop.eup %2625 }
 0x25b   : > { %v3700_v32 = vpop.xlane.xlu1 %1396  ;;  %4436 = vst [vmem:[#allocation28_spill] sm:$0xff] %v3704_v57  ;;  %v3711_v20 = vpop.eup %2627 }
 0x25c   : > { %4437 = vst [vmem:[#allocation29_spill] sm:$0xff] %v3711_v20  ;;  %v1544_v5 = vsel %vm1185_vm2, %v3711_v20, 0.0 }
 0x262   : > { %v1402_v13 = vpop.xlane.xlu2 %1401  ;;  %1538 = vadd.xlane.f32.xlu1 %v1537_v61  ;;  %v3717_v61 = vpop.eup %2629 }
 0x263   : > { %v1448_v56 = vsub.f32 %v3467_v25, %v1402_v13  ;;  %v3713_v26 = vpop.xlane.xlu1 %1228  ;;  %v3721_v6 = vpop.eup %2631  ;;  %v1449_v9 = vsub.f32 %v3474_v33, %v1402_v13  ;;  %v1545_v17 = vadd.f32 %v3717_v61, %v1544_v5  ;;  %v1438_v33 = vsub.f32 %v3352_v21, %v3633_v10 }
 0x264   : > { %4438 = vst [vmem:[#allocation30_spill] sm:$0xff] %v3721_v6  ;;  %v3731_v20 = vpop.eup %2633 }
 0x265   : > { %v1500_v18 = vmul.f32 1.442695, %v1448_v56  ;;  %v1502_v56 = vmul.f32 1.442695, %v1449_v9  ;;  %4439 = vst [vmem:[#allocation31_spill] sm:$0xff] %v3731_v20 }
 0x266   : > { %v1480_v5 = vmul.f32 1.442695, %v1438_v33 }
 0x267   : > { %2635 = vpow2.f32 %v1500_v18 }
 0x268   : > { %2637 = vpow2.f32 %v1478_v8 }
 0x269   : > { %2639 = vpow2.f32 %v1502_v56 }
 0x26a   : > { %v3702_v50 = vpop.xlane.xlu2 %1232 }
 0x26b   : > { %v1407_v28 = vpop.xlane.xlu1 %1406 }
 0x26c   : > { %1674 = vrot.lane.b32.xlu0 %v3704_v57, %s2873_s12  ;;  %v1450_v27 = vsub.f32 %v3488_v58, %v1407_v28  ;;  %v1451_v9 = vsub.f32 %v3499_v1, %v1407_v28 }
 0x26d   : > { %v3733_v24 = vpop.eup %2635 }
 0x26e   : > { %4440 = vst [vmem:[#allocation32_spill] sm:$0xff] %v3733_v24  ;;  %v1504_v36 = vmul.f32 1.442695, %v1450_v27  ;;  %v3744_v2 = vpop.eup %2637  ;;  %v1506_v21 = vmul.f32 1.442695, %v1451_v9 }
 0x26f   : > { %4441 = vst [vmem:[#allocation33_spill] sm:$0xff] %v3744_v2  ;;  %v3746_v18 = vpop.eup %2639 }
 0x270   : > { %4442 = vst [vmem:[#allocation34_spill] sm:$0xff] %v3746_v18  ;;  %2641 = vpow2.f32 %v1504_v36  ;;  %v1265_v36 = vsub.f32 %v3396_v63, %v3655_v45 }
 0x271   : > { %2643 = vpow2.f32 %v1480_v5 }
 0x272   : > { %v3715_v22 = vpop.xlane.xlu2 %1236  ;;  %2645 = vpow2.f32 %v1506_v21  ;;  %v1264_v21 = vsub.f32 %v3394_v62, %v3655_v45 }
 0x274   : > { %1678 = vrot.lane.b32.xlu0 %v3721_v6, %s2873_s12  ;;  %v1312_v6 = vmul.f32 1.442695, %v1265_v36 }
 0x278   : > { %1546 = vadd.xlane.f32.xlu2 %v1545_v17  ;;  %v3757_v17 = vpop.eup %2641 }
 0x279   : > { %4443 = vst [vmem:[#allocation35_spill] sm:$0xff] %v3757_v17  ;;  %v3763_v56 = vpop.eup %2643 }
 0x27a   : > { %v3729_v57 = vpop.xlane.xlu2 %1411  ;;  %v3750_v29 = vpop.xlane.xlu1 %1416  ;;  %4444 = vst [vmem:[#allocation36_spill] sm:$0xff] %v3763_v56 }
 0x27b   : > { %1668 = vrot.lane.b32.xlu1 %v3731_v20, %s2873_s12  ;;  %v1454_v8 = vsub.f32 %v3529_v54, %v3750_v29  ;;  %v3769_v33 = vpop.eup %2645 }
 0x27c   : > { %1692 = vrot.lane.b32.xlu0 %v3733_v24, %s2873_s12  ;;  %4445 = vst [vmem:[#allocation37_spill] sm:$0xff] %v3769_v33 }
 0x27d   : > { %v1512_v28 = vmul.f32 1.442695, %v1454_v8  ;;  %v1221_v8 = vpop.xlane.xlu0 %1220 }
 0x27e   : > { %v1266_v24 = vsub.f32 %v3417_v19, %v1221_v8 }
 0x27f   : > { %2647 = vpow2.f32 %v1512_v28  ;;  %v1267_v28 = vsub.f32 %v3419_v23, %v1221_v8 }
 0x280   : > { %2649 = vpow2.f32 %v1312_v6  ;;  %v1314_v15 = vmul.f32 1.442695, %v1266_v24 }
 0x282   : > { %v3742_v13 = vpop.xlane.xlu2 %1240  ;;  %v3765_v27 = vpop.xlane.xlu1 %1244 }
 0x283   : > { %1670 = vrot.lane.b32.xlu1 %v3744_v2, %s2873_s12 }
 0x284   : > { %1694 = vrot.lane.b32.xlu0 %v3746_v18, %s2873_s12  ;;  %v1310_v18 = vmul.f32 1.442695, %v1264_v21  ;;  %v1262_v21 = vsub.f32 %v3387_v55, %v3648_v34 }
 0x285   : > { %v3779_v2 = vpop.eup %2647 }
 0x286   : > { %4446 = vst [vmem:[#allocation38_spill] sm:$0xff] %v3779_v2  ;;  %2651 = vpow2.f32 %v1310_v18  ;;  %v3793_v6 = vpop.eup %2649 }
 0x287   : > { %4447 = vst [vmem:[#allocation39_spill] sm:$0xff] %v3793_v6  ;;  %v1552_v8 = vsel %vm1185_vm2, %v3793_v6, 0.0 }
 0x28a   : > { %v3755_v10 = vpop.xlane.xlu2 %1421  ;;  %v3775_v5 = vpop.xlane.xlu1 %1248 }
 0x28c   : > { %1696 = vrot.lane.b32.xlu0 %v3757_v17, %s2873_s12  ;;  %v3797_v18 = vpop.eup %2651 }
 0x28d   : > { %v1553_v55 = vadd.f32 %v3797_v18, %v1552_v8 }
 0x290   : > { %1672 = vrot.lane.b32.xlu2 %v3763_v56, %s2873_s12  ;;  %v1316_v56 = vmul.f32 1.442695, %v1267_v28  ;;  %v1655_v19 = vpop.permute.xlu0 %1654 }
 0x292   : > { %v1527_v1 = vpop.xlane.xlu2 %1526  ;;  %v3787_v62 = vpop.xlane.xlu1 %1426  ;;  %2653 = vpow2.f32 %v1316_v56 }
 0x294   : > { %1698 = vrot.lane.b32.xlu0 %v3769_v33, %s2873_s12  ;;  %v1263_v33 = vsub.f32 %v3379_v46, %v3648_v34 }
 0x298   : > { %v3806_v24 = vpop.eup %2653 }
 0x299   : > { %4448 = vst [vmem:[#allocation40_spill] sm:$0xff] %v3806_v24 }
 0x29a   : > { %v1661_v9 = vpop.permute.xlu2 %1660 }
 0x29c   : > { %1704 = vrot.lane.b32.xlu0 %v3779_v2, %s2873_s12  ;;  %v1308_v2 = vmul.f32 1.442695, %v1263_v33 }
 0x29e   : > { %2655 = vpow2.f32 %v1308_v2 }
 0x29f   : > { %2657 = vpow2.f32 %v1314_v15  ;;  %v1556_v15 = vsel %vm1185_vm2, %v3806_v24, 0.0 }
 0x2a2   : > { %v1663_v17 = vpop.permute.xlu2 %1662 }
 0x2a3   : > { %v1719_v45 = vsel %vm1716_vm5, %v1661_v9, %v1663_v17  ;;  %v1773_v36 = vsel %vm1185_vm2, %v1663_v17, 0.0  ;;  %v1306_v9 = vmul.f32 1.442695, %v1262_v21 }
 0x2a4   : > { %v3791_v20 = vadd.f32 %v1773_v36, %v1719_v45  ;;  %v1765_v45 = vsel %vm1185_vm2, %v1655_v19, 0.0  ;;  %v3808_v56 = vpop.eup %2655 }
 0x2a5   : > { %2659 = vpow2.f32 %v1306_v9  ;;  %4449 = vst [vmem:[#allocation41_spill] sm:$0xff] %v3808_v56  ;;  %v3810_v33 = vpop.eup %2657  ;;  %v1548_v9 = vsel %vm1185_vm2, %v3808_v56, 0.0 }
 0x2a6   : > { %v1557_v8 = vadd.f32 %v3810_v33, %v1556_v15  ;;  %v1440_v15 = vsub.f32 %v3379_v46, %v3670_v43  ;;  %v1442_v43 = vsub.f32 %v3396_v63, %v3674_v37 }
 0x2aa   : > { %v1665_v17 = vpop.permute.xlu2 %1664  ;;  %v1653_v28 = vpop.permute.xlu1 %1652 }
 0x2ab   : > { %v1717_v36 = vsel %vm1716_vm5, %v1653_v28, %v1655_v19  ;;  %v3816_v28 = vpop.eup %2659 }
 0x2ac   : > { %v3804_v34 = vadd.f32 %v1765_v45, %v1717_v36  ;;  %v1549_v36 = vadd.f32 %v3816_v28, %v1548_v9 }
 0x2ad   : > { %1554 = vadd.xlane.f32.xlu1 %v1553_v55  ;;  %v1588_v55 = vmul.f32 2.0, %v1527_v1 }
 0x2af   : > { %2661 = vrcp.f32 %v1588_v55 }
 0x2b2   : > { %v1667_v2 = vpop.permute.xlu2 %1666 }
 0x2b3   : > { %v1720_v21 = vsel %vm1716_vm5, %v1665_v17, %v1667_v2  ;;  %v1777_v19 = vsel %vm1185_vm2, %v1667_v2, 0.0  ;;  %v1444_v17 = vsub.f32 %v3419_v23, %v3681_v51  ;;  %v1446_v23 = vsub.f32 %v3443_v53, %v3700_v32 }
 0x2b4   : > { %v3821_v45 = vadd.f32 %v1777_v19, %v1720_v21  ;;  %v1484_v19 = vmul.f32 1.442695, %v1440_v15 }
 0x2b5   : > { %1558 = vadd.xlane.f32.xlu1 %v1557_v8  ;;  %v3828_v2 = vpop.eup %2661  ;;  %v1492_v56 = vmul.f32 1.442695, %v1444_v17 }
 0x2b6   : > { %4450 = vst [vmem:[#allocation42_spill] sm:$0xff] %v3828_v2  ;;  %v3834_v1 = vmul.f32 %v3828_v2, %v3594_v40  ;;  %v1488_v40 = vmul.f32 1.442695, %v1442_v43 }
 0x2b9   : > { %1550 = vadd.xlane.f32.xlu2 %v1549_v36 }
 0x2bb   : > { %v1531_v6 = vpop.xlane.xlu0 %1530 }
 0x2bc   : > { %v1589_v24 = vmul.f32 2.0, %v1531_v6 }
 0x2be   : > { %2663 = vrcp.f32 %v1589_v24  ;;  %v1496_v24 = vmul.f32 1.442695, %v1446_v23 }
 0x2bf   : > { %2665 = vpow2.f32 %v1492_v56  ;;  %v1443_v56 = vsub.f32 %v3413_v14, %v3674_v37  ;;  %v1445_v14 = vsub.f32 %v3439_v44, %v3681_v51 }
 0x2c0   : > { %2667 = vpow2.f32 %v1484_v19 }
 0x2c1   : > { %2669 = vpow2.f32 %v1496_v24  ;;  %v1490_v55 = vmul.f32 1.442695, %v1443_v56  ;;  %v1494_v43 = vmul.f32 1.442695, %v1445_v14  ;;  %v1272_v14 = vsub.f32 %v3494_v49, %v3702_v50 }
 0x2c2   : > { %2671 = vpow2.f32 %v1488_v40 }
 0x2c3   : > { %v1535_v8 = vpop.xlane.xlu0 %1534  ;;  %v1326_v2 = vmul.f32 1.442695, %v1272_v14 }
 0x2c4   : > { %v3830_v21 = vpop.eup %2663  ;;  %v1590_v36 = vmul.f32 2.0, %v1535_v8 }
 0x2c5   : > { %4451 = vst [vmem:[#allocation43_spill] sm:$0xff] %v3830_v21  ;;  %v3838_v6 = vmul.f32 %v3830_v21, %v3641_v42  ;;  %v3846_v9 = vpop.eup %2665 }
 0x2c6   : > { %v3850_v42 = vpop.eup %2667  ;;  %2673 = vrcp.f32 %v1590_v36 }
 0x2c7   : > { %v3856_v63 = vpop.eup %2669 }
 0x2c8   : > { %v3860_v23 = vpop.eup %2671 }
 0x2cb   : > { %v1543_v15 = vpop.xlane.xlu0 %1542 }
 0x2cc   : > { %v3866_v37 = vpop.eup %2673 }
 0x2cd   : > { %4452 = vst [vmem:[#allocation44_spill] sm:$0xff] %v3866_v37  ;;  %v3874_v56 = vmul.f32 %v3866_v37, %v3657_v4  ;;  %v1273_v4 = vsub.f32 %v3488_v58, %v3702_v50 }
 0x2ce   : > { %1684 = vrot.lane.b32.xlu1 %v3846_v9, %s2873_s12 }
 0x2cf   : > { %v1328_v46 = vmul.f32 1.442695, %v1273_v4 }
 0x2d1   : > { %1676 = vrot.lane.b32.xlu2 %v3850_v42, %s2873_s12 }
 0x2d5   : > { %v1539_v17 = vpop.xlane.xlu1 %1538 }
 0x2d6   : > { %v1591_v19 = vmul.f32 2.0, %v1539_v17  ;;  %1688 = vrot.lane.b32.xlu1 %v3856_v63, %s2873_s12  ;;  %v1592_v17 = vmul.f32 2.0, %v1543_v15 }
 0x2d8   : > { %2675 = vrcp.f32 %v1591_v19 }
 0x2d9   : > { %1680 = vrot.lane.b32.xlu2 %v3860_v23, %s2873_s12  ;;  %2677 = vpow2.f32 %v1490_v55 }
 0x2da   : > { %2679 = vpow2.f32 %v1494_v43 }
 0x2db   : > { %2681 = vrcp.f32 %v1592_v17 }
 0x2de   : > { %v3868_v24 = vpop.eup %2675  ;;  %v1675_v8 = vpop.permute.xlu0 %1674 }
 0x2df   : > { %4453 = vst [vmem:[#allocation45_spill] sm:$0xff] %v3868_v24  ;;  %v3870_v40 = vpop.eup %2677  ;;  %v3878_v36 = vmul.f32 %v3868_v24, %v3687_v12  ;;  %v1785_v24 = vsel %vm1185_vm2, %v1675_v8, 0.0 }
 0x2e0   : > { %4454 = vst [vmem:[#allocation46_spill] sm:$0xff] %v3870_v40  ;;  %v3886_v55 = vpop.eup %2679 }
 0x2e1   : > { %1682 = vrot.lane.b32.xlu2 %v3870_v40, %s2873_s12  ;;  %4455 = vst [vmem:[#allocation47_spill] sm:$0xff] %v3886_v55  ;;  %v3894_v21 = vpop.eup %2681 }
 0x2e2   : > { %v3902_v17 = vmul.f32 %v3894_v21, %v3676_v52 }
 0x2e6   : > { %v3884_v51 = vpop.permute.xlu0 %1678 }
 0x2e9   : > { %1686 = vrot.lane.b32.xlu2 %v3886_v55, %s2873_s12 }
 0x2eb   : > { %v1547_v12 = vpop.xlane.xlu2 %1546 }
 0x2ec   : > { %v1593_v19 = vmul.f32 2.0, %v1547_v12 }
 0x2ed   : > { %v1669_v43 = vpop.permute.xlu1 %1668 }
 0x2ee   : > { %2683 = vrcp.f32 %v1593_v19  ;;  %v1693_v44 = vpop.permute.xlu0 %1692 }
 0x2ef   : > { %2685 = vpow2.f32 %v1328_v46 }
 0x2f0   : > { %2687 = vpow2.f32 %v1326_v2 }
 0x2f3   : > { %v1673_v15 = vpop.permute.xlu2 %1672 }
 0x2f4   : > { %v3896_v40 = vpop.eup %2683  ;;  %v1722_v58 = vsel %vm1716_vm5, %v1673_v15, %v1675_v8 }
 0x2f5   : > { %4456 = vst [vmem:[#allocation48_spill] sm:$0xff] %v3896_v40  ;;  %v3906_v49 = vmul.f32 %v3896_v40, %v3717_v61  ;;  %v3908_v50 = vadd.f32 %v1785_v24, %v1722_v58  ;;  %v1671_v4 = vpop.permute.xlu1 %1670  ;;  %v3918_v61 = vpop.eup %2685 }
 0x2f6   : > { %v1721_v46 = vsel %vm1716_vm5, %v1669_v43, %v1671_v4  ;;  %v1781_v12 = vsel %vm1185_vm2, %v1671_v4, 0.0  ;;  %v1695_v19 = vpop.permute.xlu0 %1694  ;;  %4457 = vst [vmem:[#allocation49_spill] sm:$0xff] %v3918_v61  ;;  %v3922_v2 = vpop.eup %2687  ;;  %v1269_v43 = vsub.f32 %v3443_v53, %v3685_v39  ;;  %v1568_v58 = vsel %vm1185_vm2, %v3918_v61, 0.0 }
 0x2f7   : > { %v1727_v14 = vsel %vm1716_vm5, %v1693_v44, %v1695_v19  ;;  %v1805_v52 = vsel %vm1185_vm2, %v1695_v19, 0.0  ;;  %v3916_v15 = vadd.f32 %v1781_v12, %v1721_v46  ;;  %v1268_v4 = vsub.f32 %v3441_v48, %v3685_v39 }
 0x2f8   : > { %v3920_v24 = vadd.f32 %v1805_v52, %v1727_v14  ;;  %v1569_v19 = vadd.f32 %v3922_v2, %v1568_v58  ;;  %v1320_v46 = vmul.f32 1.442695, %v1269_v43  ;;  %v1452_v48 = vsub.f32 %v3506_v16, %v3729_v57 }
 0x2f9   : > { %v1318_v12 = vmul.f32 1.442695, %v1268_v4 }
 0x2fa   : > { %2689 = vpow2.f32 %v1320_v46  ;;  %v1508_v58 = vmul.f32 1.442695, %v1452_v48 }
 0x2fb   : > { %2691 = vpow2.f32 %v1318_v12 }
 0x2fc   : > { %2693 = vpow2.f32 %v1508_v58  ;;  %v1276_v58 = vsub.f32 %v3556_v0, %v3742_v13 }
 0x2fe   : > { %v1697_v44 = vpop.permute.xlu0 %1696 }
 0x300   : > { %1570 = vadd.xlane.f32.xlu1 %v1569_v19  ;;  %v3935_v37 = vpop.eup %2689 }
 0x301   : > { %v3939_v39 = vpop.eup %2691  ;;  %v1560_v43 = vsel %vm1185_vm2, %v3935_v37, 0.0 }
 0x302   : > { %v1561_v4 = vadd.f32 %v3939_v39, %v1560_v43  ;;  %v1277_v43 = vsub.f32 %v3529_v54, %v3742_v13 }
 0x306   : > { %v1699_v14 = vpop.permute.xlu0 %1698 }
 0x307   : > { %v1728_v52 = vsel %vm1716_vm5, %v1697_v44, %v1699_v14  ;;  %v1809_v8 = vsel %vm1185_vm2, %v1699_v14, 0.0  ;;  %v3944_v44 = vpop.eup %2693 }
 0x308   : > { %v3933_v53 = vadd.f32 %v1809_v8, %v1728_v52  ;;  %v1447_v8 = vsub.f32 %v3455_v3, %v3700_v32  ;;  %v1336_v3 = vmul.f32 1.442695, %v1277_v43 }
 0x30a   : > { %v1498_v19 = vmul.f32 1.442695, %v1447_v8 }
 0x30c   : > { %2695 = vpow2.f32 %v1498_v19  ;;  %v1334_v19 = vmul.f32 1.442695, %v1276_v58 }
 0x30e   : > { %v1705_v40 = vpop.permute.xlu0 %1704 }
 0x312   : > { %1562 = vadd.xlane.f32.xlu2 %v1561_v4  ;;  %v3950_v12 = vpop.eup %2695 }
 0x313   : > { %4458 = vst [vmem:[#allocation50_spill] sm:$0xff] %v3950_v12 }
 0x319   : > { %1700 = vrot.lane.b32.xlu1 %v3944_v44, %s2873_s12 }
 0x320   : > { %v1555_v46 = vpop.xlane.xlu1 %1554 }
 0x321   : > { %v1595_v14 = vmul.f32 2.0, %v1555_v46  ;;  %v1789_v46 = vsel %vm1185_vm2, %v3884_v51, 0.0 }
 0x323   : > { %2697 = vrcp.f32 %v1595_v14 }
 0x329   : > { %v3958_v32 = vpop.eup %2697 }
 0x32a   : > { %1690 = vrot.lane.b32.xlu2 %v3950_v12, %s2873_s12  ;;  %v3974_v0 = vmul.f32 %v3958_v32, %v3797_v18 }
 0x32c   : > { %v1551_v52 = vpop.xlane.xlu2 %1550 }
 0x32d   : > { %v1594_v48 = vmul.f32 2.0, %v1551_v52 }
 0x32f   : > { %2699 = vrcp.f32 %v1594_v48 }
 0x330   : > { %2701 = vpow2.f32 %v1336_v3  ;;  %v1270_v3 = vsub.f32 %v3472_v31, %v3713_v26  ;;  %v1274_v31 = vsub.f32 %v3513_v35, %v3715_v22 }
 0x331   : > { %2703 = vpow2.f32 %v1334_v19 }
 0x334   : > { %v1677_v4 = vpop.permute.xlu2 %1676 }
 0x335   : > { %v3960_v8 = vpop.eup %2699  ;;  %v1723_v14 = vsel %vm1716_vm5, %v1677_v4, %v3884_v51  ;;  %v1271_v51 = vsub.f32 %v3467_v25, %v3713_v26 }
 0x336   : > { %v3966_v52 = vadd.f32 %v1789_v46, %v1723_v14  ;;  %v3970_v54 = vmul.f32 %v3960_v8, %v3816_v28  ;;  %v3978_v48 = vpop.eup %2701  ;;  %v1322_v46 = vmul.f32 1.442695, %v1270_v3  ;;  %v1275_v14 = vsub.f32 %v3506_v16, %v3715_v22 }
 0x337   : > { %v3982_v58 = vpop.eup %2703  ;;  %v1576_v28 = vsel %vm1185_vm2, %v3978_v48, 0.0  ;;  %v1324_v18 = vmul.f32 1.442695, %v1271_v51  ;;  %v1455_v16 = vsub.f32 %v3534_v7, %v3750_v29  ;;  %v1457_v22 = vsub.f32 %v3570_v41, %v3755_v10 }
 0x338   : > { %v1577_v4 = vadd.f32 %v3982_v58, %v1576_v28  ;;  %v1332_v26 = vmul.f32 1.442695, %v1275_v14  ;;  %v1330_v28 = vmul.f32 1.442695, %v1274_v31 }
 0x339   : > { %2705 = vpow2.f32 %v1324_v18  ;;  %v1514_v18 = vmul.f32 1.442695, %v1455_v16  ;;  %v1518_v29 = vmul.f32 1.442695, %v1457_v22  ;;  %v1279_v22 = vsub.f32 %v3543_v30, %v3765_v27 }
 0x33a   : > { %2707 = vpow2.f32 %v1322_v46 }
 0x33b   : > { %2709 = vpow2.f32 %v1332_v26  ;;  %v1281_v26 = vsub.f32 %v3575_v11, %v3775_v5 }
 0x33c   : > { %v1681_v43 = vpop.permute.xlu2 %1680  ;;  %2711 = vpow2.f32 %v1330_v28  ;;  %v1280_v28 = vsub.f32 %v3577_v60, %v3775_v5  ;;  %v1278_v60 = vsub.f32 %v3552_v47, %v3765_v27 }
 0x33d   : > { %2713 = vpow2.f32 %v1514_v18  ;;  %v1344_v16 = vmul.f32 1.442695, %v1281_v26 }
 0x33e   : > { %2715 = vpow2.f32 %v1518_v29  ;;  %v1340_v29 = vmul.f32 1.442695, %v1279_v22  ;;  %v1338_v26 = vmul.f32 1.442695, %v1278_v60 }
 0x33f   : > { %v3997_v51 = vpop.eup %2705 }
 0x340   : > { %4459 = vst [vmem:[#allocation51_spill] sm:$0xff] %v3997_v51  ;;  %v3999_v3 = vpop.eup %2707 }
 0x343   : > { %1578 = vadd.xlane.f32.xlu1 %v1577_v4  ;;  %v4006_v4 = vpop.eup %2709 }
 0x344   : > { %v1683_v19 = vpop.permute.xlu2 %1682  ;;  %v4008_v35 = vpop.eup %2711  ;;  %v1572_v46 = vsel %vm1185_vm2, %v4006_v4, 0.0 }
 0x345   : > { %v1724_v25 = vsel %vm1716_vm5, %v1681_v43, %v1683_v19  ;;  %v1793_v13 = vsel %vm1185_vm2, %v1683_v19, 0.0  ;;  %v1564_v43 = vsel %vm1185_vm2, %v3997_v51, 0.0  ;;  %v1573_v7 = vadd.f32 %v4008_v35, %v1572_v46  ;;  %v4015_v19 = vpop.eup %2713 }
 0x346   : > { %v3993_v55 = vadd.f32 %v1793_v13, %v1724_v25  ;;  %v1565_v13 = vadd.f32 %v3999_v3, %v1564_v43  ;;  %v4019_v14 = vpop.eup %2715  ;;  %v1453_v25 = vsub.f32 %v3524_v59, %v3729_v57  ;;  %v1559_v59 = vpop.xlane.xlu1 %1558  ;;  %v1342_v57 = vmul.f32 1.442695, %v1280_v28 }
 0x348   : > { %v1510_v41 = vmul.f32 1.442695, %v1453_v25 }
 0x34a   : > { %2717 = vpow2.f32 %v1510_v41 }
 0x34b   : > { %2719 = vpow2.f32 %v1344_v16 }
 0x34c   : > { %v4033_v43 = vpop.permute.xlu2 %1686  ;;  %2721 = vpow2.f32 %v1342_v57 }
 0x34e   : > { %v1685_v60 = vpop.permute.xlu1 %1684 }
 0x350   : > { %v4025_v31 = vpop.eup %2717 }
 0x353   : > { %1566 = vadd.xlane.f32.xlu2 %v1565_v13  ;;  %v1596_v13 = vmul.f32 2.0, %v1559_v59 }
 0x355   : > { %2723 = vrcp.f32 %v1596_v13 }
 0x35b   : > { %1574 = vadd.xlane.f32.xlu2 %v1573_v7  ;;  %v4037_v7 = vpop.eup %2719 }
 0x35c   : > { %1706 = vrot.lane.b32.xlu1 %v4015_v19, %s2873_s12  ;;  %v4041_v5 = vpop.eup %2721  ;;  %v1584_v25 = vsel %vm1185_vm2, %v4037_v7, 0.0 }
 0x35d   : > { %v4045_v41 = vpop.eup %2723  ;;  %v1585_v28 = vadd.f32 %v4041_v5, %v1584_v25 }
 0x35e   : > { %v4052_v59 = vmul.f32 %v4045_v41, %v3810_v33  ;;  %v1456_v33 = vsub.f32 %v3543_v30, %v3755_v10 }
 0x364   : > { %1710 = vrot.lane.b32.xlu1 %v4019_v14, %s2873_s12 }
 0x373   : > { %1702 = vrot.lane.b32.xlu2 %v4025_v31, %s2873_s12 }
 0x385   : > { %v1563_v18 = vpop.xlane.xlu2 %1562 }
 0x386   : > { %v1597_v46 = vmul.f32 2.0, %v1563_v18 }
 0x388   : > { %2725 = vrcp.f32 %v1597_v46  ;;  %v1516_v46 = vmul.f32 1.442695, %v1456_v33 }
 0x389   : > { %2727 = vpow2.f32 %v1340_v29 }
 0x38a   : > { %2729 = vpow2.f32 %v1338_v26  ;;  %v1459_v26 = vsub.f32 %v3592_v38, %v3787_v62 }
 0x38b   : > { %2731 = vpow2.f32 %v1516_v46 }
 0x38e   : > { %v4048_v16 = vpop.eup %2725  ;;  %1586 = vadd.xlane.f32.xlu1 %v1585_v28  ;;  %v1689_v28 = vpop.permute.xlu1 %1688 }
 0x38f   : > { %v4056_v47 = vmul.f32 %v4048_v16, %v3939_v39  ;;  %v4060_v57 = vpop.eup %2727  ;;  %v1458_v39 = vsub.f32 %v3575_v11, %v3787_v62  ;;  %v1691_v11 = vpop.permute.xlu2 %1690 }
 0x390   : > { %v4062_v13 = vpop.eup %2729  ;;  %v1580_v18 = vsel %vm1185_vm2, %v4060_v57, 0.0 }
 0x391   : > { %v1581_v22 = vadd.f32 %v4062_v13, %v1580_v18  ;;  %v1520_v29 = vmul.f32 1.442695, %v1458_v39  ;;  %v4071_v25 = vpop.eup %2731  ;;  %v1522_v18 = vmul.f32 1.442695, %v1459_v26 }
 0x393   : > { %2733 = vpow2.f32 %v1520_v29 }
 0x394   : > { %2735 = vpow2.f32 %v1522_v18 }
 0x396   : > { %v1571_v30 = vpop.xlane.xlu1 %1570 }
 0x397   : > { %v1599_v33 = vmul.f32 2.0, %v1571_v30 }
 0x399   : > { %2737 = vrcp.f32 %v1599_v33 }
 0x39c   : > { %1582 = vadd.xlane.f32.xlu2 %v1581_v22  ;;  %v4077_v22 = vpop.eup %2733 }
 0x39d   : > { %v4081_v10 = vpop.eup %2735 }
 0x39e   : > { %v1701_v27 = vpop.permute.xlu1 %1700 }
 0x39f   : > { %v4085_v62 = vpop.eup %2737 }
 0x3a0   : > { %v4095_v18 = vmul.f32 %v4085_v62, %v3922_v2 }
 0x3b4   : > { %1708 = vrot.lane.b32.xlu2 %v4071_v25, %s2873_s12 }
 0x3b6   : > { %v1579_v51 = vpop.xlane.xlu1 %1578 }
 0x3bc   : > { %1712 = vrot.lane.b32.xlu2 %v4077_v22, %s2873_s12 }
 0x3c4   : > { %1714 = vrot.lane.b32.xlu2 %v4081_v10, %s2873_s12 }
 0x3c6   : > { %v1567_v46 = vpop.xlane.xlu2 %1566 }
 0x3c7   : > { %v1598_v38 = vmul.f32 2.0, %v1567_v46 }
 0x3c9   : > { %2739 = vrcp.f32 %v1598_v38 }
 0x3ce   : > { %v1575_v39 = vpop.xlane.xlu2 %1574  ;;  %v1707_v61 = vpop.permute.xlu1 %1706 }
 0x3cf   : > { %v4087_v29 = vpop.eup %2739 }
 0x3d0   : > { %4460 = vst [vmem:[#allocation52_spill] sm:$0xff] %v4087_v29  ;;  %v4091_v26 = vmul.f32 %v4087_v29, %v3999_v3  ;;  %v1730_v3 = vsel %vm1716_vm5, %v1705_v40, %v1707_v61  ;;  %v1817_v29 = vsel %vm1185_vm2, %v1707_v61, 0.0 }
 0x3d1   : > { %v1818_v2 = vadd.f32 %v1817_v29, %v1730_v3  ;;  %v1600_v3 = vmul.f32 2.0, %v1575_v39 }
 0x3d2   : > { %v1956_v30 = vpack.c.bf16 %v4095_v18, %v4091_v26  ;;  %v1725_v26 = vsel %vm1716_vm5, %v1685_v60, %v4033_v43  ;;  %v1797_v18 = vsel %vm1185_vm2, %v4033_v43, 0.0  ;;  %v1601_v43 = vmul.f32 2.0, %v1579_v51 }
 0x3d6   : > { %v1703_v33 = vpop.permute.xlu2 %1702 }
 0x3d7   : > { %v1729_v46 = vsel %vm1716_vm5, %v1701_v27, %v1703_v33  ;;  %v1813_v38 = vsel %vm1185_vm2, %v1703_v33, 0.0  ;;  %v1798_v27 = vadd.f32 %v1797_v18, %v1725_v26  ;;  %v1726_v33 = vsel %vm1716_vm5, %v1689_v28, %v1691_v11 }
 0x3d8   : > { %v1814_v12 = vadd.f32 %v1813_v38, %v1729_v46  ;;  %v1711_v38 = vpop.permute.xlu1 %1710 }
 0x3da   : > { %1815 = vadd.xlane.f32.xlu1 %v1814_v12  ;;  %v1801_v12 = vsel %vm1185_vm2, %v1691_v11, 0.0 }
 0x3db   : > { %v1802_v46 = vadd.f32 %v1801_v12, %v1726_v33 }
 0x3ed   : > { %1819 = vadd.xlane.f32.xlu2 %v1818_v2 }
 0x3f5   : > { %1799 = vadd.xlane.f32.xlu2 %v1798_v27 }
 0x3fd   : > { %1803 = vadd.xlane.f32.xlu2 %v1802_v46 }
 0x401   : > { %v1587_v40 = vpop.xlane.xlu1 %1586 }
 0x402   : > { %v1603_v61 = vmul.f32 2.0, %v1587_v40  ;;  %v4461_v40 = vld [vmem:[#allocation17_spill] sm:$0xff] }
 0x404   : > { %2741 = vrcp.f32 %v1603_v61  ;;  %v4462_v61 = vld [vmem:[#allocation14_spill] sm:$0xff] }
 0x405   : > { %1791 = vadd.xlane.f32.xlu2 %v3966_v52  ;;  %v1821_v52 = vsel %vm1185_vm2, %v1711_v38, 0.0 }
 0x40a   : > { %v4112_v28 = vpop.eup %2741 }
 0x40b   : > { %v1891_v51 = vmul.f32 %v4112_v28, %v4041_v5 }
 0x40d   : > { %1795 = vadd.xlane.f32.xlu2 %v3993_v55 }
 0x40f   : > { %v1583_v29 = vpop.xlane.xlu2 %1582 }
 0x410   : > { %v1602_v60 = vmul.f32 2.0, %v1583_v29  ;;  %v1430_v29 = vsub.f32 %v4462_v61, %v4461_v40 }
 0x412   : > { %2743 = vrcp.f32 %v1602_v60 }
 0x413   : > { %2745 = vrcp.f32 %v1600_v3  ;;  %v1464_v3 = vmul.f32 1.442695, %v1430_v29 }
 0x414   : > { %2747 = vrcp.f32 %v1601_v43 }
 0x415   : > { %1783 = vadd.xlane.f32.xlu2 %v3916_v15  ;;  %2749 = vpow2.f32 %v1464_v3 }
 0x417   : > { %v1709_v11 = vpop.permute.xlu2 %1708 }
 0x418   : > { %v4114_v2 = vpop.eup %2743  ;;  %v1731_v26 = vsel %vm1716_vm5, %v1709_v11, %v1711_v38 }
 0x419   : > { %v1822_v55 = vadd.f32 %v1821_v52, %v1731_v26  ;;  %v1889_v18 = vmul.f32 %v4114_v2, %v4062_v13  ;;  %v2746_v39 = vpop.eup %2745  ;;  %v4464_v52 = vpack.c.bf16 %v4056_v47, %v4052_v59  ;;  %v4465_v26 = vpack.c.bf16 %v3974_v0, %v3970_v54  ;;  %v4470_v54 = vld [vmem:[#allocation12_spill] sm:$0xff] }
 0x41a   : > { %v2748_v27 = vpop.eup %2747  ;;  %v1885_v12 = vmul.f32 %v2746_v39, %v4008_v35  ;;  %v4468_v59 = vpack.c.bf16 %v3878_v36, %v3874_v56  ;;  %v4469_v47 = vpack.c.bf16 %v3838_v6, %v3834_v1  ;;  %v4471_v56 = vld [vmem:[#allocation11_spill] sm:$0xff] }
 0x41b   : > { %1823 = vadd.xlane.f32.xlu1 %v1822_v55  ;;  %v1962_v15 = vpack.c.bf16 %v1891_v51, %v1889_v18  ;;  %v1887_v46 = vmul.f32 %v2748_v27, %v3982_v58  ;;  %v4131_v11 = vpop.eup %2749  ;;  %v4467_v18 = vld [vmem:[#allocation13_spill] sm:$0xff] }
 0x41d   : > { %2043 = vmatpush.bf16.xpose.msra.mxu3 %v1962_v15  ;;  %1779 = vadd.xlane.f32.xlu2 %v3821_v45  ;;  %v1959_v38 = vpack.c.bf16 %v1887_v46, %v1885_v12  ;;  %v4463_v45 = vld [vmem:[#allocation15_spill] sm:$0xff]  ;;  %v4472_v12 = vld [vmem:[#allocation38_spill] sm:$0xff] }
 0x41e   : > { %v1431_v35 = vsub.f32 %v4463_v45, %v4461_v40 }
 0x41f   : > { %v1713_v33 = vpop.permute.xlu2 %1712 }
 0x420   : > { %v1466_v58 = vmul.f32 1.442695, %v1431_v35 }
 0x422   : > { %2751 = vpow2.f32 %v1466_v58  ;;  %v4476_v58 = vld [vmem:[#allocation39_spill] sm:$0xff] }
 0x425   : > { %2044 = vmatpush.bf16.xpose.msra.mxu3 %v1959_v38 }
 0x427   : > { %v1715_v13 = vpop.permute.xlu2 %1714 }
 0x428   : > { %v1732_v5 = vsel %vm1716_vm5, %v1713_v33, %v1715_v13  ;;  %v1825_v60 = vsel %vm1185_vm2, %v1715_v13, 0.0  ;;  %v4141_v55 = vpop.eup %2751  ;;  %v1886_v33 = vmul.f32 %v2746_v39, %v4006_v4  ;;  %v4473_v39 = vld [vmem:[#allocation10_spill] sm:$0xff]  ;;  %v4474_v13 = vld [vmem:[#allocation40_spill] sm:$0xff] }
 0x429   : > { %v1826_v43 = vadd.f32 %v1825_v60, %v1732_v5  ;;  %v1880_v5 = vmul.f32 %v4048_v16, %v3935_v37  ;;  %v4475_v37 = vld [vmem:[#allocation9_spill] sm:$0xff] }
 0x42b   : > { %1827 = vadd.xlane.f32.xlu0 %v1826_v43 }
 0x42d   : > { %2045 = vmatpush.bf16.xpose.msra.mxu3 %v1956_v30  ;;  %v4466_v30 = vpack.c.bf16 %v3906_v49, %v3902_v17 }
 0x434   : > { %1656 = vrot.lane.b32.xlu1 %v4131_v11, %s2873_s12 }
 0x435   : > { %2046 = vmatpush.bf16.xpose.msra.mxu3 %v4464_v52  ;;  %v1876_v52 = vmul.f32 %v3958_v32, %v4476_v58  ;;  %v4482_v58 = vld [vmem:[#allocation29_spill] sm:$0xff] }
 0x43d   : > { %2047 = vmatpush.bf16.xpose.msra.mxu3 %v4465_v26  ;;  %v4477_v26 = vld [vmem:[#allocation41_spill] sm:$0xff] }
 0x43f   : > { %1658 = vrot.lane.b32.xlu0 %v4141_v55, %s2873_s12 }
 0x445   : > { %2048 = vmatpush.bf16.xpose.msra.mxu3 %v4466_v30  ;;  %v1874_v30 = vmul.f32 %v3960_v8, %v4477_v26 }
 0x446   : > { %1997 = vxpose.xlu2.c.b16.start [1/7] (short) (narrow) %v4467_v18, 32 }
 0x44d   : > { %2049 = vmatpush.bf16.xpose.msra.mxu3 %v4468_v59  ;;  %v1816_v0 = vpop.xlane.xlu1 %1815 }
 0x44e   : > { %v1841_v51 = vmul.f32 2.0, %v1816_v0  ;;  %v4478_v0 = vld [vmem:[#allocation8_spill] sm:$0xff] }
 0x450   : > { %2753 = vrcp.f32 %v1841_v51 }
 0x455   : > { %2050 = vmatpush.bf16.xpose.msra.mxu3 %v4469_v47 }
 0x456   : > { %1998 = vxpose.xlu2.c.b16.cont [2/7] (short) (narrow) %v4470_v54, 32  ;;  %v4157_v15 = vpop.eup %2753 }
 0x457   : > { %v1917_v1 = vmul.f32 %v4157_v15, %v3944_v44 }
 0x45c   : > { %2482 = vmatmul.lmr.bf16.vlgmr.msra.gmra.4.mxu3 }
 0x45e   : > { %1807 = vadd.xlane.f32.xlu1 %v3920_v24  ;;  %v1888_v24 = vmul.f32 %v2748_v27, %v3978_v48 }
 0x460   : > { %v1820_v17 = vpop.xlane.xlu2 %1819 }
 0x461   : > { %v1842_v49 = vmul.f32 2.0, %v1820_v17 }
 0x463   : > { %2755 = vrcp.f32 %v1842_v49  ;;  %v4479_v49 = vld [vmem:[#allocation7_spill] sm:$0xff] }
 0x464   : > { %2483 = vmatmul.lmr.bf16.gmra.4.mxu3 }
 0x466   : > { %1787 = vadd.xlane.f32.xlu1 %v3908_v50  ;;  %1999 = vxpose.xlu2.c.b16.cont [3/7] (short) (narrow) %v4471_v56, 32  ;;  %v4171_v50 = vsel %vm1185_vm2, %v1886_v33, %v1917_v1  ;;  %v1892_v1 = vmul.f32 %v4112_v28, %v4037_v7 }
 0x468   : > { %v1800_v6 = vpop.xlane.xlu2 %1799 }
 0x469   : > { %v4163_v36 = vpop.eup %2755  ;;  %1811 = vadd.xlane.f32.xlu0 %v3933_v53  ;;  %v1837_v38 = vmul.f32 2.0, %v1800_v6  ;;  %v1890_v6 = vmul.f32 %v4114_v2, %v4060_v57 }
 0x46a   : > { %v1919_v46 = vmul.f32 %v4163_v36, %v4472_v12  ;;  %v1920_v7 = vmul.f32 %v4163_v36, %v4015_v19 }
 0x46b   : > { %2757 = vrcp.f32 %v1837_v38 }
 0x46c   : > { %v4174_v40 = vsel %vm1185_vm2, %v1888_v24, %v1919_v46  ;;  %2484 = vmatmul.lmr.bf16.gmra.4.mxu3 }
 0x46d   : > { %v1960_v44 = vpack.c.bf16 %v4174_v40, %v4171_v50  ;;  %v4480_v40 = vld [vmem:[#allocation31_spill] sm:$0xff] }
 0x46e   : > { %1767 = vadd.xlane.f32.xlu1 %v3804_v34  ;;  %v1878_v34 = vmul.f32 %v4045_v41, %v4474_v13 }
 0x470   : > { %v1804_v53 = vpop.xlane.xlu2 %1803 }
 0x471   : > { %v1838_v48 = vmul.f32 2.0, %v1804_v53  ;;  %1775 = vadd.xlane.f32.xlu0 %v3791_v20  ;;  %v4180_v4 = vpop.eup %2757 }
 0x472   : > { %v1909_v27 = vmul.f32 %v4180_v4, %v3846_v9 }
 0x473   : > { %2759 = vrcp.f32 %v1838_v48 }
 0x474   : > { %2485 = vmatmul.lmr.bf16.gmra.4.mxu3  ;;  %v4194_v3 = vsel %vm1185_vm2, %v1878_v34, %v1909_v27 }
 0x476   : > { %2000 = vxpose.xlu2.c.b16.cont [4/7] (short) (narrow) %v4473_v39, 32 }
 0x478   : > { %v1792_v61 = vpop.xlane.xlu2 %1791 }
 0x479   : > { %v4185_v29 = vpop.eup %2759  ;;  %v1835_v60 = vmul.f32 2.0, %v1792_v61 }
 0x47a   : > { %v1911_v20 = vmul.f32 %v4185_v29, %v3856_v63 }
 0x47b   : > { %2494 = vllmr.4.mxu3  ;;  %2761 = vrcp.f32 %v1835_v60 }
 0x47c   : > { %v4197_v43 = vsel %vm1185_vm2, %v1880_v5, %v1911_v20 }
 0x47d   : > { %v1954_v9 = vpack.c.bf16 %v4197_v43, %v4194_v3  ;;  %v4504_v43 = vld [vmem:[#allocation21_spill] sm:$0xff] }
 0x480   : > { %v1796_v45 = vpop.xlane.xlu2 %1795 }
 0x481   : > { %v1836_v41 = vmul.f32 2.0, %v1796_v45  ;;  %v4201_v35 = vpop.eup %2761 }
 0x482   : > { %v1905_v63 = vmul.f32 %v4201_v35, %v3850_v42 }
 0x483   : > { %2763 = vrcp.f32 %v1836_v41 }
 0x484   : > { %v4215_v59 = vsel %vm1185_vm2, %v1874_v30, %v1905_v63  ;;  %v4484_v30 = vld [vmem:[#allocation36_spill] sm:$0xff] }
 0x486   : > { %2001 = vxpose.xlu2.c.b16.cont [5/7] (short) (narrow) %v4475_v37, 32  ;;  %v4481_v37 = vld [vmem:[#allocation26_spill] sm:$0xff] }
 0x487   : > { %v1870_v63 = vmul.f32 %v3894_v21, %v4481_v37 }
 0x488   : > { %v1784_v19 = vpop.xlane.xlu2 %1783 }
 0x489   : > { %v4206_v16 = vpop.eup %2763 }
 0x48a   : > { %v1907_v18 = vmul.f32 %v4206_v16, %v3860_v23 }
 0x48c   : > { %v4218_v47 = vsel %vm1185_vm2, %v1876_v52, %v1907_v18  ;;  %v4483_v52 = vld [vmem:[#allocation48_spill] sm:$0xff] }
 0x48d   : > { %v1951_v42 = vpack.c.bf16 %v4218_v47, %v4215_v59  ;;  %v1872_v26 = vmul.f32 %v4483_v52, %v4482_v58  ;;  %v4500_v52 = vld [vmem:[#allocation46_spill] sm:$0xff] }
 0x48e   : > { %v1824_v54 = vpop.xlane.xlu1 %1823 }
 0x48f   : > { %v1843_v51 = vmul.f32 2.0, %v1824_v54  ;;  %v4485_v54 = vld [vmem:[#allocation49_spill] sm:$0xff] }
 0x490   : > { %v1780_v34 = vpop.xlane.xlu2 %1779 }
 0x491   : > { %2765 = vrcp.f32 %v1843_v51  ;;  %v1832_v45 = vmul.f32 2.0, %v1780_v34  ;;  %v4486_v51 = vld [vmem:[#allocation32_spill] sm:$0xff] }
 0x496   : > { %2002 = vxpose.xlu2.c.b16.cont [6/7] (short) (narrow) %v4478_v0, 32  ;;  %v1884_v0 = vmul.f32 %v4085_v62, %v4485_v54 }
 0x497   : > { %v2766_v8 = vpop.eup %2765 }
 0x498   : > { %v1921_v23 = vmul.f32 %v2766_v8, %v4071_v25  ;;  %v1922_v33 = vmul.f32 %v2766_v8, %v4019_v14  ;;  %v1918_v14 = vmul.f32 %v4157_v15, %v4025_v31  ;;  %v1833_v15 = vmul.f32 2.0, %v1784_v19 }
 0x49a   : > { %v1939_v46 = vsel %vm1185_vm2, %v1890_v6, %v1921_v23  ;;  %v1961_v57 = vpack.c.bf16 %v1920_v7, %v1918_v14  ;;  %v4487_v23 = vld [vmem:[#allocation51_spill] sm:$0xff] }
 0x49c   : > { %v4245_v27 = vsel %vm1348_vm4, %v1961_v57, 0 }
 0x49e   : > { %v1828_v32 = vpop.xlane.xlu0 %1827 }
 0x49f   : > { %v1844_v17 = vmul.f32 2.0, %v1828_v32 }
 0x4a1   : > { %2767 = vrcp.f32 %v1844_v17 }
 0x4a2   : > { %2769 = vrcp.f32 %v1833_v15 }
 0x4a6   : > { %2003 = vxpose.xlu2.c.b16.end [7/7] (short) (narrow) %v4479_v49, 32  ;;  %v4488_v49 = vld [vmem:[#allocation52_spill] sm:$0xff] }
 0x4a7   : > { %v2768_v56 = vpop.eup %2767 }
 0x4a8   : > { %v1923_v24 = vmul.f32 %v2768_v56, %v4077_v22  ;;  %v1924_v12 = vmul.f32 %v2768_v56, %v4081_v10  ;;  %v1657_v22 = vpop.permute.xlu1 %1656  ;;  %v2770_v60 = vpop.eup %2769  ;;  %v1882_v56 = vmul.f32 %v4488_v49, %v4487_v23 }
 0x4aa   : > { %v1940_v38 = vsel %vm1185_vm2, %v1892_v1, %v1923_v24  ;;  %v1964_v25 = vpack.c.bf16 %v1924_v12, %v1922_v33  ;;  %v4489_v24 = vld [vmem:[#allocation35_spill] sm:$0xff]  ;;  %v4490_v12 = vld [vmem:[#allocation34_spill] sm:$0xff] }
 0x4ab   : > { %v1963_v53 = vpack.c.bf16 %v1940_v38, %v1939_v46  ;;  %v4491_v38 = vld [vmem:[#allocation37_spill] sm:$0xff] }
 0x4ac   : > { %v4235_v48 = vsel %vm1348_vm4, %v1964_v25, 0 }
 0x4ad   : > { %2062 = vmatpush.bf16.xpose.msra.mxu3 %v1963_v53  ;;  %2081 = vmatpush.bf16.xpose.msrb.mxu2 %v4235_v48 }
 0x4b1   : > { %v1659_v10 = vpop.permute.xlu0 %1658 }
 0x4b2   : > { %v1718_v28 = vsel %vm1716_vm5, %v1657_v22, %v1659_v10  ;;  %v1769_v2 = vsel %vm1185_vm2, %v1659_v10, 0.0 }
 0x4b3   : > { %v1770_v39 = vadd.f32 %v1769_v2, %v1718_v28  ;;  %v4492_v28 = vld [vmem:[#allocation50_spill] sm:$0xff] }
 0x4b4   : > { %v1912_v2 = vmul.f32 %v4185_v29, %v4492_v28 }
 0x4b5   : > { %2063 = vmatpush.bf16.xpose.msra.mxu3 %v1960_v44  ;;  %2082 = vmatpush.bf16.xpose.msrb.mxu2 %v4245_v27  ;;  %v1901_v44 = vmul.f32 %v2770_v60, %v4480_v40 }
 0x4b6   : > { %1771 = vadd.xlane.f32.xlu0 %v1770_v39  ;;  %v4493_v39 = vld [vmem:[#allocation23_spill] sm:$0xff] }
 0x4b7   : > { %v1929_v6 = vsel %vm1185_vm2, %v1870_v63, %v1901_v44 }
 0x4d1   : > { %v1808_v31 = vpop.xlane.xlu1 %1807 }
 0x4d2   : > { %v1839_v36 = vmul.f32 2.0, %v1808_v31  ;;  %v4494_v31 = vld [vmem:[#allocation47_spill] sm:$0xff] }
 0x4d3   : > { %v1910_v15 = vmul.f32 %v4180_v4, %v4494_v31  ;;  %v1908_v4 = vmul.f32 %v4206_v16, %v4500_v52 }
 0x4d4   : > { %2771 = vrcp.f32 %v1839_v36 }
 0x4d5   : > { %v1955_v44 = vpack.c.bf16 %v1912_v2, %v1910_v15 }
 0x4d7   : > { %v2032_v58 = vsel %vm1348_vm4, %v1955_v44, 0 }
 0x4d9   : > { %v1788_v61 = vpop.xlane.xlu1 %1787 }
 0x4da   : > { %v1834_v13 = vmul.f32 2.0, %v1788_v61  ;;  %v2772_v50 = vpop.eup %2771  ;;  %v4495_v61 = vld [vmem:[#allocation24_spill] sm:$0xff] }
 0x4db   : > { %v1913_v32 = vmul.f32 %v2772_v50, %v4486_v51  ;;  %v1914_v46 = vmul.f32 %v2772_v50, %v4490_v12  ;;  %v4499_v50 = vld [vmem:[#allocation19_spill] sm:$0xff]  ;;  %v4509_v12 = vld [vmem:[#allocation22_spill] sm:$0xff] }
 0x4dc   : > { %2773 = vrcp.f32 %v1834_v13  ;;  %v1812_v5 = vpop.xlane.xlu0 %1811  ;;  %v4496_v13 = vld [vmem:[#allocation44_spill] sm:$0xff] }
 0x4dd   : > { %v1840_v20 = vmul.f32 2.0, %v1812_v5  ;;  %v1935_v62 = vsel %vm1185_vm2, %v1882_v56, %v1913_v32  ;;  %v1866_v34 = vmul.f32 %v4496_v13, %v4495_v61  ;;  %v4497_v5 = vld [vmem:[#allocation27_spill] sm:$0xff]  ;;  %v4503_v32 = vld [vmem:[#allocation33_spill] sm:$0xff]  ;;  %v4506_v56 = vld [vmem:[#allocation20_spill] sm:$0xff] }
 0x4de   : > { %v1902_v16 = vmul.f32 %v2770_v60, %v4503_v32 }
 0x4df   : > { %2775 = vrcp.f32 %v1840_v20  ;;  %v4498_v20 = vld [vmem:[#allocation45_spill] sm:$0xff] }
 0x4e0   : > { %2777 = vrcp.f32 %v1832_v45  ;;  %v1868_v45 = vmul.f32 %v4498_v20, %v4497_v5 }
 0x4e2   : > { %v2774_v41 = vpop.eup %2773 }
 0x4e3   : > { %v1903_v18 = vmul.f32 %v2774_v41, %v4484_v30 }
 0x4e4   : > { %v1776_v17 = vpop.xlane.xlu0 %1775 }
 0x4e5   : > { %v2776_v8 = vpop.eup %2775  ;;  %v1831_v1 = vmul.f32 2.0, %v1776_v17  ;;  %v1930_v21 = vsel %vm1185_vm2, %v1872_v26, %v1903_v18  ;;  %v4501_v26 = vld [vmem:[#allocation30_spill] sm:$0xff] }
 0x4e6   : > { %v1915_v33 = vmul.f32 %v2776_v8, %v4489_v24  ;;  %v1916_v25 = vmul.f32 %v2776_v8, %v4491_v38  ;;  %v1948_v53 = vpack.c.bf16 %v1930_v21, %v1929_v6  ;;  %v2778_v57 = vpop.eup %2777  ;;  %v1906_v30 = vmul.f32 %v4201_v35, %v4501_v26  ;;  %v4505_v35 = vld [vmem:[#allocation25_spill] sm:$0xff]  ;;  %v4507_v21 = vld [vmem:[#allocation16_spill] sm:$0xff]  ;;  %v4508_v24 = vld [vmem:[#allocation42_spill] sm:$0xff] }
 0x4e7   : > { %2779 = vrcp.f32 %v1831_v1  ;;  %v1899_v19 = vmul.f32 %v2778_v57, %v4493_v39  ;;  %v1900_v8 = vmul.f32 %v2778_v57, %v4505_v35  ;;  %v2005_v39 = vpop.trf.xlu2 }
 0x4e8   : > { %v1936_v7 = vsel %vm1185_vm2, %v1884_v0, %v1915_v33  ;;  %v1958_v14 = vpack.c.bf16 %v1916_v25, %v1914_v46  ;;  %v1952_v18 = vpack.c.bf16 %v1908_v4, %v1906_v30  ;;  %v4502_v0 = vld [vmem:[#allocation28_spill] sm:$0xff]  ;;  %v1862_v33 = vmul.f32 %v4508_v24, %v4507_v21  ;;  %v4510_v46 = vld [vmem:[#allocation43_spill] sm:$0xff] }
 0x4e9   : > { %v1957_v22 = vpack.c.bf16 %v1936_v7, %v1935_v62  ;;  %v1928_v29 = vsel %vm1185_vm2, %v1868_v45, %v1899_v19  ;;  %v1904_v51 = vmul.f32 %v2774_v41, %v4502_v0  ;;  %v1768_v41 = vpop.xlane.xlu1 %1767  ;;  %v1864_v38 = vmul.f32 %v4510_v46, %v4509_v12 }
 0x4ea   : > { %v2035_v10 = vsel %vm1348_vm4, %v1958_v14, 0  ;;  %v2029_v54 = vsel %vm1348_vm4, %v1952_v18, 0  ;;  %v1829_v59 = vmul.f32 2.0, %v1768_v41 }
 0x4eb   : > { %2064 = vmatpush.bf16.xpose.msra.mxu3 %v1957_v22  ;;  %2083 = vmatpush.bf16.xpose.msrb.mxu2 %v2035_v10  ;;  %v1949_v17 = vpack.c.bf16 %v1904_v51, %v1902_v16 }
 0x4ec   : > { %2781 = vrcp.f32 %v1829_v59 }
 0x4ed   : > { %v2780_v36 = vpop.eup %2779  ;;  %v2026_v3 = vsel %vm1348_vm4, %v1949_v17, 0 }
 0x4ee   : > { %v1897_v40 = vmul.f32 %v2780_v36, %v4499_v50 }
 0x4f0   : > { %v1927_v37 = vsel %vm1185_vm2, %v1866_v34, %v1897_v40 }
 0x4f1   : > { %v1945_v63 = vpack.c.bf16 %v1928_v29, %v1927_v37 }
 0x4f2   : > { %v2782_v60 = vpop.eup %2781 }
 0x4f3   : > { %2065 = vmatpush.bf16.xpose.msra.mxu3 %v1954_v9  ;;  %2084 = vmatpush.bf16.xpose.msrb.mxu2 %v2032_v58  ;;  %v1898_v9 = vmul.f32 %v2780_v36, %v4504_v43  ;;  %v1893_v1 = vmul.f32 %v2782_v60, %v4506_v56 }
 0x4f5   : > { %v1946_v23 = vpack.c.bf16 %v1900_v8, %v1898_v9  ;;  %v1925_v14 = vsel %vm1185_vm2, %v1862_v33, %v1893_v1 }
 0x4f7   : > { %v2023_v49 = vsel %vm1348_vm4, %v1946_v23, 0 }
 0x4fb   : > { %2066 = vmatpush.bf16.xpose.msra.mxu3 %v1951_v42  ;;  %2085 = vmatpush.bf16.xpose.msrb.mxu2 %v2029_v54 }
 0x503   : > { %2067 = vmatpush.bf16.xpose.msra.mxu3 %v1948_v53  ;;  %2086 = vmatpush.bf16.xpose.msrb.mxu2 %v2026_v3  ;;  %v4511_v53 = vld [vmem:[#allocation18_spill] sm:$0xff] }
 0x504   : > { %v1894_v62 = vmul.f32 %v2782_v60, %v4511_v53 }
 0x50b   : > { %2068 = vmatpush.bf16.xpose.msra.mxu3 %v1945_v63  ;;  %2087 = vmatpush.bf16.xpose.msrb.mxu2 %v2023_v49 }
 0x529   : > { %v1772_v47 = vpop.xlane.xlu0 %1771 }
 0x52a   : > { %v1830_v42 = vmul.f32 2.0, %v1772_v47 }
 0x52c   : > { %2783 = vrcp.f32 %v1830_v42 }
 0x532   : > { %v2784_v6 = vpop.eup %2783 }
 0x533   : > { %v1895_v25 = vmul.f32 %v2784_v6, %v4131_v11  ;;  %v1896_v7 = vmul.f32 %v2784_v6, %v4141_v55  ;;  %v2006_v11 = vpop.trf.xlu2  ;;  %v2052_v55 = vpop.f32.mrf.mxu3 }
 0x535   : > { %v1926_v57 = vsel %vm1185_vm2, %v1864_v38, %v1895_v25  ;;  %v1943_v22 = vpack.c.bf16 %v1896_v7, %v1894_v62 }
 0x536   : > { %v1942_v28 = vpack.c.bf16 %v1926_v57, %v1925_v14 }
 0x537   : > { %v2020_v2 = vsel %vm1348_vm4, %v1943_v22, 0 }
 0x538   : > { %2069 = vmatpush.bf16.xpose.msra.mxu3 %v1942_v28  ;;  %2088 = vmatpush.bf16.xpose.msrb.mxu2 %v2020_v2 }
 0x53b   : > { %v2054_v19 = vpop.f32.mrf.mxu3 }
 0x53f   : > { %2495 = vmatmul.lmr.bf16.vlgmr.msra.gmra.4.mxu3  ;;  %2427 = vmatmul.msk.bf16.vlgmr.msrb.gmra.mxu2 %vm1348_vm4, %v2005_v39 }
 0x540   : > { %2459 = vmatpush.bf16.xpose.msra.mxu3 %v4235_v48 }
 0x543   : > { %v2057_v31 = vpop.f32.mrf.mxu3 }
 0x547   : > { %2496 = vmatmul.lmr.bf16.gmra.4.mxu3 }
 0x548   : > { %2460 = vmatpush.bf16.xpose.msra.mxu3 %v4245_v27 }
 0x54b   : > { %v2059_v15 = vpop.f32.mrf.mxu3 }
 0x54f   : > { %2497 = vmatmul.lmr.bf16.gmra.4.mxu3 }
 0x550   : > { %2461 = vmatpush.bf16.xpose.msra.mxu3 %v2035_v10 }
 0x557   : > { %2498 = vmatmul.lmr.bf16.gmra.4.mxu3 }
 0x558   : > { %2462 = vmatpush.bf16.xpose.msra.mxu3 %v2032_v58 }
 0x560   : > { %2463 = vmatpush.bf16.xpose.msra.mxu3 %v2029_v54 }
 0x568   : > { %2464 = vmatpush.bf16.xpose.msra.mxu3 %v2026_v3 }
 0x570   : > { %2465 = vmatpush.bf16.xpose.msra.mxu3 %v2023_v49 }
 0x578   : > { %2466 = vmatpush.bf16.xpose.msra.mxu3 %v2020_v2 }
 0x57f   : > { %2428 = vmatmul.msk.bf16.vlgmr.msra.gmra.mxu3 %vm1348_vm4, %v2006_v11 }
 0x5c2   : > { %v2071_v48 = vpop.f32.mrf.mxu3  ;;  %v2090_v36 = vpop.f32.mrf.mxu2 }
 0x5c3   : > { %v2072_v27 = vadd.f32 %v2071_v48, %v2052_v55 }
 0x5c5   : > { %v2091_v61 = vadd.f32 %v2090_v36, %v2072_v27 }
 0x5c7   : > { %2100 = vst [vmem:[%s642_s28] sm:$0xff] %v2091_v61 }
 0x5ca   : > { %v2073_v10 = vpop.f32.mrf.mxu3  ;;  %v2092_v13 = vpop.f32.mrf.mxu2 }
 0x5cb   : > { %v2074_v34 = vadd.f32 %v2073_v10, %v2054_v19 }
 0x5cd   : > { %v2093_v5 = vadd.f32 %v2092_v13, %v2074_v34 }
 0x5ce   : > { %v2151_v58 = vld [vmem:[%s642_s28] sm:$0xff] (%p2986_p9) }
 0x5cf   : > { %2101 = vst [vmem:[%s642_s28 + $0x8] sm:$0xff] %v2093_v5 }
 0x5d0   : > { %2152 = vst [vmem:[%s2116_s7] sm:$0xff] (%p2986_p9), %v2151_v58 }
 0x5d2   : > { %v2076_v20 = vpop.f32.mrf.mxu3 }
 0x5d3   : > { %v2077_v50 = vadd.f32 %v2076_v20, %v2057_v31 }
 0x5d6   : > { %v2153_v52 = vld [vmem:[%s642_s28 + $0x8] sm:$0xff] (%p2986_p9) }
 0x5d7   : > { %2154 = vst [vmem:[%s2116_s7 + $0x10] sm:$0xff] (%p2986_p9), %v2153_v52 }
 0x5da   : > { %v2078_v45 = vpop.f32.mrf.mxu3 }
 0x5db   : > { %v2079_v37 = vadd.f32 %v2078_v45, %v2059_v15 }
 0x602   : > { %v2095_v40 = vpop.f32.mrf.mxu3 }
 0x603   : > { %v2096_v44 = vadd.f32 %v2095_v40, %v2077_v50 }
 0x605   : > { %2102 = vst [vmem:[%s642_s28 + $0x10] sm:$0xff] %v2096_v44 }
 0x609   : > { %2110 = sbr.rel (!%p2986_p9) target bundleno = 1558 (0x616), region = 118 }
 0x60a   : > { %v2097_v29 = vpop.f32.mrf.mxu3 }
 0x60b   : > { %v2098_v63 = vadd.f32 %v2097_v29, %v2079_v37 }
 0x60c   : > { %v2155_v4 = vld [vmem:[%s642_s28 + $0x10] sm:$0xff] (%p2986_p9) }
 0x60d   : > { %2103 = vst [vmem:[%s642_s28 + $0x18] sm:$0xff] %v2098_v63 }
 0x60e   : > { %2156 = vst [vmem:[%s2116_s7 + $0x20] sm:$0xff] %v2155_v4 }
 0x614   : > { %v2157_v26 = vld [vmem:[%s642_s28 + $0x18] sm:$0xff] }
 0x615   : > { %2158 = vst [vmem:[%s2116_s7 + $0x30] sm:$0xff] %v2157_v26 }
 0x616 PF: > { %s13_s22 = sadd.s32 1, %s2871_s22   ;;  %s4512_s4 = sld [smem:[#allocation5_spill]] }
 0x617   : > { %p10_p2 = scmp.ge.s32.totalorder %s13_s22, 10   ;;  %s4513_s9 = sld [smem:[#allocation6_spill]] }
 0x618   : > { %s4514_s12 = smov %s2835_s13  ;;  %s4515_s13 = smov %s2995_s10 }
 0x619   : > { %s4516_s14 = smov %s2843_s15  ;;  %s4517_s15 = smov %s2998_s11 }
 0x61a   : > { %s4518_s16 = smov %s2859_s19  ;;  %s4519_s17 = smov %s2863_s20 }
 0x61b   : > { %s4520_s18 = smov %s2867_s21  ;;  %s4521_s19 = smov %s4525_s23 }
 0x61c   : > { %s4522_s20 = smov %s4512_s4  ;;  %12 = sbr.rel (!%p10_p2) target bundleno = 6 (0x6), region = 197 }
 0x61d   : > { %s4523_s21 = smov %s4513_s9 }

</bundles_post_ra>
